<compile_context>
chip_gen: v7x
topology: tpu7x:2x2x1
jax: 0.10.0
libtpu: 0.0.40
codegen_flags: <defaults>
</compile_context>

<pallas_src>
import functools
import math

import numpy as np
import jax
import jax.numpy as jnp
from jax.experimental import pallas as pl
from jax.experimental.pallas import tpu as pltpu


def _leaky_relu(v, slope=0.2):
    return jnp.where(v >= 0, v, slope * v)


def _tap_masks(h, w, k):
    """(k*k, h*w) float32 0/1 boundary masks, tap order t = ky*k + kx."""
    pad = (k - 1) // 2
    ys, xs = np.mgrid[0:h, 0:w]
    rows = []
    for ky in range(k):
        for kx in range(k):
            dy, dx = ky - pad, kx - pad
            ok = (ys + dy >= 0) & (ys + dy < h) & (xs + dx >= 0) & (xs + dx < w)
            rows.append(ok.reshape(-1))
    return jnp.asarray(np.stack(rows).astype(np.float32))


def _bottleneck_kernel(x_ref, m_ref, w1_ref, b1_ref, w2_ref, b2_ref,
                       w3_ref, b3_ref, o_ref, *, k, h, w):
    """One batch element per grid step; all intermediates stay in vregs.

    x_ref  : (1, cin, hw)        VMEM  flattened NCHW input (lane-dense)
    m_ref  : (k*k, hw)           VMEM  precomputed 0/1 boundary masks per tap
    w1_ref : (k*k*cin, cmid, 1)  VMEM  conv1 weight columns per (tap, c_in)
    w2_ref : (cmid, cmid, 1)     VMEM  conv2 (1x1) weight columns per c_in
    w3_ref : (k*k*cmid, cmid, 1) VMEM  conv3 weight columns per (tap, c_in)
    b*_ref : (cmid, 1)           VMEM
    o_ref  : (1, cmid, hw)       VMEM  output (single lane-dense store)
    """
    hw = h * w
    kk = k * k
    pad = (k - 1) // 2
    cin = x_ref.shape[1]
    cmid = b1_ref.shape[0]

    # Static flat-spatial roll amounts per (ky, kx) tap.  out[p] needs
    # in[p + dy*w + dx]; jnp.roll/pltpu.roll semantics => roll by -(dy*w+dx).
    shifts = [(-((ky - pad) * w + (kx - pad))) % hw
              for ky in range(k) for kx in range(k)]

    # Boundary masks loaded once, outside every tap loop (no iota/div in-kernel).
    masks = m_ref[...]                                    # (k*k, hw) f32 0/1

    def mix(acc, slab, w_ref, base, c_in):
        # acc (cmid, hw) += sum_c  w[:, c] (cmid, 1) * slab[c] (1, hw)
        # -> dense sublane/lane-broadcast FMAs on full (8, 256) slabs, exact f32.
        for c in range(c_in):
            acc = acc + w_ref[base + c] * slab[c:c + 1]
        return acc

    def conv_kxk(slab, w_ref, b_ref, c_in):
        # KxK conv on the flattened slab: each tap is an XLU lane-roll of the
        # vreg-resident slab times a boundary mask (no padded scratch, no
        # unaligned re-slicing).  k*k = 9 -> small static unroll, tiny live set.
        acc = jnp.zeros((cmid, hw), jnp.float32)
        for t in range(kk):
            if shifts[t] == 0:
                tap = slab                               # centre tap: no shift/mask
            else:
                tap = pltpu.roll(slab, shifts[t], axis=1) * masks[t:t + 1]
            acc = mix(acc, tap, w_ref, t * c_in, c_in)
        return acc + b_ref[...]

    x_slab = x_ref[0].astype(jnp.float32)                # (cin, hw), stays in vregs

    t1 = _leaky_relu(conv_kxk(x_slab, w1_ref, b1_ref, cin))            # conv1+lrelu
    t2 = _leaky_relu(mix(jnp.zeros((cmid, hw), jnp.float32),
                         t1, w2_ref, 0, cmid) + b2_ref[...])           # conv2+lrelu
    out = conv_kxk(t2, w3_ref, b3_ref, cmid)                           # conv3

    o_ref[0] = out.astype(o_ref.dtype)                   # one full lane-dense store


@functools.partial(jax.jit, static_argnames=("kernel_size",))
def bottleneck_forward(x, params, *, kernel_size):
    """x: [N, C_in, H, W] float32 (NCHW). Returns [N, C_out, H, W]."""
    w1, b1, w2, b2, w3, b3 = params
    n, cin, h, w = x.shape
    cmid = int(b1.shape[0])
    k = int(kernel_size)
    hw = h * w

    # Lane-dense layout: flatten spatial (contiguous reshape; no pad, no transpose).
    x_flat = x.reshape(n, cin, hw)

    # Weight columns for the sublane-broadcast FMA mix:
    #   row index = (ky*k + kx)*c_in + c, column = output channel.
    w1_cols = jnp.transpose(w1, (2, 3, 1, 0)).reshape(k * k * cin, cmid, 1)
    w2_cols = jnp.transpose(w2.reshape(cmid, cmid), (1, 0)).reshape(cmid, cmid, 1)
    w3_cols = jnp.transpose(w3, (2, 3, 1, 0)).reshape(k * k * cmid, cmid, 1)
    b1c = b1.reshape(cmid, 1)
    b2c = b2.reshape(cmid, 1)
    b3c = b3.reshape(cmid, 1)

    masks = _tap_masks(h, w, k)                           # (k*k, hw) constant

    kernel = functools.partial(_bottleneck_kernel, k=k, h=h, w=w)

    def full_spec(shape):
        return pl.BlockSpec(shape, lambda i, _n=len(shape): (0,) * _n)

    flops = 2 * n * hw * (cmid * cin * k * k + cmid * cmid + cmid * cmid * k * k)
    bytes_accessed = 4 * (x_flat.size + n * cmid * hw + masks.size
                          + w1_cols.size + w2_cols.size + w3_cols.size + 3 * cmid)

    y_flat = pl.pallas_call(
        kernel,
        out_shape=jax.ShapeDtypeStruct((n, cmid, hw), x.dtype),
        grid=(n,),
        in_specs=[
            pl.BlockSpec((1, cin, hw), lambda i: (i, 0, 0)),
            full_spec(masks.shape),
            full_spec(w1_cols.shape), full_spec(b1c.shape),
            full_spec(w2_cols.shape), full_spec(b2c.shape),
            full_spec(w3_cols.shape), full_spec(b3c.shape),
        ],
        out_specs=pl.BlockSpec((1, cmid, hw), lambda i: (i, 0, 0)),
        compiler_params=pltpu.CompilerParams(
            dimension_semantics=("parallel",)),
        cost_estimate=pl.CostEstimate(flops=flops, transcendentals=0,
                                      bytes_accessed=bytes_accessed),
    )(x_flat, masks, w1_cols, b1c, w2_cols, b2c, w3_cols, b3c)

    return y_flat.reshape(n, cmid, h, w)


class Bottleneck:
    """JAX/Pallas port of the PyTorch Bottleneck module (forward pass)."""

    def __init__(self, in_channels, out_channels, kernel_size, key=None):
        if key is None:
            key = jax.random.PRNGKey(0)
        k1, k2 = jax.random.split(key, 2)
        ks = kernel_size

        def xavier(rng, shape, scale):
            fan_in = shape[1] * shape[2] * shape[3]
            fan_out = shape[0] * shape[2] * shape[3]
            std = math.sqrt(2.0 / (fan_in + fan_out))
            return scale * std * jax.random.normal(rng, shape, jnp.float32)

        # conv1 / conv2: xavier_normal_ * 0.1, zero bias.
        w1 = xavier(k1, (out_channels, in_channels, ks, ks), 0.1)
        b1 = jnp.zeros((out_channels,), jnp.float32)
        w2 = xavier(k2, (out_channels, out_channels, 1, 1), 0.1)
        b2 = jnp.zeros((out_channels,), jnp.float32)
        # conv3: initialize_weights(conv3, 0) -> kaiming init * 0 == zeros.
        w3 = jnp.zeros((out_channels, out_channels, ks, ks), jnp.float32)
        b3 = jnp.zeros((out_channels,), jnp.float32)

        self.kernel_size = ks
        self.params = (w1, b1, w2, b2, w3, b3)

    def __call__(self, x):
        return bottleneck_forward(x, self.params, kernel_size=self.kernel_size)


# ---------------- pure-JAX reference (for correctness checks) ----------------
def _conv2d_nchw(x, w, b, pad):
    out = jax.lax.conv_general_dilated(
        x, w, window_strides=(1, 1),
        padding=((pad, pad), (pad, pad)),
        dimension_numbers=("NCHW", "OIHW", "NCHW"),
        precision=jax.lax.Precision.HIGHEST)
    return out + b[None, :, None, None]


def bottleneck_reference(x, params, kernel_size):
    w1, b1, w2, b2, w3, b3 = params
    pad = (kernel_size - 1) // 2
    t1 = _leaky_relu(_conv2d_nchw(x, w1, b1, pad))
    t2 = _leaky_relu(_conv2d_nchw(t1, w2, b2, 0))
    return _conv2d_nchw(t2, w3, b3, pad)


if __name__ == "__main__":
    N, C_IN, C_OUT, H, W, K = 2, 4, 8, 16, 16, 3
    x = jax.random.normal(jax.random.PRNGKey(0), (N, C_IN, H, W), dtype=jnp.float32)

    # 1) Module with its faithful initialization (conv3 weights are zero,
    #    matching initialize_weights(self.conv3, 0) in the PyTorch code).
    layer = Bottleneck(C_IN, C_OUT, K, key=jax.random.PRNGKey(1))
    y = jax.block_until_ready(layer(x))
    y_ref = bottleneck_reference(x, layer.params, K)
    assert y.shape == (N, C_OUT, H, W)
    assert jnp.allclose(y, y_ref, atol=1e-4, rtol=1e-4), "module forward mismatch"

    # 2) Non-degenerate weights (conv3 != 0, larger scales) to exercise the
    #    full fused pipeline numerically.
    kw, kb = jax.random.split(jax.random.PRNGKey(2))
    w1, b1, w2, b2, _, _ = layer.params
    w3_nd = 0.1 * jax.random.normal(kw, (C_OUT, C_OUT, K, K), jnp.float32)
    b3_nd = 0.05 * jax.random.normal(kb, (C_OUT,), jnp.float32)
    params_nd = (10.0 * w1, b1, 10.0 * w2, b2, w3_nd, b3_nd)
    y2 = jax.block_until_ready(bottleneck_forward(x, params_nd, kernel_size=K))
    y2_ref = bottleneck_reference(x, params_nd, K)
    max_err = float(jnp.max(jnp.abs(y2 - y2_ref)))
    assert jnp.allclose(y2, y2_ref, atol=1e-4, rtol=1e-4), \
        f"fused kernel mismatch (max err {max_err})"

    print("KERNEL_OK")
</pallas_src>

<mosaic_0001>
module attributes {stable_mosaic.version = 11 : i64} {
  func.func @_bottleneck_kernel(%arg0: i32, %arg1: memref<1x4x256xf32, #tpu.memory_space<vmem>>, %arg2: memref<9x256xf32, #tpu.memory_space<vmem>>, %arg3: memref<36x8x1xf32, #tpu.memory_space<vmem>>, %arg4: memref<8x1xf32, #tpu.memory_space<vmem>>, %arg5: memref<8x8x1xf32, #tpu.memory_space<vmem>>, %arg6: memref<8x1xf32, #tpu.memory_space<vmem>>, %arg7: memref<72x8x1xf32, #tpu.memory_space<vmem>>, %arg8: memref<8x1xf32, #tpu.memory_space<vmem>>, %arg9: memref<1x8x256xf32, #tpu.memory_space<vmem>>) attributes {dimension_semantics = [#tpu.dimension_semantics<parallel>], iteration_bounds = array<i64: 2>, scalar_prefetch = 0 : i64, scratch_operands = 0 : i64, tpu.core_type = #tpu.core_type<tc>, window_params = [{transform_indices = @transform_0, window_bounds = array<i64: 1, 4, 256>}, {pipeline_mode = #tpu.pipeline_mode<synchronous>, transform_indices = @transform_1, window_bounds = array<i64: 9, 256>}, {pipeline_mode = #tpu.pipeline_mode<synchronous>, transform_indices = @transform_2, window_bounds = array<i64: 36, 8, 1>}, {pipeline_mode = #tpu.pipeline_mode<synchronous>, transform_indices = @transform_3, window_bounds = array<i64: 8, 1>}, {pipeline_mode = #tpu.pipeline_mode<synchronous>, transform_indices = @transform_4, window_bounds = array<i64: 8, 8, 1>}, {pipeline_mode = #tpu.pipeline_mode<synchronous>, transform_indices = @transform_5, window_bounds = array<i64: 8, 1>}, {pipeline_mode = #tpu.pipeline_mode<synchronous>, transform_indices = @transform_6, window_bounds = array<i64: 72, 8, 1>}, {pipeline_mode = #tpu.pipeline_mode<synchronous>, transform_indices = @transform_7, window_bounds = array<i64: 8, 1>}, {transform_indices = @transform_8, window_bounds = array<i64: 1, 8, 256>}]} {
    %c0 = arith.constant 0 : index
    %c0_0 = arith.constant 0 : index
    %0 = vector.load %arg2[%c0, %c0_0] : memref<9x256xf32, #tpu.memory_space<vmem>>, vector<9x256xf32>
    %c0_1 = arith.constant 0 : index
    %c0_2 = arith.constant 0 : index
    %c0_3 = arith.constant 0 : index
    %1 = vector.load %arg1[%c0_1, %c0_2, %c0_3] : memref<1x4x256xf32, #tpu.memory_space<vmem>>, vector<1x4x256xf32>
    %2 = vector.shape_cast %1 : vector<1x4x256xf32> to vector<4x256xf32>
    %cst = arith.constant 0.000000e+00 : f32
    %3 = vector.broadcast %cst : f32 to vector<8x256xf32>
    %c17_i32 = arith.constant 17 : i32
    %4 = tpu.dynamic_rotate %2 by %c17_i32 dim 1 : vector<4x256xf32>, i32 -> vector<4x256xf32>
    %5 = vector.extract_strided_slice %0 {offsets = [0, 0], sizes = [1, 256], strides = [1, 1]} : vector<9x256xf32> to vector<1x256xf32>
    %6 = vector.broadcast %5 : vector<1x256xf32> to vector<4x256xf32>
    %7 = arith.mulf %4, %6 : vector<4x256xf32>
    %c0_4 = arith.constant 0 : index
    %c0_5 = arith.constant 0 : index
    %c0_6 = arith.constant 0 : index
    %8 = vector.load %arg3[%c0_4, %c0_5, %c0_6] : memref<36x8x1xf32, #tpu.memory_space<vmem>>, vector<1x8x1xf32>
    %9 = vector.shape_cast %8 : vector<1x8x1xf32> to vector<8x1xf32>
    %10 = vector.extract_strided_slice %7 {offsets = [0, 0], sizes = [1, 256], strides = [1, 1]} : vector<4x256xf32> to vector<1x256xf32>
    %11 = vector.broadcast %9 : vector<8x1xf32> to vector<8x256xf32>
    %12 = vector.broadcast %10 : vector<1x256xf32> to vector<8x256xf32>
    %13 = arith.mulf %11, %12 : vector<8x256xf32>
    %14 = arith.addf %3, %13 : vector<8x256xf32>
    %c1 = arith.constant 1 : index
    %c0_7 = arith.constant 0 : index
    %c0_8 = arith.constant 0 : index
    %15 = vector.load %arg3[%c1, %c0_7, %c0_8] : memref<36x8x1xf32, #tpu.memory_space<vmem>>, vector<1x8x1xf32>
    %16 = vector.shape_cast %15 : vector<1x8x1xf32> to vector<8x1xf32>
    %17 = vector.extract_strided_slice %7 {offsets = [1, 0], sizes = [1, 256], strides = [1, 1]} : vector<4x256xf32> to vector<1x256xf32>
    %18 = vector.broadcast %16 : vector<8x1xf32> to vector<8x256xf32>
    %19 = vector.broadcast %17 : vector<1x256xf32> to vector<8x256xf32>
    %20 = arith.mulf %18, %19 : vector<8x256xf32>
    %21 = arith.addf %14, %20 : vector<8x256xf32>
    %c2 = arith.constant 2 : index
    %c0_9 = arith.constant 0 : index
    %c0_10 = arith.constant 0 : index
    %22 = vector.load %arg3[%c2, %c0_9, %c0_10] : memref<36x8x1xf32, #tpu.memory_space<vmem>>, vector<1x8x1xf32>
    %23 = vector.shape_cast %22 : vector<1x8x1xf32> to vector<8x1xf32>
    %24 = vector.extract_strided_slice %7 {offsets = [2, 0], sizes = [1, 256], strides = [1, 1]} : vector<4x256xf32> to vector<1x256xf32>
    %25 = vector.broadcast %23 : vector<8x1xf32> to vector<8x256xf32>
    %26 = vector.broadcast %24 : vector<1x256xf32> to vector<8x256xf32>
    %27 = arith.mulf %25, %26 : vector<8x256xf32>
    %28 = arith.addf %21, %27 : vector<8x256xf32>
    %c3 = arith.constant 3 : index
    %c0_11 = arith.constant 0 : index
    %c0_12 = arith.constant 0 : index
    %29 = vector.load %arg3[%c3, %c0_11, %c0_12] : memref<36x8x1xf32, #tpu.memory_space<vmem>>, vector<1x8x1xf32>
    %30 = vector.shape_cast %29 : vector<1x8x1xf32> to vector<8x1xf32>
    %31 = vector.extract_strided_slice %7 {offsets = [3, 0], sizes = [1, 256], strides = [1, 1]} : vector<4x256xf32> to vector<1x256xf32>
    %32 = vector.broadcast %30 : vector<8x1xf32> to vector<8x256xf32>
    %33 = vector.broadcast %31 : vector<1x256xf32> to vector<8x256xf32>
    %34 = arith.mulf %32, %33 : vector<8x256xf32>
    %35 = arith.addf %28, %34 : vector<8x256xf32>
    %c16_i32 = arith.constant 16 : i32
    %36 = tpu.dynamic_rotate %2 by %c16_i32 dim 1 : vector<4x256xf32>, i32 -> vector<4x256xf32>
    %37 = vector.extract_strided_slice %0 {offsets = [1, 0], sizes = [1, 256], strides = [1, 1]} : vector<9x256xf32> to vector<1x256xf32>
    %38 = vector.broadcast %37 : vector<1x256xf32> to vector<4x256xf32>
    %39 = arith.mulf %36, %38 : vector<4x256xf32>
    %c4 = arith.constant 4 : index
    %c0_13 = arith.constant 0 : index
    %c0_14 = arith.constant 0 : index
    %40 = vector.load %arg3[%c4, %c0_13, %c0_14] : memref<36x8x1xf32, #tpu.memory_space<vmem>>, vector<1x8x1xf32>
    %41 = vector.shape_cast %40 : vector<1x8x1xf32> to vector<8x1xf32>
    %42 = vector.extract_strided_slice %39 {offsets = [0, 0], sizes = [1, 256], strides = [1, 1]} : vector<4x256xf32> to vector<1x256xf32>
    %43 = vector.broadcast %41 : vector<8x1xf32> to vector<8x256xf32>
    %44 = vector.broadcast %42 : vector<1x256xf32> to vector<8x256xf32>
    %45 = arith.mulf %43, %44 : vector<8x256xf32>
    %46 = arith.addf %35, %45 : vector<8x256xf32>
    %c5 = arith.constant 5 : index
    %c0_15 = arith.constant 0 : index
    %c0_16 = arith.constant 0 : index
    %47 = vector.load %arg3[%c5, %c0_15, %c0_16] : memref<36x8x1xf32, #tpu.memory_space<vmem>>, vector<1x8x1xf32>
    %48 = vector.shape_cast %47 : vector<1x8x1xf32> to vector<8x1xf32>
    %49 = vector.extract_strided_slice %39 {offsets = [1, 0], sizes = [1, 256], strides = [1, 1]} : vector<4x256xf32> to vector<1x256xf32>
    %50 = vector.broadcast %48 : vector<8x1xf32> to vector<8x256xf32>
    %51 = vector.broadcast %49 : vector<1x256xf32> to vector<8x256xf32>
    %52 = arith.mulf %50, %51 : vector<8x256xf32>
    %53 = arith.addf %46, %52 : vector<8x256xf32>
    %c6 = arith.constant 6 : index
    %c0_17 = arith.constant 0 : index
    %c0_18 = arith.constant 0 : index
    %54 = vector.load %arg3[%c6, %c0_17, %c0_18] : memref<36x8x1xf32, #tpu.memory_space<vmem>>, vector<1x8x1xf32>
    %55 = vector.shape_cast %54 : vector<1x8x1xf32> to vector<8x1xf32>
    %56 = vector.extract_strided_slice %39 {offsets = [2, 0], sizes = [1, 256], strides = [1, 1]} : vector<4x256xf32> to vector<1x256xf32>
    %57 = vector.broadcast %55 : vector<8x1xf32> to vector<8x256xf32>
    %58 = vector.broadcast %56 : vector<1x256xf32> to vector<8x256xf32>
    %59 = arith.mulf %57, %58 : vector<8x256xf32>
    %60 = arith.addf %53, %59 : vector<8x256xf32>
    %c7 = arith.constant 7 : index
    %c0_19 = arith.constant 0 : index
    %c0_20 = arith.constant 0 : index
    %61 = vector.load %arg3[%c7, %c0_19, %c0_20] : memref<36x8x1xf32, #tpu.memory_space<vmem>>, vector<1x8x1xf32>
    %62 = vector.shape_cast %61 : vector<1x8x1xf32> to vector<8x1xf32>
    %63 = vector.extract_strided_slice %39 {offsets = [3, 0], sizes = [1, 256], strides = [1, 1]} : vector<4x256xf32> to vector<1x256xf32>
    %64 = vector.broadcast %62 : vector<8x1xf32> to vector<8x256xf32>
    %65 = vector.broadcast %63 : vector<1x256xf32> to vector<8x256xf32>
    %66 = arith.mulf %64, %65 : vector<8x256xf32>
    %67 = arith.addf %60, %66 : vector<8x256xf32>
    %c15_i32 = arith.constant 15 : i32
    %68 = tpu.dynamic_rotate %2 by %c15_i32 dim 1 : vector<4x256xf32>, i32 -> vector<4x256xf32>
    %69 = vector.extract_strided_slice %0 {offsets = [2, 0], sizes = [1, 256], strides = [1, 1]} : vector<9x256xf32> to vector<1x256xf32>
    %70 = vector.broadcast %69 : vector<1x256xf32> to vector<4x256xf32>
    %71 = arith.mulf %68, %70 : vector<4x256xf32>
    %c8 = arith.constant 8 : index
    %c0_21 = arith.constant 0 : index
    %c0_22 = arith.constant 0 : index
    %72 = vector.load %arg3[%c8, %c0_21, %c0_22] : memref<36x8x1xf32, #tpu.memory_space<vmem>>, vector<1x8x1xf32>
    %73 = vector.shape_cast %72 : vector<1x8x1xf32> to vector<8x1xf32>
    %74 = vector.extract_strided_slice %71 {offsets = [0, 0], sizes = [1, 256], strides = [1, 1]} : vector<4x256xf32> to vector<1x256xf32>
    %75 = vector.broadcast %73 : vector<8x1xf32> to vector<8x256xf32>
    %76 = vector.broadcast %74 : vector<1x256xf32> to vector<8x256xf32>
    %77 = arith.mulf %75, %76 : vector<8x256xf32>
    %78 = arith.addf %67, %77 : vector<8x256xf32>
    %c9 = arith.constant 9 : index
    %c0_23 = arith.constant 0 : index
    %c0_24 = arith.constant 0 : index
    %79 = vector.load %arg3[%c9, %c0_23, %c0_24] : memref<36x8x1xf32, #tpu.memory_space<vmem>>, vector<1x8x1xf32>
    %80 = vector.shape_cast %79 : vector<1x8x1xf32> to vector<8x1xf32>
    %81 = vector.extract_strided_slice %71 {offsets = [1, 0], sizes = [1, 256], strides = [1, 1]} : vector<4x256xf32> to vector<1x256xf32>
    %82 = vector.broadcast %80 : vector<8x1xf32> to vector<8x256xf32>
    %83 = vector.broadcast %81 : vector<1x256xf32> to vector<8x256xf32>
    %84 = arith.mulf %82, %83 : vector<8x256xf32>
    %85 = arith.addf %78, %84 : vector<8x256xf32>
    %c10 = arith.constant 10 : index
    %c0_25 = arith.constant 0 : index
    %c0_26 = arith.constant 0 : index
    %86 = vector.load %arg3[%c10, %c0_25, %c0_26] : memref<36x8x1xf32, #tpu.memory_space<vmem>>, vector<1x8x1xf32>
    %87 = vector.shape_cast %86 : vector<1x8x1xf32> to vector<8x1xf32>
    %88 = vector.extract_strided_slice %71 {offsets = [2, 0], sizes = [1, 256], strides = [1, 1]} : vector<4x256xf32> to vector<1x256xf32>
    %89 = vector.broadcast %87 : vector<8x1xf32> to vector<8x256xf32>
    %90 = vector.broadcast %88 : vector<1x256xf32> to vector<8x256xf32>
    %91 = arith.mulf %89, %90 : vector<8x256xf32>
    %92 = arith.addf %85, %91 : vector<8x256xf32>
    %c11 = arith.constant 11 : index
    %c0_27 = arith.constant 0 : index
    %c0_28 = arith.constant 0 : index
    %93 = vector.load %arg3[%c11, %c0_27, %c0_28] : memref<36x8x1xf32, #tpu.memory_space<vmem>>, vector<1x8x1xf32>
    %94 = vector.shape_cast %93 : vector<1x8x1xf32> to vector<8x1xf32>
    %95 = vector.extract_strided_slice %71 {offsets = [3, 0], sizes = [1, 256], strides = [1, 1]} : vector<4x256xf32> to vector<1x256xf32>
    %96 = vector.broadcast %94 : vector<8x1xf32> to vector<8x256xf32>
    %97 = vector.broadcast %95 : vector<1x256xf32> to vector<8x256xf32>
    %98 = arith.mulf %96, %97 : vector<8x256xf32>
    %99 = arith.addf %92, %98 : vector<8x256xf32>
    %c1_i32 = arith.constant 1 : i32
    %100 = tpu.dynamic_rotate %2 by %c1_i32 dim 1 : vector<4x256xf32>, i32 -> vector<4x256xf32>
    %101 = vector.extract_strided_slice %0 {offsets = [3, 0], sizes = [1, 256], strides = [1, 1]} : vector<9x256xf32> to vector<1x256xf32>
    %102 = vector.broadcast %101 : vector<1x256xf32> to vector<4x256xf32>
    %103 = arith.mulf %100, %102 : vector<4x256xf32>
    %c12 = arith.constant 12 : index
    %c0_29 = arith.constant 0 : index
    %c0_30 = arith.constant 0 : index
    %104 = vector.load %arg3[%c12, %c0_29, %c0_30] : memref<36x8x1xf32, #tpu.memory_space<vmem>>, vector<1x8x1xf32>
    %105 = vector.shape_cast %104 : vector<1x8x1xf32> to vector<8x1xf32>
    %106 = vector.extract_strided_slice %103 {offsets = [0, 0], sizes = [1, 256], strides = [1, 1]} : vector<4x256xf32> to vector<1x256xf32>
    %107 = vector.broadcast %105 : vector<8x1xf32> to vector<8x256xf32>
    %108 = vector.broadcast %106 : vector<1x256xf32> to vector<8x256xf32>
    %109 = arith.mulf %107, %108 : vector<8x256xf32>
    %110 = arith.addf %99, %109 : vector<8x256xf32>
    %c13 = arith.constant 13 : index
    %c0_31 = arith.constant 0 : index
    %c0_32 = arith.constant 0 : index
    %111 = vector.load %arg3[%c13, %c0_31, %c0_32] : memref<36x8x1xf32, #tpu.memory_space<vmem>>, vector<1x8x1xf32>
    %112 = vector.shape_cast %111 : vector<1x8x1xf32> to vector<8x1xf32>
    %113 = vector.extract_strided_slice %103 {offsets = [1, 0], sizes = [1, 256], strides = [1, 1]} : vector<4x256xf32> to vector<1x256xf32>
    %114 = vector.broadcast %112 : vector<8x1xf32> to vector<8x256xf32>
    %115 = vector.broadcast %113 : vector<1x256xf32> to vector<8x256xf32>
    %116 = arith.mulf %114, %115 : vector<8x256xf32>
    %117 = arith.addf %110, %116 : vector<8x256xf32>
    %c14 = arith.constant 14 : index
    %c0_33 = arith.constant 0 : index
    %c0_34 = arith.constant 0 : index
    %118 = vector.load %arg3[%c14, %c0_33, %c0_34] : memref<36x8x1xf32, #tpu.memory_space<vmem>>, vector<1x8x1xf32>
    %119 = vector.shape_cast %118 : vector<1x8x1xf32> to vector<8x1xf32>
    %120 = vector.extract_strided_slice %103 {offsets = [2, 0], sizes = [1, 256], strides = [1, 1]} : vector<4x256xf32> to vector<1x256xf32>
    %121 = vector.broadcast %119 : vector<8x1xf32> to vector<8x256xf32>
    %122 = vector.broadcast %120 : vector<1x256xf32> to vector<8x256xf32>
    %123 = arith.mulf %121, %122 : vector<8x256xf32>
    %124 = arith.addf %117, %123 : vector<8x256xf32>
    %c15 = arith.constant 15 : index
    %c0_35 = arith.constant 0 : index
    %c0_36 = arith.constant 0 : index
    %125 = vector.load %arg3[%c15, %c0_35, %c0_36] : memref<36x8x1xf32, #tpu.memory_space<vmem>>, vector<1x8x1xf32>
    %126 = vector.shape_cast %125 : vector<1x8x1xf32> to vector<8x1xf32>
    %127 = vector.extract_strided_slice %103 {offsets = [3, 0], sizes = [1, 256], strides = [1, 1]} : vector<4x256xf32> to vector<1x256xf32>
    %128 = vector.broadcast %126 : vector<8x1xf32> to vector<8x256xf32>
    %129 = vector.broadcast %127 : vector<1x256xf32> to vector<8x256xf32>
    %130 = arith.mulf %128, %129 : vector<8x256xf32>
    %131 = arith.addf %124, %130 : vector<8x256xf32>
    %c16 = arith.constant 16 : index
    %c0_37 = arith.constant 0 : index
    %c0_38 = arith.constant 0 : index
    %132 = vector.load %arg3[%c16, %c0_37, %c0_38] : memref<36x8x1xf32, #tpu.memory_space<vmem>>, vector<1x8x1xf32>
    %133 = vector.shape_cast %132 : vector<1x8x1xf32> to vector<8x1xf32>
    %134 = vector.extract_strided_slice %2 {offsets = [0, 0], sizes = [1, 256], strides = [1, 1]} : vector<4x256xf32> to vector<1x256xf32>
    %135 = vector.broadcast %133 : vector<8x1xf32> to vector<8x256xf32>
    %136 = vector.broadcast %134 : vector<1x256xf32> to vector<8x256xf32>
    %137 = arith.mulf %135, %136 : vector<8x256xf32>
    %138 = arith.addf %131, %137 : vector<8x256xf32>
    %c17 = arith.constant 17 : index
    %c0_39 = arith.constant 0 : index
    %c0_40 = arith.constant 0 : index
    %139 = vector.load %arg3[%c17, %c0_39, %c0_40] : memref<36x8x1xf32, #tpu.memory_space<vmem>>, vector<1x8x1xf32>
    %140 = vector.shape_cast %139 : vector<1x8x1xf32> to vector<8x1xf32>
    %141 = vector.extract_strided_slice %2 {offsets = [1, 0], sizes = [1, 256], strides = [1, 1]} : vector<4x256xf32> to vector<1x256xf32>
    %142 = vector.broadcast %140 : vector<8x1xf32> to vector<8x256xf32>
    %143 = vector.broadcast %141 : vector<1x256xf32> to vector<8x256xf32>
    %144 = arith.mulf %142, %143 : vector<8x256xf32>
    %145 = arith.addf %138, %144 : vector<8x256xf32>
    %c18 = arith.constant 18 : index
    %c0_41 = arith.constant 0 : index
    %c0_42 = arith.constant 0 : index
    %146 = vector.load %arg3[%c18, %c0_41, %c0_42] : memref<36x8x1xf32, #tpu.memory_space<vmem>>, vector<1x8x1xf32>
    %147 = vector.shape_cast %146 : vector<1x8x1xf32> to vector<8x1xf32>
    %148 = vector.extract_strided_slice %2 {offsets = [2, 0], sizes = [1, 256], strides = [1, 1]} : vector<4x256xf32> to vector<1x256xf32>
    %149 = vector.broadcast %147 : vector<8x1xf32> to vector<8x256xf32>
    %150 = vector.broadcast %148 : vector<1x256xf32> to vector<8x256xf32>
    %151 = arith.mulf %149, %150 : vector<8x256xf32>
    %152 = arith.addf %145, %151 : vector<8x256xf32>
    %c19 = arith.constant 19 : index
    %c0_43 = arith.constant 0 : index
    %c0_44 = arith.constant 0 : index
    %153 = vector.load %arg3[%c19, %c0_43, %c0_44] : memref<36x8x1xf32, #tpu.memory_space<vmem>>, vector<1x8x1xf32>
    %154 = vector.shape_cast %153 : vector<1x8x1xf32> to vector<8x1xf32>
    %155 = vector.extract_strided_slice %2 {offsets = [3, 0], sizes = [1, 256], strides = [1, 1]} : vector<4x256xf32> to vector<1x256xf32>
    %156 = vector.broadcast %154 : vector<8x1xf32> to vector<8x256xf32>
    %157 = vector.broadcast %155 : vector<1x256xf32> to vector<8x256xf32>
    %158 = arith.mulf %156, %157 : vector<8x256xf32>
    %159 = arith.addf %152, %158 : vector<8x256xf32>
    %c255_i32 = arith.constant 255 : i32
    %160 = tpu.dynamic_rotate %2 by %c255_i32 dim 1 : vector<4x256xf32>, i32 -> vector<4x256xf32>
    %161 = vector.extract_strided_slice %0 {offsets = [5, 0], sizes = [1, 256], strides = [1, 1]} : vector<9x256xf32> to vector<1x256xf32>
    %162 = vector.broadcast %161 : vector<1x256xf32> to vector<4x256xf32>
    %163 = arith.mulf %160, %162 : vector<4x256xf32>
    %c20 = arith.constant 20 : index
    %c0_45 = arith.constant 0 : index
    %c0_46 = arith.constant 0 : index
    %164 = vector.load %arg3[%c20, %c0_45, %c0_46] : memref<36x8x1xf32, #tpu.memory_space<vmem>>, vector<1x8x1xf32>
    %165 = vector.shape_cast %164 : vector<1x8x1xf32> to vector<8x1xf32>
    %166 = vector.extract_strided_slice %163 {offsets = [0, 0], sizes = [1, 256], strides = [1, 1]} : vector<4x256xf32> to vector<1x256xf32>
    %167 = vector.broadcast %165 : vector<8x1xf32> to vector<8x256xf32>
    %168 = vector.broadcast %166 : vector<1x256xf32> to vector<8x256xf32>
    %169 = arith.mulf %167, %168 : vector<8x256xf32>
    %170 = arith.addf %159, %169 : vector<8x256xf32>
    %c21 = arith.constant 21 : index
    %c0_47 = arith.constant 0 : index
    %c0_48 = arith.constant 0 : index
    %171 = vector.load %arg3[%c21, %c0_47, %c0_48] : memref<36x8x1xf32, #tpu.memory_space<vmem>>, vector<1x8x1xf32>
    %172 = vector.shape_cast %171 : vector<1x8x1xf32> to vector<8x1xf32>
    %173 = vector.extract_strided_slice %163 {offsets = [1, 0], sizes = [1, 256], strides = [1, 1]} : vector<4x256xf32> to vector<1x256xf32>
    %174 = vector.broadcast %172 : vector<8x1xf32> to vector<8x256xf32>
    %175 = vector.broadcast %173 : vector<1x256xf32> to vector<8x256xf32>
    %176 = arith.mulf %174, %175 : vector<8x256xf32>
    %177 = arith.addf %170, %176 : vector<8x256xf32>
    %c22 = arith.constant 22 : index
    %c0_49 = arith.constant 0 : index
    %c0_50 = arith.constant 0 : index
    %178 = vector.load %arg3[%c22, %c0_49, %c0_50] : memref<36x8x1xf32, #tpu.memory_space<vmem>>, vector<1x8x1xf32>
    %179 = vector.shape_cast %178 : vector<1x8x1xf32> to vector<8x1xf32>
    %180 = vector.extract_strided_slice %163 {offsets = [2, 0], sizes = [1, 256], strides = [1, 1]} : vector<4x256xf32> to vector<1x256xf32>
    %181 = vector.broadcast %179 : vector<8x1xf32> to vector<8x256xf32>
    %182 = vector.broadcast %180 : vector<1x256xf32> to vector<8x256xf32>
    %183 = arith.mulf %181, %182 : vector<8x256xf32>
    %184 = arith.addf %177, %183 : vector<8x256xf32>
    %c23 = arith.constant 23 : index
    %c0_51 = arith.constant 0 : index
    %c0_52 = arith.constant 0 : index
    %185 = vector.load %arg3[%c23, %c0_51, %c0_52] : memref<36x8x1xf32, #tpu.memory_space<vmem>>, vector<1x8x1xf32>
    %186 = vector.shape_cast %185 : vector<1x8x1xf32> to vector<8x1xf32>
    %187 = vector.extract_strided_slice %163 {offsets = [3, 0], sizes = [1, 256], strides = [1, 1]} : vector<4x256xf32> to vector<1x256xf32>
    %188 = vector.broadcast %186 : vector<8x1xf32> to vector<8x256xf32>
    %189 = vector.broadcast %187 : vector<1x256xf32> to vector<8x256xf32>
    %190 = arith.mulf %188, %189 : vector<8x256xf32>
    %191 = arith.addf %184, %190 : vector<8x256xf32>
    %c241_i32 = arith.constant 241 : i32
    %192 = tpu.dynamic_rotate %2 by %c241_i32 dim 1 : vector<4x256xf32>, i32 -> vector<4x256xf32>
    %193 = vector.extract_strided_slice %0 {offsets = [6, 0], sizes = [1, 256], strides = [1, 1]} : vector<9x256xf32> to vector<1x256xf32>
    %194 = vector.broadcast %193 : vector<1x256xf32> to vector<4x256xf32>
    %195 = arith.mulf %192, %194 : vector<4x256xf32>
    %c24 = arith.constant 24 : index
    %c0_53 = arith.constant 0 : index
    %c0_54 = arith.constant 0 : index
    %196 = vector.load %arg3[%c24, %c0_53, %c0_54] : memref<36x8x1xf32, #tpu.memory_space<vmem>>, vector<1x8x1xf32>
    %197 = vector.shape_cast %196 : vector<1x8x1xf32> to vector<8x1xf32>
    %198 = vector.extract_strided_slice %195 {offsets = [0, 0], sizes = [1, 256], strides = [1, 1]} : vector<4x256xf32> to vector<1x256xf32>
    %199 = vector.broadcast %197 : vector<8x1xf32> to vector<8x256xf32>
    %200 = vector.broadcast %198 : vector<1x256xf32> to vector<8x256xf32>
    %201 = arith.mulf %199, %200 : vector<8x256xf32>
    %202 = arith.addf %191, %201 : vector<8x256xf32>
    %c25 = arith.constant 25 : index
    %c0_55 = arith.constant 0 : index
    %c0_56 = arith.constant 0 : index
    %203 = vector.load %arg3[%c25, %c0_55, %c0_56] : memref<36x8x1xf32, #tpu.memory_space<vmem>>, vector<1x8x1xf32>
    %204 = vector.shape_cast %203 : vector<1x8x1xf32> to vector<8x1xf32>
    %205 = vector.extract_strided_slice %195 {offsets = [1, 0], sizes = [1, 256], strides = [1, 1]} : vector<4x256xf32> to vector<1x256xf32>
    %206 = vector.broadcast %204 : vector<8x1xf32> to vector<8x256xf32>
    %207 = vector.broadcast %205 : vector<1x256xf32> to vector<8x256xf32>
    %208 = arith.mulf %206, %207 : vector<8x256xf32>
    %209 = arith.addf %202, %208 : vector<8x256xf32>
    %c26 = arith.constant 26 : index
    %c0_57 = arith.constant 0 : index
    %c0_58 = arith.constant 0 : index
    %210 = vector.load %arg3[%c26, %c0_57, %c0_58] : memref<36x8x1xf32, #tpu.memory_space<vmem>>, vector<1x8x1xf32>
    %211 = vector.shape_cast %210 : vector<1x8x1xf32> to vector<8x1xf32>
    %212 = vector.extract_strided_slice %195 {offsets = [2, 0], sizes = [1, 256], strides = [1, 1]} : vector<4x256xf32> to vector<1x256xf32>
    %213 = vector.broadcast %211 : vector<8x1xf32> to vector<8x256xf32>
    %214 = vector.broadcast %212 : vector<1x256xf32> to vector<8x256xf32>
    %215 = arith.mulf %213, %214 : vector<8x256xf32>
    %216 = arith.addf %209, %215 : vector<8x256xf32>
    %c27 = arith.constant 27 : index
    %c0_59 = arith.constant 0 : index
    %c0_60 = arith.constant 0 : index
    %217 = vector.load %arg3[%c27, %c0_59, %c0_60] : memref<36x8x1xf32, #tpu.memory_space<vmem>>, vector<1x8x1xf32>
    %218 = vector.shape_cast %217 : vector<1x8x1xf32> to vector<8x1xf32>
    %219 = vector.extract_strided_slice %195 {offsets = [3, 0], sizes = [1, 256], strides = [1, 1]} : vector<4x256xf32> to vector<1x256xf32>
    %220 = vector.broadcast %218 : vector<8x1xf32> to vector<8x256xf32>
    %221 = vector.broadcast %219 : vector<1x256xf32> to vector<8x256xf32>
    %222 = arith.mulf %220, %221 : vector<8x256xf32>
    %223 = arith.addf %216, %222 : vector<8x256xf32>
    %c240_i32 = arith.constant 240 : i32
    %224 = tpu.dynamic_rotate %2 by %c240_i32 dim 1 : vector<4x256xf32>, i32 -> vector<4x256xf32>
    %225 = vector.extract_strided_slice %0 {offsets = [7, 0], sizes = [1, 256], strides = [1, 1]} : vector<9x256xf32> to vector<1x256xf32>
    %226 = vector.broadcast %225 : vector<1x256xf32> to vector<4x256xf32>
    %227 = arith.mulf %224, %226 : vector<4x256xf32>
    %c28 = arith.constant 28 : index
    %c0_61 = arith.constant 0 : index
    %c0_62 = arith.constant 0 : index
    %228 = vector.load %arg3[%c28, %c0_61, %c0_62] : memref<36x8x1xf32, #tpu.memory_space<vmem>>, vector<1x8x1xf32>
    %229 = vector.shape_cast %228 : vector<1x8x1xf32> to vector<8x1xf32>
    %230 = vector.extract_strided_slice %227 {offsets = [0, 0], sizes = [1, 256], strides = [1, 1]} : vector<4x256xf32> to vector<1x256xf32>
    %231 = vector.broadcast %229 : vector<8x1xf32> to vector<8x256xf32>
    %232 = vector.broadcast %230 : vector<1x256xf32> to vector<8x256xf32>
    %233 = arith.mulf %231, %232 : vector<8x256xf32>
    %234 = arith.addf %223, %233 : vector<8x256xf32>
    %c29 = arith.constant 29 : index
    %c0_63 = arith.constant 0 : index
    %c0_64 = arith.constant 0 : index
    %235 = vector.load %arg3[%c29, %c0_63, %c0_64] : memref<36x8x1xf32, #tpu.memory_space<vmem>>, vector<1x8x1xf32>
    %236 = vector.shape_cast %235 : vector<1x8x1xf32> to vector<8x1xf32>
    %237 = vector.extract_strided_slice %227 {offsets = [1, 0], sizes = [1, 256], strides = [1, 1]} : vector<4x256xf32> to vector<1x256xf32>
    %238 = vector.broadcast %236 : vector<8x1xf32> to vector<8x256xf32>
    %239 = vector.broadcast %237 : vector<1x256xf32> to vector<8x256xf32>
    %240 = arith.mulf %238, %239 : vector<8x256xf32>
    %241 = arith.addf %234, %240 : vector<8x256xf32>
    %c30 = arith.constant 30 : index
    %c0_65 = arith.constant 0 : index
    %c0_66 = arith.constant 0 : index
    %242 = vector.load %arg3[%c30, %c0_65, %c0_66] : memref<36x8x1xf32, #tpu.memory_space<vmem>>, vector<1x8x1xf32>
    %243 = vector.shape_cast %242 : vector<1x8x1xf32> to vector<8x1xf32>
    %244 = vector.extract_strided_slice %227 {offsets = [2, 0], sizes = [1, 256], strides = [1, 1]} : vector<4x256xf32> to vector<1x256xf32>
    %245 = vector.broadcast %243 : vector<8x1xf32> to vector<8x256xf32>
    %246 = vector.broadcast %244 : vector<1x256xf32> to vector<8x256xf32>
    %247 = arith.mulf %245, %246 : vector<8x256xf32>
    %248 = arith.addf %241, %247 : vector<8x256xf32>
    %c31 = arith.constant 31 : index
    %c0_67 = arith.constant 0 : index
    %c0_68 = arith.constant 0 : index
    %249 = vector.load %arg3[%c31, %c0_67, %c0_68] : memref<36x8x1xf32, #tpu.memory_space<vmem>>, vector<1x8x1xf32>
    %250 = vector.shape_cast %249 : vector<1x8x1xf32> to vector<8x1xf32>
    %251 = vector.extract_strided_slice %227 {offsets = [3, 0], sizes = [1, 256], strides = [1, 1]} : vector<4x256xf32> to vector<1x256xf32>
    %252 = vector.broadcast %250 : vector<8x1xf32> to vector<8x256xf32>
    %253 = vector.broadcast %251 : vector<1x256xf32> to vector<8x256xf32>
    %254 = arith.mulf %252, %253 : vector<8x256xf32>
    %255 = arith.addf %248, %254 : vector<8x256xf32>
    %c239_i32 = arith.constant 239 : i32
    %256 = tpu.dynamic_rotate %2 by %c239_i32 dim 1 : vector<4x256xf32>, i32 -> vector<4x256xf32>
    %257 = vector.extract_strided_slice %0 {offsets = [8, 0], sizes = [1, 256], strides = [1, 1]} : vector<9x256xf32> to vector<1x256xf32>
    %258 = vector.broadcast %257 : vector<1x256xf32> to vector<4x256xf32>
    %259 = arith.mulf %256, %258 : vector<4x256xf32>
    %c32 = arith.constant 32 : index
    %c0_69 = arith.constant 0 : index
    %c0_70 = arith.constant 0 : index
    %260 = vector.load %arg3[%c32, %c0_69, %c0_70] : memref<36x8x1xf32, #tpu.memory_space<vmem>>, vector<1x8x1xf32>
    %261 = vector.shape_cast %260 : vector<1x8x1xf32> to vector<8x1xf32>
    %262 = vector.extract_strided_slice %259 {offsets = [0, 0], sizes = [1, 256], strides = [1, 1]} : vector<4x256xf32> to vector<1x256xf32>
    %263 = vector.broadcast %261 : vector<8x1xf32> to vector<8x256xf32>
    %264 = vector.broadcast %262 : vector<1x256xf32> to vector<8x256xf32>
    %265 = arith.mulf %263, %264 : vector<8x256xf32>
    %266 = arith.addf %255, %265 : vector<8x256xf32>
    %c33 = arith.constant 33 : index
    %c0_71 = arith.constant 0 : index
    %c0_72 = arith.constant 0 : index
    %267 = vector.load %arg3[%c33, %c0_71, %c0_72] : memref<36x8x1xf32, #tpu.memory_space<vmem>>, vector<1x8x1xf32>
    %268 = vector.shape_cast %267 : vector<1x8x1xf32> to vector<8x1xf32>
    %269 = vector.extract_strided_slice %259 {offsets = [1, 0], sizes = [1, 256], strides = [1, 1]} : vector<4x256xf32> to vector<1x256xf32>
    %270 = vector.broadcast %268 : vector<8x1xf32> to vector<8x256xf32>
    %271 = vector.broadcast %269 : vector<1x256xf32> to vector<8x256xf32>
    %272 = arith.mulf %270, %271 : vector<8x256xf32>
    %273 = arith.addf %266, %272 : vector<8x256xf32>
    %c34 = arith.constant 34 : index
    %c0_73 = arith.constant 0 : index
    %c0_74 = arith.constant 0 : index
    %274 = vector.load %arg3[%c34, %c0_73, %c0_74] : memref<36x8x1xf32, #tpu.memory_space<vmem>>, vector<1x8x1xf32>
    %275 = vector.shape_cast %274 : vector<1x8x1xf32> to vector<8x1xf32>
    %276 = vector.extract_strided_slice %259 {offsets = [2, 0], sizes = [1, 256], strides = [1, 1]} : vector<4x256xf32> to vector<1x256xf32>
    %277 = vector.broadcast %275 : vector<8x1xf32> to vector<8x256xf32>
    %278 = vector.broadcast %276 : vector<1x256xf32> to vector<8x256xf32>
    %279 = arith.mulf %277, %278 : vector<8x256xf32>
    %280 = arith.addf %273, %279 : vector<8x256xf32>
    %c35 = arith.constant 35 : index
    %c0_75 = arith.constant 0 : index
    %c0_76 = arith.constant 0 : index
    %281 = vector.load %arg3[%c35, %c0_75, %c0_76] : memref<36x8x1xf32, #tpu.memory_space<vmem>>, vector<1x8x1xf32>
    %282 = vector.shape_cast %281 : vector<1x8x1xf32> to vector<8x1xf32>
    %283 = vector.extract_strided_slice %259 {offsets = [3, 0], sizes = [1, 256], strides = [1, 1]} : vector<4x256xf32> to vector<1x256xf32>
    %284 = vector.broadcast %282 : vector<8x1xf32> to vector<8x256xf32>
    %285 = vector.broadcast %283 : vector<1x256xf32> to vector<8x256xf32>
    %286 = arith.mulf %284, %285 : vector<8x256xf32>
    %287 = arith.addf %280, %286 : vector<8x256xf32>
    %c0_77 = arith.constant 0 : index
    %c0_78 = arith.constant 0 : index
    %288 = vector.load %arg4[%c0_77, %c0_78] : memref<8x1xf32, #tpu.memory_space<vmem>>, vector<8x1xf32>
    %289 = vector.broadcast %288 : vector<8x1xf32> to vector<8x256xf32>
    %290 = arith.addf %287, %289 : vector<8x256xf32>
    %cst_79 = arith.constant 0.000000e+00 : f32
    %291 = vector.broadcast %cst_79 : f32 to vector<8x256xf32>
    %292 = arith.cmpf oge, %290, %291 : vector<8x256xf32>
    %cst_80 = arith.constant 2.000000e-01 : f32
    %293 = vector.broadcast %cst_80 : f32 to vector<8x256xf32>
    %294 = arith.mulf %293, %290 : vector<8x256xf32>
    %295 = arith.select %292, %290, %294 : vector<8x256xi1>, vector<8x256xf32>
    %cst_81 = arith.constant 0.000000e+00 : f32
    %296 = vector.broadcast %cst_81 : f32 to vector<8x256xf32>
    %c0_82 = arith.constant 0 : index
    %c0_83 = arith.constant 0 : index
    %c0_84 = arith.constant 0 : index
    %297 = vector.load %arg5[%c0_82, %c0_83, %c0_84] : memref<8x8x1xf32, #tpu.memory_space<vmem>>, vector<1x8x1xf32>
    %298 = vector.shape_cast %297 : vector<1x8x1xf32> to vector<8x1xf32>
    %299 = vector.extract_strided_slice %295 {offsets = [0, 0], sizes = [1, 256], strides = [1, 1]} : vector<8x256xf32> to vector<1x256xf32>
    %300 = vector.broadcast %298 : vector<8x1xf32> to vector<8x256xf32>
    %301 = vector.broadcast %299 : vector<1x256xf32> to vector<8x256xf32>
    %302 = arith.mulf %300, %301 : vector<8x256xf32>
    %303 = arith.addf %296, %302 : vector<8x256xf32>
    %c1_85 = arith.constant 1 : index
    %c0_86 = arith.constant 0 : index
    %c0_87 = arith.constant 0 : index
    %304 = vector.load %arg5[%c1_85, %c0_86, %c0_87] : memref<8x8x1xf32, #tpu.memory_space<vmem>>, vector<1x8x1xf32>
    %305 = vector.shape_cast %304 : vector<1x8x1xf32> to vector<8x1xf32>
    %306 = vector.extract_strided_slice %295 {offsets = [1, 0], sizes = [1, 256], strides = [1, 1]} : vector<8x256xf32> to vector<1x256xf32>
    %307 = vector.broadcast %305 : vector<8x1xf32> to vector<8x256xf32>
    %308 = vector.broadcast %306 : vector<1x256xf32> to vector<8x256xf32>
    %309 = arith.mulf %307, %308 : vector<8x256xf32>
    %310 = arith.addf %303, %309 : vector<8x256xf32>
    %c2_88 = arith.constant 2 : index
    %c0_89 = arith.constant 0 : index
    %c0_90 = arith.constant 0 : index
    %311 = vector.load %arg5[%c2_88, %c0_89, %c0_90] : memref<8x8x1xf32, #tpu.memory_space<vmem>>, vector<1x8x1xf32>
    %312 = vector.shape_cast %311 : vector<1x8x1xf32> to vector<8x1xf32>
    %313 = vector.extract_strided_slice %295 {offsets = [2, 0], sizes = [1, 256], strides = [1, 1]} : vector<8x256xf32> to vector<1x256xf32>
    %314 = vector.broadcast %312 : vector<8x1xf32> to vector<8x256xf32>
    %315 = vector.broadcast %313 : vector<1x256xf32> to vector<8x256xf32>
    %316 = arith.mulf %314, %315 : vector<8x256xf32>
    %317 = arith.addf %310, %316 : vector<8x256xf32>
    %c3_91 = arith.constant 3 : index
    %c0_92 = arith.constant 0 : index
    %c0_93 = arith.constant 0 : index
    %318 = vector.load %arg5[%c3_91, %c0_92, %c0_93] : memref<8x8x1xf32, #tpu.memory_space<vmem>>, vector<1x8x1xf32>
    %319 = vector.shape_cast %318 : vector<1x8x1xf32> to vector<8x1xf32>
    %320 = vector.extract_strided_slice %295 {offsets = [3, 0], sizes = [1, 256], strides = [1, 1]} : vector<8x256xf32> to vector<1x256xf32>
    %321 = vector.broadcast %319 : vector<8x1xf32> to vector<8x256xf32>
    %322 = vector.broadcast %320 : vector<1x256xf32> to vector<8x256xf32>
    %323 = arith.mulf %321, %322 : vector<8x256xf32>
    %324 = arith.addf %317, %323 : vector<8x256xf32>
    %c4_94 = arith.constant 4 : index
    %c0_95 = arith.constant 0 : index
    %c0_96 = arith.constant 0 : index
    %325 = vector.load %arg5[%c4_94, %c0_95, %c0_96] : memref<8x8x1xf32, #tpu.memory_space<vmem>>, vector<1x8x1xf32>
    %326 = vector.shape_cast %325 : vector<1x8x1xf32> to vector<8x1xf32>
    %327 = vector.extract_strided_slice %295 {offsets = [4, 0], sizes = [1, 256], strides = [1, 1]} : vector<8x256xf32> to vector<1x256xf32>
    %328 = vector.broadcast %326 : vector<8x1xf32> to vector<8x256xf32>
    %329 = vector.broadcast %327 : vector<1x256xf32> to vector<8x256xf32>
    %330 = arith.mulf %328, %329 : vector<8x256xf32>
    %331 = arith.addf %324, %330 : vector<8x256xf32>
    %c5_97 = arith.constant 5 : index
    %c0_98 = arith.constant 0 : index
    %c0_99 = arith.constant 0 : index
    %332 = vector.load %arg5[%c5_97, %c0_98, %c0_99] : memref<8x8x1xf32, #tpu.memory_space<vmem>>, vector<1x8x1xf32>
    %333 = vector.shape_cast %332 : vector<1x8x1xf32> to vector<8x1xf32>
    %334 = vector.extract_strided_slice %295 {offsets = [5, 0], sizes = [1, 256], strides = [1, 1]} : vector<8x256xf32> to vector<1x256xf32>
    %335 = vector.broadcast %333 : vector<8x1xf32> to vector<8x256xf32>
    %336 = vector.broadcast %334 : vector<1x256xf32> to vector<8x256xf32>
    %337 = arith.mulf %335, %336 : vector<8x256xf32>
    %338 = arith.addf %331, %337 : vector<8x256xf32>
    %c6_100 = arith.constant 6 : index
    %c0_101 = arith.constant 0 : index
    %c0_102 = arith.constant 0 : index
    %339 = vector.load %arg5[%c6_100, %c0_101, %c0_102] : memref<8x8x1xf32, #tpu.memory_space<vmem>>, vector<1x8x1xf32>
    %340 = vector.shape_cast %339 : vector<1x8x1xf32> to vector<8x1xf32>
    %341 = vector.extract_strided_slice %295 {offsets = [6, 0], sizes = [1, 256], strides = [1, 1]} : vector<8x256xf32> to vector<1x256xf32>
    %342 = vector.broadcast %340 : vector<8x1xf32> to vector<8x256xf32>
    %343 = vector.broadcast %341 : vector<1x256xf32> to vector<8x256xf32>
    %344 = arith.mulf %342, %343 : vector<8x256xf32>
    %345 = arith.addf %338, %344 : vector<8x256xf32>
    %c7_103 = arith.constant 7 : index
    %c0_104 = arith.constant 0 : index
    %c0_105 = arith.constant 0 : index
    %346 = vector.load %arg5[%c7_103, %c0_104, %c0_105] : memref<8x8x1xf32, #tpu.memory_space<vmem>>, vector<1x8x1xf32>
    %347 = vector.shape_cast %346 : vector<1x8x1xf32> to vector<8x1xf32>
    %348 = vector.extract_strided_slice %295 {offsets = [7, 0], sizes = [1, 256], strides = [1, 1]} : vector<8x256xf32> to vector<1x256xf32>
    %349 = vector.broadcast %347 : vector<8x1xf32> to vector<8x256xf32>
    %350 = vector.broadcast %348 : vector<1x256xf32> to vector<8x256xf32>
    %351 = arith.mulf %349, %350 : vector<8x256xf32>
    %352 = arith.addf %345, %351 : vector<8x256xf32>
    %c0_106 = arith.constant 0 : index
    %c0_107 = arith.constant 0 : index
    %353 = vector.load %arg6[%c0_106, %c0_107] : memref<8x1xf32, #tpu.memory_space<vmem>>, vector<8x1xf32>
    %354 = vector.broadcast %353 : vector<8x1xf32> to vector<8x256xf32>
    %355 = arith.addf %352, %354 : vector<8x256xf32>
    %cst_108 = arith.constant 0.000000e+00 : f32
    %356 = vector.broadcast %cst_108 : f32 to vector<8x256xf32>
    %357 = arith.cmpf oge, %355, %356 : vector<8x256xf32>
    %cst_109 = arith.constant 2.000000e-01 : f32
    %358 = vector.broadcast %cst_109 : f32 to vector<8x256xf32>
    %359 = arith.mulf %358, %355 : vector<8x256xf32>
    %360 = arith.select %357, %355, %359 : vector<8x256xi1>, vector<8x256xf32>
    %cst_110 = arith.constant 0.000000e+00 : f32
    %361 = vector.broadcast %cst_110 : f32 to vector<8x256xf32>
    %c17_i32_111 = arith.constant 17 : i32
    %362 = tpu.dynamic_rotate %360 by %c17_i32_111 dim 1 : vector<8x256xf32>, i32 -> vector<8x256xf32>
    %363 = vector.extract_strided_slice %0 {offsets = [0, 0], sizes = [1, 256], strides = [1, 1]} : vector<9x256xf32> to vector<1x256xf32>
    %364 = vector.broadcast %363 : vector<1x256xf32> to vector<8x256xf32>
    %365 = arith.mulf %362, %364 : vector<8x256xf32>
    %c0_112 = arith.constant 0 : index
    %c0_113 = arith.constant 0 : index
    %c0_114 = arith.constant 0 : index
    %366 = vector.load %arg7[%c0_112, %c0_113, %c0_114] : memref<72x8x1xf32, #tpu.memory_space<vmem>>, vector<1x8x1xf32>
    %367 = vector.shape_cast %366 : vector<1x8x1xf32> to vector<8x1xf32>
    %368 = vector.extract_strided_slice %365 {offsets = [0, 0], sizes = [1, 256], strides = [1, 1]} : vector<8x256xf32> to vector<1x256xf32>
    %369 = vector.broadcast %367 : vector<8x1xf32> to vector<8x256xf32>
    %370 = vector.broadcast %368 : vector<1x256xf32> to vector<8x256xf32>
    %371 = arith.mulf %369, %370 : vector<8x256xf32>
    %372 = arith.addf %361, %371 : vector<8x256xf32>
    %c1_115 = arith.constant 1 : index
    %c0_116 = arith.constant 0 : index
    %c0_117 = arith.constant 0 : index
    %373 = vector.load %arg7[%c1_115, %c0_116, %c0_117] : memref<72x8x1xf32, #tpu.memory_space<vmem>>, vector<1x8x1xf32>
    %374 = vector.shape_cast %373 : vector<1x8x1xf32> to vector<8x1xf32>
    %375 = vector.extract_strided_slice %365 {offsets = [1, 0], sizes = [1, 256], strides = [1, 1]} : vector<8x256xf32> to vector<1x256xf32>
    %376 = vector.broadcast %374 : vector<8x1xf32> to vector<8x256xf32>
    %377 = vector.broadcast %375 : vector<1x256xf32> to vector<8x256xf32>
    %378 = arith.mulf %376, %377 : vector<8x256xf32>
    %379 = arith.addf %372, %378 : vector<8x256xf32>
    %c2_118 = arith.constant 2 : index
    %c0_119 = arith.constant 0 : index
    %c0_120 = arith.constant 0 : index
    %380 = vector.load %arg7[%c2_118, %c0_119, %c0_120] : memref<72x8x1xf32, #tpu.memory_space<vmem>>, vector<1x8x1xf32>
    %381 = vector.shape_cast %380 : vector<1x8x1xf32> to vector<8x1xf32>
    %382 = vector.extract_strided_slice %365 {offsets = [2, 0], sizes = [1, 256], strides = [1, 1]} : vector<8x256xf32> to vector<1x256xf32>
    %383 = vector.broadcast %381 : vector<8x1xf32> to vector<8x256xf32>
    %384 = vector.broadcast %382 : vector<1x256xf32> to vector<8x256xf32>
    %385 = arith.mulf %383, %384 : vector<8x256xf32>
    %386 = arith.addf %379, %385 : vector<8x256xf32>
    %c3_121 = arith.constant 3 : index
    %c0_122 = arith.constant 0 : index
    %c0_123 = arith.constant 0 : index
    %387 = vector.load %arg7[%c3_121, %c0_122, %c0_123] : memref<72x8x1xf32, #tpu.memory_space<vmem>>, vector<1x8x1xf32>
    %388 = vector.shape_cast %387 : vector<1x8x1xf32> to vector<8x1xf32>
    %389 = vector.extract_strided_slice %365 {offsets = [3, 0], sizes = [1, 256], strides = [1, 1]} : vector<8x256xf32> to vector<1x256xf32>
    %390 = vector.broadcast %388 : vector<8x1xf32> to vector<8x256xf32>
    %391 = vector.broadcast %389 : vector<1x256xf32> to vector<8x256xf32>
    %392 = arith.mulf %390, %391 : vector<8x256xf32>
    %393 = arith.addf %386, %392 : vector<8x256xf32>
    %c4_124 = arith.constant 4 : index
    %c0_125 = arith.constant 0 : index
    %c0_126 = arith.constant 0 : index
    %394 = vector.load %arg7[%c4_124, %c0_125, %c0_126] : memref<72x8x1xf32, #tpu.memory_space<vmem>>, vector<1x8x1xf32>
    %395 = vector.shape_cast %394 : vector<1x8x1xf32> to vector<8x1xf32>
    %396 = vector.extract_strided_slice %365 {offsets = [4, 0], sizes = [1, 256], strides = [1, 1]} : vector<8x256xf32> to vector<1x256xf32>
    %397 = vector.broadcast %395 : vector<8x1xf32> to vector<8x256xf32>
    %398 = vector.broadcast %396 : vector<1x256xf32> to vector<8x256xf32>
    %399 = arith.mulf %397, %398 : vector<8x256xf32>
    %400 = arith.addf %393, %399 : vector<8x256xf32>
    %c5_127 = arith.constant 5 : index
    %c0_128 = arith.constant 0 : index
    %c0_129 = arith.constant 0 : index
    %401 = vector.load %arg7[%c5_127, %c0_128, %c0_129] : memref<72x8x1xf32, #tpu.memory_space<vmem>>, vector<1x8x1xf32>
    %402 = vector.shape_cast %401 : vector<1x8x1xf32> to vector<8x1xf32>
    %403 = vector.extract_strided_slice %365 {offsets = [5, 0], sizes = [1, 256], strides = [1, 1]} : vector<8x256xf32> to vector<1x256xf32>
    %404 = vector.broadcast %402 : vector<8x1xf32> to vector<8x256xf32>
    %405 = vector.broadcast %403 : vector<1x256xf32> to vector<8x256xf32>
    %406 = arith.mulf %404, %405 : vector<8x256xf32>
    %407 = arith.addf %400, %406 : vector<8x256xf32>
    %c6_130 = arith.constant 6 : index
    %c0_131 = arith.constant 0 : index
    %c0_132 = arith.constant 0 : index
    %408 = vector.load %arg7[%c6_130, %c0_131, %c0_132] : memref<72x8x1xf32, #tpu.memory_space<vmem>>, vector<1x8x1xf32>
    %409 = vector.shape_cast %408 : vector<1x8x1xf32> to vector<8x1xf32>
    %410 = vector.extract_strided_slice %365 {offsets = [6, 0], sizes = [1, 256], strides = [1, 1]} : vector<8x256xf32> to vector<1x256xf32>
    %411 = vector.broadcast %409 : vector<8x1xf32> to vector<8x256xf32>
    %412 = vector.broadcast %410 : vector<1x256xf32> to vector<8x256xf32>
    %413 = arith.mulf %411, %412 : vector<8x256xf32>
    %414 = arith.addf %407, %413 : vector<8x256xf32>
    %c7_133 = arith.constant 7 : index
    %c0_134 = arith.constant 0 : index
    %c0_135 = arith.constant 0 : index
    %415 = vector.load %arg7[%c7_133, %c0_134, %c0_135] : memref<72x8x1xf32, #tpu.memory_space<vmem>>, vector<1x8x1xf32>
    %416 = vector.shape_cast %415 : vector<1x8x1xf32> to vector<8x1xf32>
    %417 = vector.extract_strided_slice %365 {offsets = [7, 0], sizes = [1, 256], strides = [1, 1]} : vector<8x256xf32> to vector<1x256xf32>
    %418 = vector.broadcast %416 : vector<8x1xf32> to vector<8x256xf32>
    %419 = vector.broadcast %417 : vector<1x256xf32> to vector<8x256xf32>
    %420 = arith.mulf %418, %419 : vector<8x256xf32>
    %421 = arith.addf %414, %420 : vector<8x256xf32>
    %c16_i32_136 = arith.constant 16 : i32
    %422 = tpu.dynamic_rotate %360 by %c16_i32_136 dim 1 : vector<8x256xf32>, i32 -> vector<8x256xf32>
    %423 = vector.extract_strided_slice %0 {offsets = [1, 0], sizes = [1, 256], strides = [1, 1]} : vector<9x256xf32> to vector<1x256xf32>
    %424 = vector.broadcast %423 : vector<1x256xf32> to vector<8x256xf32>
    %425 = arith.mulf %422, %424 : vector<8x256xf32>
    %c8_137 = arith.constant 8 : index
    %c0_138 = arith.constant 0 : index
    %c0_139 = arith.constant 0 : index
    %426 = vector.load %arg7[%c8_137, %c0_138, %c0_139] : memref<72x8x1xf32, #tpu.memory_space<vmem>>, vector<1x8x1xf32>
    %427 = vector.shape_cast %426 : vector<1x8x1xf32> to vector<8x1xf32>
    %428 = vector.extract_strided_slice %425 {offsets = [0, 0], sizes = [1, 256], strides = [1, 1]} : vector<8x256xf32> to vector<1x256xf32>
    %429 = vector.broadcast %427 : vector<8x1xf32> to vector<8x256xf32>
    %430 = vector.broadcast %428 : vector<1x256xf32> to vector<8x256xf32>
    %431 = arith.mulf %429, %430 : vector<8x256xf32>
    %432 = arith.addf %421, %431 : vector<8x256xf32>
    %c9_140 = arith.constant 9 : index
    %c0_141 = arith.constant 0 : index
    %c0_142 = arith.constant 0 : index
    %433 = vector.load %arg7[%c9_140, %c0_141, %c0_142] : memref<72x8x1xf32, #tpu.memory_space<vmem>>, vector<1x8x1xf32>
    %434 = vector.shape_cast %433 : vector<1x8x1xf32> to vector<8x1xf32>
    %435 = vector.extract_strided_slice %425 {offsets = [1, 0], sizes = [1, 256], strides = [1, 1]} : vector<8x256xf32> to vector<1x256xf32>
    %436 = vector.broadcast %434 : vector<8x1xf32> to vector<8x256xf32>
    %437 = vector.broadcast %435 : vector<1x256xf32> to vector<8x256xf32>
    %438 = arith.mulf %436, %437 : vector<8x256xf32>
    %439 = arith.addf %432, %438 : vector<8x256xf32>
    %c10_143 = arith.constant 10 : index
    %c0_144 = arith.constant 0 : index
    %c0_145 = arith.constant 0 : index
    %440 = vector.load %arg7[%c10_143, %c0_144, %c0_145] : memref<72x8x1xf32, #tpu.memory_space<vmem>>, vector<1x8x1xf32>
    %441 = vector.shape_cast %440 : vector<1x8x1xf32> to vector<8x1xf32>
    %442 = vector.extract_strided_slice %425 {offsets = [2, 0], sizes = [1, 256], strides = [1, 1]} : vector<8x256xf32> to vector<1x256xf32>
    %443 = vector.broadcast %441 : vector<8x1xf32> to vector<8x256xf32>
    %444 = vector.broadcast %442 : vector<1x256xf32> to vector<8x256xf32>
    %445 = arith.mulf %443, %444 : vector<8x256xf32>
    %446 = arith.addf %439, %445 : vector<8x256xf32>
    %c11_146 = arith.constant 11 : index
    %c0_147 = arith.constant 0 : index
    %c0_148 = arith.constant 0 : index
    %447 = vector.load %arg7[%c11_146, %c0_147, %c0_148] : memref<72x8x1xf32, #tpu.memory_space<vmem>>, vector<1x8x1xf32>
    %448 = vector.shape_cast %447 : vector<1x8x1xf32> to vector<8x1xf32>
    %449 = vector.extract_strided_slice %425 {offsets = [3, 0], sizes = [1, 256], strides = [1, 1]} : vector<8x256xf32> to vector<1x256xf32>
    %450 = vector.broadcast %448 : vector<8x1xf32> to vector<8x256xf32>
    %451 = vector.broadcast %449 : vector<1x256xf32> to vector<8x256xf32>
    %452 = arith.mulf %450, %451 : vector<8x256xf32>
    %453 = arith.addf %446, %452 : vector<8x256xf32>
    %c12_149 = arith.constant 12 : index
    %c0_150 = arith.constant 0 : index
    %c0_151 = arith.constant 0 : index
    %454 = vector.load %arg7[%c12_149, %c0_150, %c0_151] : memref<72x8x1xf32, #tpu.memory_space<vmem>>, vector<1x8x1xf32>
    %455 = vector.shape_cast %454 : vector<1x8x1xf32> to vector<8x1xf32>
    %456 = vector.extract_strided_slice %425 {offsets = [4, 0], sizes = [1, 256], strides = [1, 1]} : vector<8x256xf32> to vector<1x256xf32>
    %457 = vector.broadcast %455 : vector<8x1xf32> to vector<8x256xf32>
    %458 = vector.broadcast %456 : vector<1x256xf32> to vector<8x256xf32>
    %459 = arith.mulf %457, %458 : vector<8x256xf32>
    %460 = arith.addf %453, %459 : vector<8x256xf32>
    %c13_152 = arith.constant 13 : index
    %c0_153 = arith.constant 0 : index
    %c0_154 = arith.constant 0 : index
    %461 = vector.load %arg7[%c13_152, %c0_153, %c0_154] : memref<72x8x1xf32, #tpu.memory_space<vmem>>, vector<1x8x1xf32>
    %462 = vector.shape_cast %461 : vector<1x8x1xf32> to vector<8x1xf32>
    %463 = vector.extract_strided_slice %425 {offsets = [5, 0], sizes = [1, 256], strides = [1, 1]} : vector<8x256xf32> to vector<1x256xf32>
    %464 = vector.broadcast %462 : vector<8x1xf32> to vector<8x256xf32>
    %465 = vector.broadcast %463 : vector<1x256xf32> to vector<8x256xf32>
    %466 = arith.mulf %464, %465 : vector<8x256xf32>
    %467 = arith.addf %460, %466 : vector<8x256xf32>
    %c14_155 = arith.constant 14 : index
    %c0_156 = arith.constant 0 : index
    %c0_157 = arith.constant 0 : index
    %468 = vector.load %arg7[%c14_155, %c0_156, %c0_157] : memref<72x8x1xf32, #tpu.memory_space<vmem>>, vector<1x8x1xf32>
    %469 = vector.shape_cast %468 : vector<1x8x1xf32> to vector<8x1xf32>
    %470 = vector.extract_strided_slice %425 {offsets = [6, 0], sizes = [1, 256], strides = [1, 1]} : vector<8x256xf32> to vector<1x256xf32>
    %471 = vector.broadcast %469 : vector<8x1xf32> to vector<8x256xf32>
    %472 = vector.broadcast %470 : vector<1x256xf32> to vector<8x256xf32>
    %473 = arith.mulf %471, %472 : vector<8x256xf32>
    %474 = arith.addf %467, %473 : vector<8x256xf32>
    %c15_158 = arith.constant 15 : index
    %c0_159 = arith.constant 0 : index
    %c0_160 = arith.constant 0 : index
    %475 = vector.load %arg7[%c15_158, %c0_159, %c0_160] : memref<72x8x1xf32, #tpu.memory_space<vmem>>, vector<1x8x1xf32>
    %476 = vector.shape_cast %475 : vector<1x8x1xf32> to vector<8x1xf32>
    %477 = vector.extract_strided_slice %425 {offsets = [7, 0], sizes = [1, 256], strides = [1, 1]} : vector<8x256xf32> to vector<1x256xf32>
    %478 = vector.broadcast %476 : vector<8x1xf32> to vector<8x256xf32>
    %479 = vector.broadcast %477 : vector<1x256xf32> to vector<8x256xf32>
    %480 = arith.mulf %478, %479 : vector<8x256xf32>
    %481 = arith.addf %474, %480 : vector<8x256xf32>
    %c15_i32_161 = arith.constant 15 : i32
    %482 = tpu.dynamic_rotate %360 by %c15_i32_161 dim 1 : vector<8x256xf32>, i32 -> vector<8x256xf32>
    %483 = vector.extract_strided_slice %0 {offsets = [2, 0], sizes = [1, 256], strides = [1, 1]} : vector<9x256xf32> to vector<1x256xf32>
    %484 = vector.broadcast %483 : vector<1x256xf32> to vector<8x256xf32>
    %485 = arith.mulf %482, %484 : vector<8x256xf32>
    %c16_162 = arith.constant 16 : index
    %c0_163 = arith.constant 0 : index
    %c0_164 = arith.constant 0 : index
    %486 = vector.load %arg7[%c16_162, %c0_163, %c0_164] : memref<72x8x1xf32, #tpu.memory_space<vmem>>, vector<1x8x1xf32>
    %487 = vector.shape_cast %486 : vector<1x8x1xf32> to vector<8x1xf32>
    %488 = vector.extract_strided_slice %485 {offsets = [0, 0], sizes = [1, 256], strides = [1, 1]} : vector<8x256xf32> to vector<1x256xf32>
    %489 = vector.broadcast %487 : vector<8x1xf32> to vector<8x256xf32>
    %490 = vector.broadcast %488 : vector<1x256xf32> to vector<8x256xf32>
    %491 = arith.mulf %489, %490 : vector<8x256xf32>
    %492 = arith.addf %481, %491 : vector<8x256xf32>
    %c17_165 = arith.constant 17 : index
    %c0_166 = arith.constant 0 : index
    %c0_167 = arith.constant 0 : index
    %493 = vector.load %arg7[%c17_165, %c0_166, %c0_167] : memref<72x8x1xf32, #tpu.memory_space<vmem>>, vector<1x8x1xf32>
    %494 = vector.shape_cast %493 : vector<1x8x1xf32> to vector<8x1xf32>
    %495 = vector.extract_strided_slice %485 {offsets = [1, 0], sizes = [1, 256], strides = [1, 1]} : vector<8x256xf32> to vector<1x256xf32>
    %496 = vector.broadcast %494 : vector<8x1xf32> to vector<8x256xf32>
    %497 = vector.broadcast %495 : vector<1x256xf32> to vector<8x256xf32>
    %498 = arith.mulf %496, %497 : vector<8x256xf32>
    %499 = arith.addf %492, %498 : vector<8x256xf32>
    %c18_168 = arith.constant 18 : index
    %c0_169 = arith.constant 0 : index
    %c0_170 = arith.constant 0 : index
    %500 = vector.load %arg7[%c18_168, %c0_169, %c0_170] : memref<72x8x1xf32, #tpu.memory_space<vmem>>, vector<1x8x1xf32>
    %501 = vector.shape_cast %500 : vector<1x8x1xf32> to vector<8x1xf32>
    %502 = vector.extract_strided_slice %485 {offsets = [2, 0], sizes = [1, 256], strides = [1, 1]} : vector<8x256xf32> to vector<1x256xf32>
    %503 = vector.broadcast %501 : vector<8x1xf32> to vector<8x256xf32>
    %504 = vector.broadcast %502 : vector<1x256xf32> to vector<8x256xf32>
    %505 = arith.mulf %503, %504 : vector<8x256xf32>
    %506 = arith.addf %499, %505 : vector<8x256xf32>
    %c19_171 = arith.constant 19 : index
    %c0_172 = arith.constant 0 : index
    %c0_173 = arith.constant 0 : index
    %507 = vector.load %arg7[%c19_171, %c0_172, %c0_173] : memref<72x8x1xf32, #tpu.memory_space<vmem>>, vector<1x8x1xf32>
    %508 = vector.shape_cast %507 : vector<1x8x1xf32> to vector<8x1xf32>
    %509 = vector.extract_strided_slice %485 {offsets = [3, 0], sizes = [1, 256], strides = [1, 1]} : vector<8x256xf32> to vector<1x256xf32>
    %510 = vector.broadcast %508 : vector<8x1xf32> to vector<8x256xf32>
    %511 = vector.broadcast %509 : vector<1x256xf32> to vector<8x256xf32>
    %512 = arith.mulf %510, %511 : vector<8x256xf32>
    %513 = arith.addf %506, %512 : vector<8x256xf32>
    %c20_174 = arith.constant 20 : index
    %c0_175 = arith.constant 0 : index
    %c0_176 = arith.constant 0 : index
    %514 = vector.load %arg7[%c20_174, %c0_175, %c0_176] : memref<72x8x1xf32, #tpu.memory_space<vmem>>, vector<1x8x1xf32>
    %515 = vector.shape_cast %514 : vector<1x8x1xf32> to vector<8x1xf32>
    %516 = vector.extract_strided_slice %485 {offsets = [4, 0], sizes = [1, 256], strides = [1, 1]} : vector<8x256xf32> to vector<1x256xf32>
    %517 = vector.broadcast %515 : vector<8x1xf32> to vector<8x256xf32>
    %518 = vector.broadcast %516 : vector<1x256xf32> to vector<8x256xf32>
    %519 = arith.mulf %517, %518 : vector<8x256xf32>
    %520 = arith.addf %513, %519 : vector<8x256xf32>
    %c21_177 = arith.constant 21 : index
    %c0_178 = arith.constant 0 : index
    %c0_179 = arith.constant 0 : index
    %521 = vector.load %arg7[%c21_177, %c0_178, %c0_179] : memref<72x8x1xf32, #tpu.memory_space<vmem>>, vector<1x8x1xf32>
    %522 = vector.shape_cast %521 : vector<1x8x1xf32> to vector<8x1xf32>
    %523 = vector.extract_strided_slice %485 {offsets = [5, 0], sizes = [1, 256], strides = [1, 1]} : vector<8x256xf32> to vector<1x256xf32>
    %524 = vector.broadcast %522 : vector<8x1xf32> to vector<8x256xf32>
    %525 = vector.broadcast %523 : vector<1x256xf32> to vector<8x256xf32>
    %526 = arith.mulf %524, %525 : vector<8x256xf32>
    %527 = arith.addf %520, %526 : vector<8x256xf32>
    %c22_180 = arith.constant 22 : index
    %c0_181 = arith.constant 0 : index
    %c0_182 = arith.constant 0 : index
    %528 = vector.load %arg7[%c22_180, %c0_181, %c0_182] : memref<72x8x1xf32, #tpu.memory_space<vmem>>, vector<1x8x1xf32>
    %529 = vector.shape_cast %528 : vector<1x8x1xf32> to vector<8x1xf32>
    %530 = vector.extract_strided_slice %485 {offsets = [6, 0], sizes = [1, 256], strides = [1, 1]} : vector<8x256xf32> to vector<1x256xf32>
    %531 = vector.broadcast %529 : vector<8x1xf32> to vector<8x256xf32>
    %532 = vector.broadcast %530 : vector<1x256xf32> to vector<8x256xf32>
    %533 = arith.mulf %531, %532 : vector<8x256xf32>
    %534 = arith.addf %527, %533 : vector<8x256xf32>
    %c23_183 = arith.constant 23 : index
    %c0_184 = arith.constant 0 : index
    %c0_185 = arith.constant 0 : index
    %535 = vector.load %arg7[%c23_183, %c0_184, %c0_185] : memref<72x8x1xf32, #tpu.memory_space<vmem>>, vector<1x8x1xf32>
    %536 = vector.shape_cast %535 : vector<1x8x1xf32> to vector<8x1xf32>
    %537 = vector.extract_strided_slice %485 {offsets = [7, 0], sizes = [1, 256], strides = [1, 1]} : vector<8x256xf32> to vector<1x256xf32>
    %538 = vector.broadcast %536 : vector<8x1xf32> to vector<8x256xf32>
    %539 = vector.broadcast %537 : vector<1x256xf32> to vector<8x256xf32>
    %540 = arith.mulf %538, %539 : vector<8x256xf32>
    %541 = arith.addf %534, %540 : vector<8x256xf32>
    %c1_i32_186 = arith.constant 1 : i32
    %542 = tpu.dynamic_rotate %360 by %c1_i32_186 dim 1 : vector<8x256xf32>, i32 -> vector<8x256xf32>
    %543 = vector.extract_strided_slice %0 {offsets = [3, 0], sizes = [1, 256], strides = [1, 1]} : vector<9x256xf32> to vector<1x256xf32>
    %544 = vector.broadcast %543 : vector<1x256xf32> to vector<8x256xf32>
    %545 = arith.mulf %542, %544 : vector<8x256xf32>
    %c24_187 = arith.constant 24 : index
    %c0_188 = arith.constant 0 : index
    %c0_189 = arith.constant 0 : index
    %546 = vector.load %arg7[%c24_187, %c0_188, %c0_189] : memref<72x8x1xf32, #tpu.memory_space<vmem>>, vector<1x8x1xf32>
    %547 = vector.shape_cast %546 : vector<1x8x1xf32> to vector<8x1xf32>
    %548 = vector.extract_strided_slice %545 {offsets = [0, 0], sizes = [1, 256], strides = [1, 1]} : vector<8x256xf32> to vector<1x256xf32>
    %549 = vector.broadcast %547 : vector<8x1xf32> to vector<8x256xf32>
    %550 = vector.broadcast %548 : vector<1x256xf32> to vector<8x256xf32>
    %551 = arith.mulf %549, %550 : vector<8x256xf32>
    %552 = arith.addf %541, %551 : vector<8x256xf32>
    %c25_190 = arith.constant 25 : index
    %c0_191 = arith.constant 0 : index
    %c0_192 = arith.constant 0 : index
    %553 = vector.load %arg7[%c25_190, %c0_191, %c0_192] : memref<72x8x1xf32, #tpu.memory_space<vmem>>, vector<1x8x1xf32>
    %554 = vector.shape_cast %553 : vector<1x8x1xf32> to vector<8x1xf32>
    %555 = vector.extract_strided_slice %545 {offsets = [1, 0], sizes = [1, 256], strides = [1, 1]} : vector<8x256xf32> to vector<1x256xf32>
    %556 = vector.broadcast %554 : vector<8x1xf32> to vector<8x256xf32>
    %557 = vector.broadcast %555 : vector<1x256xf32> to vector<8x256xf32>
    %558 = arith.mulf %556, %557 : vector<8x256xf32>
    %559 = arith.addf %552, %558 : vector<8x256xf32>
    %c26_193 = arith.constant 26 : index
    %c0_194 = arith.constant 0 : index
    %c0_195 = arith.constant 0 : index
    %560 = vector.load %arg7[%c26_193, %c0_194, %c0_195] : memref<72x8x1xf32, #tpu.memory_space<vmem>>, vector<1x8x1xf32>
    %561 = vector.shape_cast %560 : vector<1x8x1xf32> to vector<8x1xf32>
    %562 = vector.extract_strided_slice %545 {offsets = [2, 0], sizes = [1, 256], strides = [1, 1]} : vector<8x256xf32> to vector<1x256xf32>
    %563 = vector.broadcast %561 : vector<8x1xf32> to vector<8x256xf32>
    %564 = vector.broadcast %562 : vector<1x256xf32> to vector<8x256xf32>
    %565 = arith.mulf %563, %564 : vector<8x256xf32>
    %566 = arith.addf %559, %565 : vector<8x256xf32>
    %c27_196 = arith.constant 27 : index
    %c0_197 = arith.constant 0 : index
    %c0_198 = arith.constant 0 : index
    %567 = vector.load %arg7[%c27_196, %c0_197, %c0_198] : memref<72x8x1xf32, #tpu.memory_space<vmem>>, vector<1x8x1xf32>
    %568 = vector.shape_cast %567 : vector<1x8x1xf32> to vector<8x1xf32>
    %569 = vector.extract_strided_slice %545 {offsets = [3, 0], sizes = [1, 256], strides = [1, 1]} : vector<8x256xf32> to vector<1x256xf32>
    %570 = vector.broadcast %568 : vector<8x1xf32> to vector<8x256xf32>
    %571 = vector.broadcast %569 : vector<1x256xf32> to vector<8x256xf32>
    %572 = arith.mulf %570, %571 : vector<8x256xf32>
    %573 = arith.addf %566, %572 : vector<8x256xf32>
    %c28_199 = arith.constant 28 : index
    %c0_200 = arith.constant 0 : index
    %c0_201 = arith.constant 0 : index
    %574 = vector.load %arg7[%c28_199, %c0_200, %c0_201] : memref<72x8x1xf32, #tpu.memory_space<vmem>>, vector<1x8x1xf32>
    %575 = vector.shape_cast %574 : vector<1x8x1xf32> to vector<8x1xf32>
    %576 = vector.extract_strided_slice %545 {offsets = [4, 0], sizes = [1, 256], strides = [1, 1]} : vector<8x256xf32> to vector<1x256xf32>
    %577 = vector.broadcast %575 : vector<8x1xf32> to vector<8x256xf32>
    %578 = vector.broadcast %576 : vector<1x256xf32> to vector<8x256xf32>
    %579 = arith.mulf %577, %578 : vector<8x256xf32>
    %580 = arith.addf %573, %579 : vector<8x256xf32>
    %c29_202 = arith.constant 29 : index
    %c0_203 = arith.constant 0 : index
    %c0_204 = arith.constant 0 : index
    %581 = vector.load %arg7[%c29_202, %c0_203, %c0_204] : memref<72x8x1xf32, #tpu.memory_space<vmem>>, vector<1x8x1xf32>
    %582 = vector.shape_cast %581 : vector<1x8x1xf32> to vector<8x1xf32>
    %583 = vector.extract_strided_slice %545 {offsets = [5, 0], sizes = [1, 256], strides = [1, 1]} : vector<8x256xf32> to vector<1x256xf32>
    %584 = vector.broadcast %582 : vector<8x1xf32> to vector<8x256xf32>
    %585 = vector.broadcast %583 : vector<1x256xf32> to vector<8x256xf32>
    %586 = arith.mulf %584, %585 : vector<8x256xf32>
    %587 = arith.addf %580, %586 : vector<8x256xf32>
    %c30_205 = arith.constant 30 : index
    %c0_206 = arith.constant 0 : index
    %c0_207 = arith.constant 0 : index
    %588 = vector.load %arg7[%c30_205, %c0_206, %c0_207] : memref<72x8x1xf32, #tpu.memory_space<vmem>>, vector<1x8x1xf32>
    %589 = vector.shape_cast %588 : vector<1x8x1xf32> to vector<8x1xf32>
    %590 = vector.extract_strided_slice %545 {offsets = [6, 0], sizes = [1, 256], strides = [1, 1]} : vector<8x256xf32> to vector<1x256xf32>
    %591 = vector.broadcast %589 : vector<8x1xf32> to vector<8x256xf32>
    %592 = vector.broadcast %590 : vector<1x256xf32> to vector<8x256xf32>
    %593 = arith.mulf %591, %592 : vector<8x256xf32>
    %594 = arith.addf %587, %593 : vector<8x256xf32>
    %c31_208 = arith.constant 31 : index
    %c0_209 = arith.constant 0 : index
    %c0_210 = arith.constant 0 : index
    %595 = vector.load %arg7[%c31_208, %c0_209, %c0_210] : memref<72x8x1xf32, #tpu.memory_space<vmem>>, vector<1x8x1xf32>
    %596 = vector.shape_cast %595 : vector<1x8x1xf32> to vector<8x1xf32>
    %597 = vector.extract_strided_slice %545 {offsets = [7, 0], sizes = [1, 256], strides = [1, 1]} : vector<8x256xf32> to vector<1x256xf32>
    %598 = vector.broadcast %596 : vector<8x1xf32> to vector<8x256xf32>
    %599 = vector.broadcast %597 : vector<1x256xf32> to vector<8x256xf32>
    %600 = arith.mulf %598, %599 : vector<8x256xf32>
    %601 = arith.addf %594, %600 : vector<8x256xf32>
    %c32_211 = arith.constant 32 : index
    %c0_212 = arith.constant 0 : index
    %c0_213 = arith.constant 0 : index
    %602 = vector.load %arg7[%c32_211, %c0_212, %c0_213] : memref<72x8x1xf32, #tpu.memory_space<vmem>>, vector<1x8x1xf32>
    %603 = vector.shape_cast %602 : vector<1x8x1xf32> to vector<8x1xf32>
    %604 = vector.extract_strided_slice %360 {offsets = [0, 0], sizes = [1, 256], strides = [1, 1]} : vector<8x256xf32> to vector<1x256xf32>
    %605 = vector.broadcast %603 : vector<8x1xf32> to vector<8x256xf32>
    %606 = vector.broadcast %604 : vector<1x256xf32> to vector<8x256xf32>
    %607 = arith.mulf %605, %606 : vector<8x256xf32>
    %608 = arith.addf %601, %607 : vector<8x256xf32>
    %c33_214 = arith.constant 33 : index
    %c0_215 = arith.constant 0 : index
    %c0_216 = arith.constant 0 : index
    %609 = vector.load %arg7[%c33_214, %c0_215, %c0_216] : memref<72x8x1xf32, #tpu.memory_space<vmem>>, vector<1x8x1xf32>
    %610 = vector.shape_cast %609 : vector<1x8x1xf32> to vector<8x1xf32>
    %611 = vector.extract_strided_slice %360 {offsets = [1, 0], sizes = [1, 256], strides = [1, 1]} : vector<8x256xf32> to vector<1x256xf32>
    %612 = vector.broadcast %610 : vector<8x1xf32> to vector<8x256xf32>
    %613 = vector.broadcast %611 : vector<1x256xf32> to vector<8x256xf32>
    %614 = arith.mulf %612, %613 : vector<8x256xf32>
    %615 = arith.addf %608, %614 : vector<8x256xf32>
    %c34_217 = arith.constant 34 : index
    %c0_218 = arith.constant 0 : index
    %c0_219 = arith.constant 0 : index
    %616 = vector.load %arg7[%c34_217, %c0_218, %c0_219] : memref<72x8x1xf32, #tpu.memory_space<vmem>>, vector<1x8x1xf32>
    %617 = vector.shape_cast %616 : vector<1x8x1xf32> to vector<8x1xf32>
    %618 = vector.extract_strided_slice %360 {offsets = [2, 0], sizes = [1, 256], strides = [1, 1]} : vector<8x256xf32> to vector<1x256xf32>
    %619 = vector.broadcast %617 : vector<8x1xf32> to vector<8x256xf32>
    %620 = vector.broadcast %618 : vector<1x256xf32> to vector<8x256xf32>
    %621 = arith.mulf %619, %620 : vector<8x256xf32>
    %622 = arith.addf %615, %621 : vector<8x256xf32>
    %c35_220 = arith.constant 35 : index
    %c0_221 = arith.constant 0 : index
    %c0_222 = arith.constant 0 : index
    %623 = vector.load %arg7[%c35_220, %c0_221, %c0_222] : memref<72x8x1xf32, #tpu.memory_space<vmem>>, vector<1x8x1xf32>
    %624 = vector.shape_cast %623 : vector<1x8x1xf32> to vector<8x1xf32>
    %625 = vector.extract_strided_slice %360 {offsets = [3, 0], sizes = [1, 256], strides = [1, 1]} : vector<8x256xf32> to vector<1x256xf32>
    %626 = vector.broadcast %624 : vector<8x1xf32> to vector<8x256xf32>
    %627 = vector.broadcast %625 : vector<1x256xf32> to vector<8x256xf32>
    %628 = arith.mulf %626, %627 : vector<8x256xf32>
    %629 = arith.addf %622, %628 : vector<8x256xf32>
    %c36 = arith.constant 36 : index
    %c0_223 = arith.constant 0 : index
    %c0_224 = arith.constant 0 : index
    %630 = vector.load %arg7[%c36, %c0_223, %c0_224] : memref<72x8x1xf32, #tpu.memory_space<vmem>>, vector<1x8x1xf32>
    %631 = vector.shape_cast %630 : vector<1x8x1xf32> to vector<8x1xf32>
    %632 = vector.extract_strided_slice %360 {offsets = [4, 0], sizes = [1, 256], strides = [1, 1]} : vector<8x256xf32> to vector<1x256xf32>
    %633 = vector.broadcast %631 : vector<8x1xf32> to vector<8x256xf32>
    %634 = vector.broadcast %632 : vector<1x256xf32> to vector<8x256xf32>
    %635 = arith.mulf %633, %634 : vector<8x256xf32>
    %636 = arith.addf %629, %635 : vector<8x256xf32>
    %c37 = arith.constant 37 : index
    %c0_225 = arith.constant 0 : index
    %c0_226 = arith.constant 0 : index
    %637 = vector.load %arg7[%c37, %c0_225, %c0_226] : memref<72x8x1xf32, #tpu.memory_space<vmem>>, vector<1x8x1xf32>
    %638 = vector.shape_cast %637 : vector<1x8x1xf32> to vector<8x1xf32>
    %639 = vector.extract_strided_slice %360 {offsets = [5, 0], sizes = [1, 256], strides = [1, 1]} : vector<8x256xf32> to vector<1x256xf32>
    %640 = vector.broadcast %638 : vector<8x1xf32> to vector<8x256xf32>
    %641 = vector.broadcast %639 : vector<1x256xf32> to vector<8x256xf32>
    %642 = arith.mulf %640, %641 : vector<8x256xf32>
    %643 = arith.addf %636, %642 : vector<8x256xf32>
    %c38 = arith.constant 38 : index
    %c0_227 = arith.constant 0 : index
    %c0_228 = arith.constant 0 : index
    %644 = vector.load %arg7[%c38, %c0_227, %c0_228] : memref<72x8x1xf32, #tpu.memory_space<vmem>>, vector<1x8x1xf32>
    %645 = vector.shape_cast %644 : vector<1x8x1xf32> to vector<8x1xf32>
    %646 = vector.extract_strided_slice %360 {offsets = [6, 0], sizes = [1, 256], strides = [1, 1]} : vector<8x256xf32> to vector<1x256xf32>
    %647 = vector.broadcast %645 : vector<8x1xf32> to vector<8x256xf32>
    %648 = vector.broadcast %646 : vector<1x256xf32> to vector<8x256xf32>
    %649 = arith.mulf %647, %648 : vector<8x256xf32>
    %650 = arith.addf %643, %649 : vector<8x256xf32>
    %c39 = arith.constant 39 : index
    %c0_229 = arith.constant 0 : index
    %c0_230 = arith.constant 0 : index
    %651 = vector.load %arg7[%c39, %c0_229, %c0_230] : memref<72x8x1xf32, #tpu.memory_space<vmem>>, vector<1x8x1xf32>
    %652 = vector.shape_cast %651 : vector<1x8x1xf32> to vector<8x1xf32>
    %653 = vector.extract_strided_slice %360 {offsets = [7, 0], sizes = [1, 256], strides = [1, 1]} : vector<8x256xf32> to vector<1x256xf32>
    %654 = vector.broadcast %652 : vector<8x1xf32> to vector<8x256xf32>
    %655 = vector.broadcast %653 : vector<1x256xf32> to vector<8x256xf32>
    %656 = arith.mulf %654, %655 : vector<8x256xf32>
    %657 = arith.addf %650, %656 : vector<8x256xf32>
    %c255_i32_231 = arith.constant 255 : i32
    %658 = tpu.dynamic_rotate %360 by %c255_i32_231 dim 1 : vector<8x256xf32>, i32 -> vector<8x256xf32>
    %659 = vector.extract_strided_slice %0 {offsets = [5, 0], sizes = [1, 256], strides = [1, 1]} : vector<9x256xf32> to vector<1x256xf32>
    %660 = vector.broadcast %659 : vector<1x256xf32> to vector<8x256xf32>
    %661 = arith.mulf %658, %660 : vector<8x256xf32>
    %c40 = arith.constant 40 : index
    %c0_232 = arith.constant 0 : index
    %c0_233 = arith.constant 0 : index
    %662 = vector.load %arg7[%c40, %c0_232, %c0_233] : memref<72x8x1xf32, #tpu.memory_space<vmem>>, vector<1x8x1xf32>
    %663 = vector.shape_cast %662 : vector<1x8x1xf32> to vector<8x1xf32>
    %664 = vector.extract_strided_slice %661 {offsets = [0, 0], sizes = [1, 256], strides = [1, 1]} : vector<8x256xf32> to vector<1x256xf32>
    %665 = vector.broadcast %663 : vector<8x1xf32> to vector<8x256xf32>
    %666 = vector.broadcast %664 : vector<1x256xf32> to vector<8x256xf32>
    %667 = arith.mulf %665, %666 : vector<8x256xf32>
    %668 = arith.addf %657, %667 : vector<8x256xf32>
    %c41 = arith.constant 41 : index
    %c0_234 = arith.constant 0 : index
    %c0_235 = arith.constant 0 : index
    %669 = vector.load %arg7[%c41, %c0_234, %c0_235] : memref<72x8x1xf32, #tpu.memory_space<vmem>>, vector<1x8x1xf32>
    %670 = vector.shape_cast %669 : vector<1x8x1xf32> to vector<8x1xf32>
    %671 = vector.extract_strided_slice %661 {offsets = [1, 0], sizes = [1, 256], strides = [1, 1]} : vector<8x256xf32> to vector<1x256xf32>
    %672 = vector.broadcast %670 : vector<8x1xf32> to vector<8x256xf32>
    %673 = vector.broadcast %671 : vector<1x256xf32> to vector<8x256xf32>
    %674 = arith.mulf %672, %673 : vector<8x256xf32>
    %675 = arith.addf %668, %674 : vector<8x256xf32>
    %c42 = arith.constant 42 : index
    %c0_236 = arith.constant 0 : index
    %c0_237 = arith.constant 0 : index
    %676 = vector.load %arg7[%c42, %c0_236, %c0_237] : memref<72x8x1xf32, #tpu.memory_space<vmem>>, vector<1x8x1xf32>
    %677 = vector.shape_cast %676 : vector<1x8x1xf32> to vector<8x1xf32>
    %678 = vector.extract_strided_slice %661 {offsets = [2, 0], sizes = [1, 256], strides = [1, 1]} : vector<8x256xf32> to vector<1x256xf32>
    %679 = vector.broadcast %677 : vector<8x1xf32> to vector<8x256xf32>
    %680 = vector.broadcast %678 : vector<1x256xf32> to vector<8x256xf32>
    %681 = arith.mulf %679, %680 : vector<8x256xf32>
    %682 = arith.addf %675, %681 : vector<8x256xf32>
    %c43 = arith.constant 43 : index
    %c0_238 = arith.constant 0 : index
    %c0_239 = arith.constant 0 : index
    %683 = vector.load %arg7[%c43, %c0_238, %c0_239] : memref<72x8x1xf32, #tpu.memory_space<vmem>>, vector<1x8x1xf32>
    %684 = vector.shape_cast %683 : vector<1x8x1xf32> to vector<8x1xf32>
    %685 = vector.extract_strided_slice %661 {offsets = [3, 0], sizes = [1, 256], strides = [1, 1]} : vector<8x256xf32> to vector<1x256xf32>
    %686 = vector.broadcast %684 : vector<8x1xf32> to vector<8x256xf32>
    %687 = vector.broadcast %685 : vector<1x256xf32> to vector<8x256xf32>
    %688 = arith.mulf %686, %687 : vector<8x256xf32>
    %689 = arith.addf %682, %688 : vector<8x256xf32>
    %c44 = arith.constant 44 : index
    %c0_240 = arith.constant 0 : index
    %c0_241 = arith.constant 0 : index
    %690 = vector.load %arg7[%c44, %c0_240, %c0_241] : memref<72x8x1xf32, #tpu.memory_space<vmem>>, vector<1x8x1xf32>
    %691 = vector.shape_cast %690 : vector<1x8x1xf32> to vector<8x1xf32>
    %692 = vector.extract_strided_slice %661 {offsets = [4, 0], sizes = [1, 256], strides = [1, 1]} : vector<8x256xf32> to vector<1x256xf32>
    %693 = vector.broadcast %691 : vector<8x1xf32> to vector<8x256xf32>
    %694 = vector.broadcast %692 : vector<1x256xf32> to vector<8x256xf32>
    %695 = arith.mulf %693, %694 : vector<8x256xf32>
    %696 = arith.addf %689, %695 : vector<8x256xf32>
    %c45 = arith.constant 45 : index
    %c0_242 = arith.constant 0 : index
    %c0_243 = arith.constant 0 : index
    %697 = vector.load %arg7[%c45, %c0_242, %c0_243] : memref<72x8x1xf32, #tpu.memory_space<vmem>>, vector<1x8x1xf32>
    %698 = vector.shape_cast %697 : vector<1x8x1xf32> to vector<8x1xf32>
    %699 = vector.extract_strided_slice %661 {offsets = [5, 0], sizes = [1, 256], strides = [1, 1]} : vector<8x256xf32> to vector<1x256xf32>
    %700 = vector.broadcast %698 : vector<8x1xf32> to vector<8x256xf32>
    %701 = vector.broadcast %699 : vector<1x256xf32> to vector<8x256xf32>
    %702 = arith.mulf %700, %701 : vector<8x256xf32>
    %703 = arith.addf %696, %702 : vector<8x256xf32>
    %c46 = arith.constant 46 : index
    %c0_244 = arith.constant 0 : index
    %c0_245 = arith.constant 0 : index
    %704 = vector.load %arg7[%c46, %c0_244, %c0_245] : memref<72x8x1xf32, #tpu.memory_space<vmem>>, vector<1x8x1xf32>
    %705 = vector.shape_cast %704 : vector<1x8x1xf32> to vector<8x1xf32>
    %706 = vector.extract_strided_slice %661 {offsets = [6, 0], sizes = [1, 256], strides = [1, 1]} : vector<8x256xf32> to vector<1x256xf32>
    %707 = vector.broadcast %705 : vector<8x1xf32> to vector<8x256xf32>
    %708 = vector.broadcast %706 : vector<1x256xf32> to vector<8x256xf32>
    %709 = arith.mulf %707, %708 : vector<8x256xf32>
    %710 = arith.addf %703, %709 : vector<8x256xf32>
    %c47 = arith.constant 47 : index
    %c0_246 = arith.constant 0 : index
    %c0_247 = arith.constant 0 : index
    %711 = vector.load %arg7[%c47, %c0_246, %c0_247] : memref<72x8x1xf32, #tpu.memory_space<vmem>>, vector<1x8x1xf32>
    %712 = vector.shape_cast %711 : vector<1x8x1xf32> to vector<8x1xf32>
    %713 = vector.extract_strided_slice %661 {offsets = [7, 0], sizes = [1, 256], strides = [1, 1]} : vector<8x256xf32> to vector<1x256xf32>
    %714 = vector.broadcast %712 : vector<8x1xf32> to vector<8x256xf32>
    %715 = vector.broadcast %713 : vector<1x256xf32> to vector<8x256xf32>
    %716 = arith.mulf %714, %715 : vector<8x256xf32>
    %717 = arith.addf %710, %716 : vector<8x256xf32>
    %c241_i32_248 = arith.constant 241 : i32
    %718 = tpu.dynamic_rotate %360 by %c241_i32_248 dim 1 : vector<8x256xf32>, i32 -> vector<8x256xf32>
    %719 = vector.extract_strided_slice %0 {offsets = [6, 0], sizes = [1, 256], strides = [1, 1]} : vector<9x256xf32> to vector<1x256xf32>
    %720 = vector.broadcast %719 : vector<1x256xf32> to vector<8x256xf32>
    %721 = arith.mulf %718, %720 : vector<8x256xf32>
    %c48 = arith.constant 48 : index
    %c0_249 = arith.constant 0 : index
    %c0_250 = arith.constant 0 : index
    %722 = vector.load %arg7[%c48, %c0_249, %c0_250] : memref<72x8x1xf32, #tpu.memory_space<vmem>>, vector<1x8x1xf32>
    %723 = vector.shape_cast %722 : vector<1x8x1xf32> to vector<8x1xf32>
    %724 = vector.extract_strided_slice %721 {offsets = [0, 0], sizes = [1, 256], strides = [1, 1]} : vector<8x256xf32> to vector<1x256xf32>
    %725 = vector.broadcast %723 : vector<8x1xf32> to vector<8x256xf32>
    %726 = vector.broadcast %724 : vector<1x256xf32> to vector<8x256xf32>
    %727 = arith.mulf %725, %726 : vector<8x256xf32>
    %728 = arith.addf %717, %727 : vector<8x256xf32>
    %c49 = arith.constant 49 : index
    %c0_251 = arith.constant 0 : index
    %c0_252 = arith.constant 0 : index
    %729 = vector.load %arg7[%c49, %c0_251, %c0_252] : memref<72x8x1xf32, #tpu.memory_space<vmem>>, vector<1x8x1xf32>
    %730 = vector.shape_cast %729 : vector<1x8x1xf32> to vector<8x1xf32>
    %731 = vector.extract_strided_slice %721 {offsets = [1, 0], sizes = [1, 256], strides = [1, 1]} : vector<8x256xf32> to vector<1x256xf32>
    %732 = vector.broadcast %730 : vector<8x1xf32> to vector<8x256xf32>
    %733 = vector.broadcast %731 : vector<1x256xf32> to vector<8x256xf32>
    %734 = arith.mulf %732, %733 : vector<8x256xf32>
    %735 = arith.addf %728, %734 : vector<8x256xf32>
    %c50 = arith.constant 50 : index
    %c0_253 = arith.constant 0 : index
    %c0_254 = arith.constant 0 : index
    %736 = vector.load %arg7[%c50, %c0_253, %c0_254] : memref<72x8x1xf32, #tpu.memory_space<vmem>>, vector<1x8x1xf32>
    %737 = vector.shape_cast %736 : vector<1x8x1xf32> to vector<8x1xf32>
    %738 = vector.extract_strided_slice %721 {offsets = [2, 0], sizes = [1, 256], strides = [1, 1]} : vector<8x256xf32> to vector<1x256xf32>
    %739 = vector.broadcast %737 : vector<8x1xf32> to vector<8x256xf32>
    %740 = vector.broadcast %738 : vector<1x256xf32> to vector<8x256xf32>
    %741 = arith.mulf %739, %740 : vector<8x256xf32>
    %742 = arith.addf %735, %741 : vector<8x256xf32>
    %c51 = arith.constant 51 : index
    %c0_255 = arith.constant 0 : index
    %c0_256 = arith.constant 0 : index
    %743 = vector.load %arg7[%c51, %c0_255, %c0_256] : memref<72x8x1xf32, #tpu.memory_space<vmem>>, vector<1x8x1xf32>
    %744 = vector.shape_cast %743 : vector<1x8x1xf32> to vector<8x1xf32>
    %745 = vector.extract_strided_slice %721 {offsets = [3, 0], sizes = [1, 256], strides = [1, 1]} : vector<8x256xf32> to vector<1x256xf32>
    %746 = vector.broadcast %744 : vector<8x1xf32> to vector<8x256xf32>
    %747 = vector.broadcast %745 : vector<1x256xf32> to vector<8x256xf32>
    %748 = arith.mulf %746, %747 : vector<8x256xf32>
    %749 = arith.addf %742, %748 : vector<8x256xf32>
    %c52 = arith.constant 52 : index
    %c0_257 = arith.constant 0 : index
    %c0_258 = arith.constant 0 : index
    %750 = vector.load %arg7[%c52, %c0_257, %c0_258] : memref<72x8x1xf32, #tpu.memory_space<vmem>>, vector<1x8x1xf32>
    %751 = vector.shape_cast %750 : vector<1x8x1xf32> to vector<8x1xf32>
    %752 = vector.extract_strided_slice %721 {offsets = [4, 0], sizes = [1, 256], strides = [1, 1]} : vector<8x256xf32> to vector<1x256xf32>
    %753 = vector.broadcast %751 : vector<8x1xf32> to vector<8x256xf32>
    %754 = vector.broadcast %752 : vector<1x256xf32> to vector<8x256xf32>
    %755 = arith.mulf %753, %754 : vector<8x256xf32>
    %756 = arith.addf %749, %755 : vector<8x256xf32>
    %c53 = arith.constant 53 : index
    %c0_259 = arith.constant 0 : index
    %c0_260 = arith.constant 0 : index
    %757 = vector.load %arg7[%c53, %c0_259, %c0_260] : memref<72x8x1xf32, #tpu.memory_space<vmem>>, vector<1x8x1xf32>
    %758 = vector.shape_cast %757 : vector<1x8x1xf32> to vector<8x1xf32>
    %759 = vector.extract_strided_slice %721 {offsets = [5, 0], sizes = [1, 256], strides = [1, 1]} : vector<8x256xf32> to vector<1x256xf32>
    %760 = vector.broadcast %758 : vector<8x1xf32> to vector<8x256xf32>
    %761 = vector.broadcast %759 : vector<1x256xf32> to vector<8x256xf32>
    %762 = arith.mulf %760, %761 : vector<8x256xf32>
    %763 = arith.addf %756, %762 : vector<8x256xf32>
    %c54 = arith.constant 54 : index
    %c0_261 = arith.constant 0 : index
    %c0_262 = arith.constant 0 : index
    %764 = vector.load %arg7[%c54, %c0_261, %c0_262] : memref<72x8x1xf32, #tpu.memory_space<vmem>>, vector<1x8x1xf32>
    %765 = vector.shape_cast %764 : vector<1x8x1xf32> to vector<8x1xf32>
    %766 = vector.extract_strided_slice %721 {offsets = [6, 0], sizes = [1, 256], strides = [1, 1]} : vector<8x256xf32> to vector<1x256xf32>
    %767 = vector.broadcast %765 : vector<8x1xf32> to vector<8x256xf32>
    %768 = vector.broadcast %766 : vector<1x256xf32> to vector<8x256xf32>
    %769 = arith.mulf %767, %768 : vector<8x256xf32>
    %770 = arith.addf %763, %769 : vector<8x256xf32>
    %c55 = arith.constant 55 : index
    %c0_263 = arith.constant 0 : index
    %c0_264 = arith.constant 0 : index
    %771 = vector.load %arg7[%c55, %c0_263, %c0_264] : memref<72x8x1xf32, #tpu.memory_space<vmem>>, vector<1x8x1xf32>
    %772 = vector.shape_cast %771 : vector<1x8x1xf32> to vector<8x1xf32>
    %773 = vector.extract_strided_slice %721 {offsets = [7, 0], sizes = [1, 256], strides = [1, 1]} : vector<8x256xf32> to vector<1x256xf32>
    %774 = vector.broadcast %772 : vector<8x1xf32> to vector<8x256xf32>
    %775 = vector.broadcast %773 : vector<1x256xf32> to vector<8x256xf32>
    %776 = arith.mulf %774, %775 : vector<8x256xf32>
    %777 = arith.addf %770, %776 : vector<8x256xf32>
    %c240_i32_265 = arith.constant 240 : i32
    %778 = tpu.dynamic_rotate %360 by %c240_i32_265 dim 1 : vector<8x256xf32>, i32 -> vector<8x256xf32>
    %779 = vector.extract_strided_slice %0 {offsets = [7, 0], sizes = [1, 256], strides = [1, 1]} : vector<9x256xf32> to vector<1x256xf32>
    %780 = vector.broadcast %779 : vector<1x256xf32> to vector<8x256xf32>
    %781 = arith.mulf %778, %780 : vector<8x256xf32>
    %c56 = arith.constant 56 : index
    %c0_266 = arith.constant 0 : index
    %c0_267 = arith.constant 0 : index
    %782 = vector.load %arg7[%c56, %c0_266, %c0_267] : memref<72x8x1xf32, #tpu.memory_space<vmem>>, vector<1x8x1xf32>
    %783 = vector.shape_cast %782 : vector<1x8x1xf32> to vector<8x1xf32>
    %784 = vector.extract_strided_slice %781 {offsets = [0, 0], sizes = [1, 256], strides = [1, 1]} : vector<8x256xf32> to vector<1x256xf32>
    %785 = vector.broadcast %783 : vector<8x1xf32> to vector<8x256xf32>
    %786 = vector.broadcast %784 : vector<1x256xf32> to vector<8x256xf32>
    %787 = arith.mulf %785, %786 : vector<8x256xf32>
    %788 = arith.addf %777, %787 : vector<8x256xf32>
    %c57 = arith.constant 57 : index
    %c0_268 = arith.constant 0 : index
    %c0_269 = arith.constant 0 : index
    %789 = vector.load %arg7[%c57, %c0_268, %c0_269] : memref<72x8x1xf32, #tpu.memory_space<vmem>>, vector<1x8x1xf32>
    %790 = vector.shape_cast %789 : vector<1x8x1xf32> to vector<8x1xf32>
    %791 = vector.extract_strided_slice %781 {offsets = [1, 0], sizes = [1, 256], strides = [1, 1]} : vector<8x256xf32> to vector<1x256xf32>
    %792 = vector.broadcast %790 : vector<8x1xf32> to vector<8x256xf32>
    %793 = vector.broadcast %791 : vector<1x256xf32> to vector<8x256xf32>
    %794 = arith.mulf %792, %793 : vector<8x256xf32>
    %795 = arith.addf %788, %794 : vector<8x256xf32>
    %c58 = arith.constant 58 : index
    %c0_270 = arith.constant 0 : index
    %c0_271 = arith.constant 0 : index
    %796 = vector.load %arg7[%c58, %c0_270, %c0_271] : memref<72x8x1xf32, #tpu.memory_space<vmem>>, vector<1x8x1xf32>
    %797 = vector.shape_cast %796 : vector<1x8x1xf32> to vector<8x1xf32>
    %798 = vector.extract_strided_slice %781 {offsets = [2, 0], sizes = [1, 256], strides = [1, 1]} : vector<8x256xf32> to vector<1x256xf32>
    %799 = vector.broadcast %797 : vector<8x1xf32> to vector<8x256xf32>
    %800 = vector.broadcast %798 : vector<1x256xf32> to vector<8x256xf32>
    %801 = arith.mulf %799, %800 : vector<8x256xf32>
    %802 = arith.addf %795, %801 : vector<8x256xf32>
    %c59 = arith.constant 59 : index
    %c0_272 = arith.constant 0 : index
    %c0_273 = arith.constant 0 : index
    %803 = vector.load %arg7[%c59, %c0_272, %c0_273] : memref<72x8x1xf32, #tpu.memory_space<vmem>>, vector<1x8x1xf32>
    %804 = vector.shape_cast %803 : vector<1x8x1xf32> to vector<8x1xf32>
    %805 = vector.extract_strided_slice %781 {offsets = [3, 0], sizes = [1, 256], strides = [1, 1]} : vector<8x256xf32> to vector<1x256xf32>
    %806 = vector.broadcast %804 : vector<8x1xf32> to vector<8x256xf32>
    %807 = vector.broadcast %805 : vector<1x256xf32> to vector<8x256xf32>
    %808 = arith.mulf %806, %807 : vector<8x256xf32>
    %809 = arith.addf %802, %808 : vector<8x256xf32>
    %c60 = arith.constant 60 : index
    %c0_274 = arith.constant 0 : index
    %c0_275 = arith.constant 0 : index
    %810 = vector.load %arg7[%c60, %c0_274, %c0_275] : memref<72x8x1xf32, #tpu.memory_space<vmem>>, vector<1x8x1xf32>
    %811 = vector.shape_cast %810 : vector<1x8x1xf32> to vector<8x1xf32>
    %812 = vector.extract_strided_slice %781 {offsets = [4, 0], sizes = [1, 256], strides = [1, 1]} : vector<8x256xf32> to vector<1x256xf32>
    %813 = vector.broadcast %811 : vector<8x1xf32> to vector<8x256xf32>
    %814 = vector.broadcast %812 : vector<1x256xf32> to vector<8x256xf32>
    %815 = arith.mulf %813, %814 : vector<8x256xf32>
    %816 = arith.addf %809, %815 : vector<8x256xf32>
    %c61 = arith.constant 61 : index
    %c0_276 = arith.constant 0 : index
    %c0_277 = arith.constant 0 : index
    %817 = vector.load %arg7[%c61, %c0_276, %c0_277] : memref<72x8x1xf32, #tpu.memory_space<vmem>>, vector<1x8x1xf32>
    %818 = vector.shape_cast %817 : vector<1x8x1xf32> to vector<8x1xf32>
    %819 = vector.extract_strided_slice %781 {offsets = [5, 0], sizes = [1, 256], strides = [1, 1]} : vector<8x256xf32> to vector<1x256xf32>
    %820 = vector.broadcast %818 : vector<8x1xf32> to vector<8x256xf32>
    %821 = vector.broadcast %819 : vector<1x256xf32> to vector<8x256xf32>
    %822 = arith.mulf %820, %821 : vector<8x256xf32>
    %823 = arith.addf %816, %822 : vector<8x256xf32>
    %c62 = arith.constant 62 : index
    %c0_278 = arith.constant 0 : index
    %c0_279 = arith.constant 0 : index
    %824 = vector.load %arg7[%c62, %c0_278, %c0_279] : memref<72x8x1xf32, #tpu.memory_space<vmem>>, vector<1x8x1xf32>
    %825 = vector.shape_cast %824 : vector<1x8x1xf32> to vector<8x1xf32>
    %826 = vector.extract_strided_slice %781 {offsets = [6, 0], sizes = [1, 256], strides = [1, 1]} : vector<8x256xf32> to vector<1x256xf32>
    %827 = vector.broadcast %825 : vector<8x1xf32> to vector<8x256xf32>
    %828 = vector.broadcast %826 : vector<1x256xf32> to vector<8x256xf32>
    %829 = arith.mulf %827, %828 : vector<8x256xf32>
    %830 = arith.addf %823, %829 : vector<8x256xf32>
    %c63 = arith.constant 63 : index
    %c0_280 = arith.constant 0 : index
    %c0_281 = arith.constant 0 : index
    %831 = vector.load %arg7[%c63, %c0_280, %c0_281] : memref<72x8x1xf32, #tpu.memory_space<vmem>>, vector<1x8x1xf32>
    %832 = vector.shape_cast %831 : vector<1x8x1xf32> to vector<8x1xf32>
    %833 = vector.extract_strided_slice %781 {offsets = [7, 0], sizes = [1, 256], strides = [1, 1]} : vector<8x256xf32> to vector<1x256xf32>
    %834 = vector.broadcast %832 : vector<8x1xf32> to vector<8x256xf32>
    %835 = vector.broadcast %833 : vector<1x256xf32> to vector<8x256xf32>
    %836 = arith.mulf %834, %835 : vector<8x256xf32>
    %837 = arith.addf %830, %836 : vector<8x256xf32>
    %c239_i32_282 = arith.constant 239 : i32
    %838 = tpu.dynamic_rotate %360 by %c239_i32_282 dim 1 : vector<8x256xf32>, i32 -> vector<8x256xf32>
    %839 = vector.extract_strided_slice %0 {offsets = [8, 0], sizes = [1, 256], strides = [1, 1]} : vector<9x256xf32> to vector<1x256xf32>
    %840 = vector.broadcast %839 : vector<1x256xf32> to vector<8x256xf32>
    %841 = arith.mulf %838, %840 : vector<8x256xf32>
    %c64 = arith.constant 64 : index
    %c0_283 = arith.constant 0 : index
    %c0_284 = arith.constant 0 : index
    %842 = vector.load %arg7[%c64, %c0_283, %c0_284] : memref<72x8x1xf32, #tpu.memory_space<vmem>>, vector<1x8x1xf32>
    %843 = vector.shape_cast %842 : vector<1x8x1xf32> to vector<8x1xf32>
    %844 = vector.extract_strided_slice %841 {offsets = [0, 0], sizes = [1, 256], strides = [1, 1]} : vector<8x256xf32> to vector<1x256xf32>
    %845 = vector.broadcast %843 : vector<8x1xf32> to vector<8x256xf32>
    %846 = vector.broadcast %844 : vector<1x256xf32> to vector<8x256xf32>
    %847 = arith.mulf %845, %846 : vector<8x256xf32>
    %848 = arith.addf %837, %847 : vector<8x256xf32>
    %c65 = arith.constant 65 : index
    %c0_285 = arith.constant 0 : index
    %c0_286 = arith.constant 0 : index
    %849 = vector.load %arg7[%c65, %c0_285, %c0_286] : memref<72x8x1xf32, #tpu.memory_space<vmem>>, vector<1x8x1xf32>
    %850 = vector.shape_cast %849 : vector<1x8x1xf32> to vector<8x1xf32>
    %851 = vector.extract_strided_slice %841 {offsets = [1, 0], sizes = [1, 256], strides = [1, 1]} : vector<8x256xf32> to vector<1x256xf32>
    %852 = vector.broadcast %850 : vector<8x1xf32> to vector<8x256xf32>
    %853 = vector.broadcast %851 : vector<1x256xf32> to vector<8x256xf32>
    %854 = arith.mulf %852, %853 : vector<8x256xf32>
    %855 = arith.addf %848, %854 : vector<8x256xf32>
    %c66 = arith.constant 66 : index
    %c0_287 = arith.constant 0 : index
    %c0_288 = arith.constant 0 : index
    %856 = vector.load %arg7[%c66, %c0_287, %c0_288] : memref<72x8x1xf32, #tpu.memory_space<vmem>>, vector<1x8x1xf32>
    %857 = vector.shape_cast %856 : vector<1x8x1xf32> to vector<8x1xf32>
    %858 = vector.extract_strided_slice %841 {offsets = [2, 0], sizes = [1, 256], strides = [1, 1]} : vector<8x256xf32> to vector<1x256xf32>
    %859 = vector.broadcast %857 : vector<8x1xf32> to vector<8x256xf32>
    %860 = vector.broadcast %858 : vector<1x256xf32> to vector<8x256xf32>
    %861 = arith.mulf %859, %860 : vector<8x256xf32>
    %862 = arith.addf %855, %861 : vector<8x256xf32>
    %c67 = arith.constant 67 : index
    %c0_289 = arith.constant 0 : index
    %c0_290 = arith.constant 0 : index
    %863 = vector.load %arg7[%c67, %c0_289, %c0_290] : memref<72x8x1xf32, #tpu.memory_space<vmem>>, vector<1x8x1xf32>
    %864 = vector.shape_cast %863 : vector<1x8x1xf32> to vector<8x1xf32>
    %865 = vector.extract_strided_slice %841 {offsets = [3, 0], sizes = [1, 256], strides = [1, 1]} : vector<8x256xf32> to vector<1x256xf32>
    %866 = vector.broadcast %864 : vector<8x1xf32> to vector<8x256xf32>
    %867 = vector.broadcast %865 : vector<1x256xf32> to vector<8x256xf32>
    %868 = arith.mulf %866, %867 : vector<8x256xf32>
    %869 = arith.addf %862, %868 : vector<8x256xf32>
    %c68 = arith.constant 68 : index
    %c0_291 = arith.constant 0 : index
    %c0_292 = arith.constant 0 : index
    %870 = vector.load %arg7[%c68, %c0_291, %c0_292] : memref<72x8x1xf32, #tpu.memory_space<vmem>>, vector<1x8x1xf32>
    %871 = vector.shape_cast %870 : vector<1x8x1xf32> to vector<8x1xf32>
    %872 = vector.extract_strided_slice %841 {offsets = [4, 0], sizes = [1, 256], strides = [1, 1]} : vector<8x256xf32> to vector<1x256xf32>
    %873 = vector.broadcast %871 : vector<8x1xf32> to vector<8x256xf32>
    %874 = vector.broadcast %872 : vector<1x256xf32> to vector<8x256xf32>
    %875 = arith.mulf %873, %874 : vector<8x256xf32>
    %876 = arith.addf %869, %875 : vector<8x256xf32>
    %c69 = arith.constant 69 : index
    %c0_293 = arith.constant 0 : index
    %c0_294 = arith.constant 0 : index
    %877 = vector.load %arg7[%c69, %c0_293, %c0_294] : memref<72x8x1xf32, #tpu.memory_space<vmem>>, vector<1x8x1xf32>
    %878 = vector.shape_cast %877 : vector<1x8x1xf32> to vector<8x1xf32>
    %879 = vector.extract_strided_slice %841 {offsets = [5, 0], sizes = [1, 256], strides = [1, 1]} : vector<8x256xf32> to vector<1x256xf32>
    %880 = vector.broadcast %878 : vector<8x1xf32> to vector<8x256xf32>
    %881 = vector.broadcast %879 : vector<1x256xf32> to vector<8x256xf32>
    %882 = arith.mulf %880, %881 : vector<8x256xf32>
    %883 = arith.addf %876, %882 : vector<8x256xf32>
    %c70 = arith.constant 70 : index
    %c0_295 = arith.constant 0 : index
    %c0_296 = arith.constant 0 : index
    %884 = vector.load %arg7[%c70, %c0_295, %c0_296] : memref<72x8x1xf32, #tpu.memory_space<vmem>>, vector<1x8x1xf32>
    %885 = vector.shape_cast %884 : vector<1x8x1xf32> to vector<8x1xf32>
    %886 = vector.extract_strided_slice %841 {offsets = [6, 0], sizes = [1, 256], strides = [1, 1]} : vector<8x256xf32> to vector<1x256xf32>
    %887 = vector.broadcast %885 : vector<8x1xf32> to vector<8x256xf32>
    %888 = vector.broadcast %886 : vector<1x256xf32> to vector<8x256xf32>
    %889 = arith.mulf %887, %888 : vector<8x256xf32>
    %890 = arith.addf %883, %889 : vector<8x256xf32>
    %c71 = arith.constant 71 : index
    %c0_297 = arith.constant 0 : index
    %c0_298 = arith.constant 0 : index
    %891 = vector.load %arg7[%c71, %c0_297, %c0_298] : memref<72x8x1xf32, #tpu.memory_space<vmem>>, vector<1x8x1xf32>
    %892 = vector.shape_cast %891 : vector<1x8x1xf32> to vector<8x1xf32>
    %893 = vector.extract_strided_slice %841 {offsets = [7, 0], sizes = [1, 256], strides = [1, 1]} : vector<8x256xf32> to vector<1x256xf32>
    %894 = vector.broadcast %892 : vector<8x1xf32> to vector<8x256xf32>
    %895 = vector.broadcast %893 : vector<1x256xf32> to vector<8x256xf32>
    %896 = arith.mulf %894, %895 : vector<8x256xf32>
    %897 = arith.addf %890, %896 : vector<8x256xf32>
    %c0_299 = arith.constant 0 : index
    %c0_300 = arith.constant 0 : index
    %898 = vector.load %arg8[%c0_299, %c0_300] : memref<8x1xf32, #tpu.memory_space<vmem>>, vector<8x1xf32>
    %899 = vector.broadcast %898 : vector<8x1xf32> to vector<8x256xf32>
    %900 = arith.addf %897, %899 : vector<8x256xf32>
    %c0_301 = arith.constant 0 : index
    %c0_302 = arith.constant 0 : index
    %c0_303 = arith.constant 0 : index
    %901 = vector.load %arg9[%c0_301, %c0_302, %c0_303] : memref<1x8x256xf32, #tpu.memory_space<vmem>>, vector<1x8x256xf32>
    %902 = vector.shape_cast %901 : vector<1x8x256xf32> to vector<8x256xf32>
    %903 = vector.shape_cast %900 : vector<8x256xf32> to vector<1x8x256xf32>
    tpu.vector_store %arg9[%c0_301, %c0_302, %c0_303], %903 {strides = array<i32>} : memref<1x8x256xf32, #tpu.memory_space<vmem>>, vector<1x8x256xf32>,
    return
  }
  func.func @transform_0(%arg0: i32) -> (i32, i32, i32) {
    %c0_i32 = arith.constant 0 : i32
    %c0_i32_0 = arith.constant 0 : i32
    %c0_i32_1 = arith.constant 0 : i32
    return %arg0, %c0_i32, %c0_i32_0 : i32, i32, i32
  }
  func.func @transform_1(%arg0: i32) -> (i32, i32) {
    %c0_i32 = arith.constant 0 : i32
    %c0_i32_0 = arith.constant 0 : i32
    %c0_i32_1 = arith.constant 0 : i32
    return %c0_i32, %c0_i32_0 : i32, i32
  }
  func.func @transform_2(%arg0: i32) -> (i32, i32, i32) {
    %c0_i32 = arith.constant 0 : i32
    %c0_i32_0 = arith.constant 0 : i32
    %c0_i32_1 = arith.constant 0 : i32
    %c0_i32_2 = arith.constant 0 : i32
    return %c0_i32, %c0_i32_0, %c0_i32_1 : i32, i32, i32
  }
  func.func @transform_3(%arg0: i32) -> (i32, i32) {
    %c0_i32 = arith.constant 0 : i32
    %c0_i32_0 = arith.constant 0 : i32
    %c0_i32_1 = arith.constant 0 : i32
    return %c0_i32, %c0_i32_0 : i32, i32
  }
  func.func @transform_4(%arg0: i32) -> (i32, i32, i32) {
    %c0_i32 = arith.constant 0 : i32
    %c0_i32_0 = arith.constant 0 : i32
    %c0_i32_1 = arith.constant 0 : i32
    %c0_i32_2 = arith.constant 0 : i32
    return %c0_i32, %c0_i32_0, %c0_i32_1 : i32, i32, i32
  }
  func.func @transform_5(%arg0: i32) -> (i32, i32) {
    %c0_i32 = arith.constant 0 : i32
    %c0_i32_0 = arith.constant 0 : i32
    %c0_i32_1 = arith.constant 0 : i32
    return %c0_i32, %c0_i32_0 : i32, i32
  }
  func.func @transform_6(%arg0: i32) -> (i32, i32, i32) {
    %c0_i32 = arith.constant 0 : i32
    %c0_i32_0 = arith.constant 0 : i32
    %c0_i32_1 = arith.constant 0 : i32
    %c0_i32_2 = arith.constant 0 : i32
    return %c0_i32, %c0_i32_0, %c0_i32_1 : i32, i32, i32
  }
  func.func @transform_7(%arg0: i32) -> (i32, i32) {
    %c0_i32 = arith.constant 0 : i32
    %c0_i32_0 = arith.constant 0 : i32
    %c0_i32_1 = arith.constant 0 : i32
    return %c0_i32, %c0_i32_0 : i32, i32
  }
  func.func @transform_8(%arg0: i32) -> (i32, i32, i32) {
    %c0_i32 = arith.constant 0 : i32
    %c0_i32_0 = arith.constant 0 : i32
    %c0_i32_1 = arith.constant 0 : i32
    return %arg0, %c0_i32, %c0_i32_0 : i32, i32, i32
  }
}

</mosaic_0001>

<bundles_post_ra>
// kernel: bottleneck_forward.1
= control target key start
LH: loop header
LB: loop body
LE: loop exit
PB: predicated region body
PF: predicated region fallthrough
CT: control target
= control target key end

     0   :  { %s3062_s27 = smov 0   ;;  %s4332_s0 = inlined_call_operand.vmem [shape: f32[2,4,256], index: 0, kind: input, shape index: {}]   ;;  %s4333_s1 = inlined_call_operand.vmem [shape: f32[9,256], index: 1, kind: input, shape index: {}]   ;;  %s4334_s2 = inlined_call_operand.vmem [shape: f32[36,8,1], index: 2, kind: input, shape index: {}]   ;;  %s4335_s3 = inlined_call_operand.vmem [shape: f32[8,1], index: 3, kind: input, shape index: {}]   ;;  %s4336_s4 = inlined_call_operand.vmem [shape: f32[8,8,1], index: 4, kind: input, shape index: {}]   ;;  %s4337_s5 = inlined_call_operand.vmem [shape: f32[8,1], index: 5, kind: input, shape index: {}]   ;;  %s4338_s6 = inlined_call_operand.vmem [shape: f32[72,8,1], index: 6, kind: input, shape index: {}]   ;;  %s4339_s7 = inlined_call_operand.vmem [shape: f32[8,1], index: 7, kind: input, shape index: {}]   ;;  %s4340_s8 = inlined_call_operand.vmem [shape: f32[2,8,256], index: 8, kind: output, shape index: {}]  }
   0x1 LB: > { %s2850_s28 = sadd.s32 4294967295, %s3006_s27   ;;  %p2854_p0 = scmp.ge.s32.totalorder %s3006_s27, 1  ;;  %s3006_s27 = sphi %s3062_s27, %s18_s27  }
   0x2   : > { %p262_p1 = scmp.lt.s32.totalorder %s3006_s27, 3 }
   0x4   : > { %p263_p2 = pnand %p2854_p0, %p262_p1 }
   0x5   : > { %v333_v0 = vld [vmem:[%s4334_s2] sm:$0xff] (!%p263_p2)  ;;  %p296_p3 = scmp.lt.s32.totalorder (!%p263_p2), %s2850_s28, 1  ;;  %v3008_v1 = vmov (!%p263_p2), 0   ;;  %v2859_v2 = vld [vmem:[%s4334_s2 + $0x8] sm:$0xff] (!%p263_p2)  ;;  %s3009_s15 = smov (!%p263_p2), 17   ;;  %v2861_v4 = vld [vmem:[%s4334_s2 + $0x18] sm:$0xff] (!%p263_p2)  ;;  %v318_v48 = vlaneseq (!%p263_p2) }
   0x6   : > { %266 = sbr.rel (%p263_p2) target bundleno = 562 (0x232), region = 52  ;;  %2995 = vset.pattern.permute.xlu1 (!%p263_p2), %v3008_v1  ;;  %2996 = vset.pattern.permute.xlu0 (!%p263_p2), %v3008_v1  ;;  %v2860_v6 = vld [vmem:[%s4334_s2 + $0x10] sm:$0xff] (!%p263_p2)  ;;  %s3010_s20 = smov (!%p263_p2), 16   ;;  %v2862_v7 = vld [vmem:[%s4334_s2 + $0x20] sm:$0xff] (!%p263_p2)  ;;  %v2863_v9 = vld [vmem:[%s4334_s2 + $0x28] sm:$0xff] (!%p263_p2) }
   0x7   : > { %336 = vperm.xlu1 (!%p263_p2), %2995, %v333_v0   ;;  %v2864_v8 = vld [vmem:[%s4334_s2 + $0x30] sm:$0xff] (!%p263_p2)  ;;  %v2865_v10 = vld [vmem:[%s4334_s2 + $0x38] sm:$0xff] (!%p263_p2)  ;;  %s3011_s9 = smov (!%p263_p2), 15   ;;  %v2866_v11 = vld [vmem:[%s4334_s2 + $0x40] sm:$0xff] (!%p263_p2)  ;;  %s3012_s19 = smov (!%p263_p2), 1   ;;  %v3252_v51 = vshrl.u32 (!%p263_p2), %v318_v48, 7 }
   0x8   : > { %v2868_v12 = vld [vmem:[%s4334_s2 + $0x50] sm:$0xff] (!%p263_p2)  ;;  %v2867_v13 = vld [vmem:[%s4334_s2 + $0x48] sm:$0xff] (!%p263_p2)  ;;  %v2869_v14 = vld [vmem:[%s4334_s2 + $0x58] sm:$0xff] (!%p263_p2)  ;;  %s3013_s21 = smov (!%p263_p2), 127   ;;  %s3015_s24 = smov (!%p263_p2), 112   ;;  %v3257_v53 = vand.u32 (!%p263_p2), 127, %v318_v48 }
   0x9   : > { %v2870_v15 = vld [vmem:[%s4334_s2 + $0x60] sm:$0xff] (!%p263_p2)  ;;  %v2872_v16 = vld [vmem:[%s4334_s2 + $0x70] sm:$0xff] (!%p263_p2)  ;;  %v2871_v17 = vld [vmem:[%s4334_s2 + $0x68] sm:$0xff] (!%p263_p2)  ;;  %s3016_s16 = smov (!%p263_p2), 111   ;;  %v3263_v55 = vsub.s32 (!%p263_p2), 0, %v3252_v51 }
   0xa   : > { %v2874_v18 = vld [vmem:[%s4334_s2 + $0x80] sm:$0xff] (!%p263_p2)  ;;  %v2873_v19 = vld [vmem:[%s4334_s2 + $0x78] sm:$0xff] (!%p263_p2)  ;;  %v2876_v20 = vld [vmem:[%s4334_s2 + $0x90] sm:$0xff] (!%p263_p2)  ;;  %vm320_vm0 = vcmp.lt.s32.totalorder (!%p263_p2), %v3257_v53, 17  ;;  %vm412_vm1 = vcmp.lt.s32.totalorder (!%p263_p2), %v3257_v53, 16  ;;  %vm505_vm2 = vcmp.lt.s32.totalorder (!%p263_p2), %v3257_v53, 15 }
   0xb   : > { %355 = vperm.xlu1 (!%p263_p2), %2995, %v2859_v2   ;;  %v2875_v21 = vld [vmem:[%s4334_s2 + $0x88] sm:$0xff] (!%p263_p2)  ;;  %v2877_v22 = vld [vmem:[%s4334_s2 + $0x98] sm:$0xff] (!%p263_p2)  ;;  %v2878_v23 = vld [vmem:[%s4334_s2 + $0xa0] sm:$0xff] (!%p263_p2)  ;;  %vm598_vm3 = vcmp.lt.s32.totalorder (!%p263_p2), %v3257_v53, 1  ;;  %vm807_vm4 = vcmp.lt.s32.totalorder (!%p263_p2), %v3257_v53, 127  ;;  %vm900_vm5 = vcmp.lt.s32.totalorder (!%p263_p2), %v3257_v53, 113 }
   0xc   : > { %v2880_v24 = vld [vmem:[%s4334_s2 + $0xb0] sm:$0xff] (!%p263_p2)  ;;  %v2879_v25 = vld [vmem:[%s4334_s2 + $0xa8] sm:$0xff] (!%p263_p2)  ;;  %v2881_v26 = vld [vmem:[%s4334_s2 + $0xb8] sm:$0xff] (!%p263_p2)  ;;  %vm993_vm6 = vcmp.lt.s32.totalorder (!%p263_p2), %v3257_v53, 112  ;;  %vm1086_vm7 = vcmp.lt.s32.totalorder (!%p263_p2), %v3257_v53, 111 }
   0xd   : > { %s4342_s28 = smov (!%p296_p3, %s2850_s28), 1  ;;  %v2882_v27 = vld [vmem:[%s4334_s2 + $0xc0] sm:$0xff]  ;;  %v2884_v28 = vld [vmem:[%s4334_s2 + $0xd0] sm:$0xff]  ;;  %v2883_v29 = vld [vmem:[%s4334_s2 + $0xc8] sm:$0xff] }
   0xe   : > { %s2976_s11 = sshll.u32 %s4342_s28, 3  ;;  %v2885_v30 = vld [vmem:[%s4334_s2 + $0xd8] sm:$0xff]  ;;  %v2886_v31 = vld [vmem:[%s4334_s2 + $0xe0] sm:$0xff]  ;;  %v2888_v32 = vld [vmem:[%s4334_s2 + $0xf0] sm:$0xff] }
   0xf   : > { %s300_s14 = scalar_lea.vmem %s4332_s0, %s2976_s11  ;;  %393 = vperm.xlu1 %2995, %v2861_v4   ;;  %s3014_s11 = smov 113   ;;  %v2887_v33 = vld [vmem:[%s4334_s2 + $0xe8] sm:$0xff]  ;;  %v2889_v34 = vld [vmem:[%s4334_s2 + $0xf8] sm:$0xff]  ;;  %v2892_v35 = vld [vmem:[%s4334_s2 + $0x100] sm:$0xff] }
  0x10   : > { %v3082_v3 = vld [vmem:[%s300_s14] sm:$0xff]  ;;  %v2894_v36 = vld [vmem:[%s4334_s2 + $0x110] sm:$0xff]  ;;  %v2893_v37 = vld [vmem:[%s4334_s2 + $0x108] sm:$0xff]  ;;  %s2977_s14 = sshll.u32 %s4342_s28, 4 }
  0x11   : > { %314 = vrot.lane.b32.xlu0 %v3082_v3, %s3009_s15  ;;  %v3091_v5 = vcombine.high %v3082_v3, %v3082_v3  ;;  %v1175_v38 = vld [vmem:[%s4335_s3] sm:$0xff]  ;;  %v2895_v39 = vld [vmem:[%s4334_s2 + $0x118] sm:$0xff]  ;;  %v2896_v40 = vld [vmem:[%s4336_s4 + $0x8] sm:$0xff]  ;;  %s305_s17 = scalar_lea.vmem %s4340_s8, %s2977_s14 }
  0x12   : > { %v1189_v41 = vld [vmem:[%s4336_s4] sm:$0xff]  ;;  %v2898_v42 = vld [vmem:[%s4336_s4 + $0x18] sm:$0xff]  ;;  %v2897_v43 = vld [vmem:[%s4336_s4 + $0x10] sm:$0xff] }
  0x13   : > { %408 = vrot.lane.b32.xlu1 %v3082_v3, %s3010_s20  ;;  %v2900_v44 = vld [vmem:[%s4336_s4 + $0x28] sm:$0xff]  ;;  %v2899_v45 = vld [vmem:[%s4336_s4 + $0x20] sm:$0xff]  ;;  %v2902_v46 = vld [vmem:[%s4336_s4 + $0x38] sm:$0xff] }
  0x14   : > { %v2901_v47 = vld [vmem:[%s4336_s4 + $0x30] sm:$0xff]  ;;  %v1362_v49 = vld [vmem:[%s4338_s6] sm:$0xff]  ;;  %v2903_v56 = vld [vmem:[%s4338_s6 + $0x8] sm:$0xff] }
  0x15   : > { %316 = vrot.lane.b32.xlu0 %v3091_v5, %s3009_s15  ;;  %v1340_v52 = vld [vmem:[%s4337_s5] sm:$0xff]  ;;  %v2904_v54 = vld [vmem:[%s4338_s6 + $0x10] sm:$0xff]  ;;  %v3276_v58 = vld [vmem:[%s4333_s1 + $0x8] sm:$0xff] }
  0x16   : > { %v3271_v57 = vld [vmem:[%s4333_s1] sm:$0xff]  ;;  %v3288_v63 = vrot.slane %v3276_v58, %v3263_v55  ;;  %v2905_v0 = vld [vmem:[%s4338_s6 + $0x18] sm:$0xff] }
  0x17   : > { %429 = vperm.xlu1 %2995, %v2862_v7   ;;  %v2906_v61 = vld [vmem:[%s4338_s6 + $0x20] sm:$0xff]  ;;  %v3284_v62 = vrot.slane %v3271_v57, %v3263_v55 }
  0x19   : > { %374 = vperm.xlu0 %2996, %v2860_v6  }
  0x1b   : > { %467 = vperm.xlu1 %2995, %v2864_v8   ;;  %v3303_v8 = vsub.s32 1, %v3252_v51 }
  0x1d   : > { %410 = vrot.lane.b32.xlu0 %v3091_v5, %s3010_s20 }
  0x1f   : > { %501 = vrot.lane.b32.xlu1 %v3082_v3, %s3011_s9 }
  0x21   : > { %448 = vperm.xlu0 %2996, %v2863_v9   ;;  %v2907_v9 = vld [vmem:[%s4338_s6 + $0x28] sm:$0xff] }
  0x23   : > { %522 = vperm.xlu1 %2995, %v2866_v11   ;;  %v3309_v11 = vsub.s32 2, %v3252_v51 }
  0x25   : > { %486 = vperm.xlu0 %2996, %v2865_v10  }
  0x27   : > { %560 = vperm.xlu1 %2995, %v2868_v12   ;;  %v2910_v12 = vld [vmem:[%s4338_s6 + $0x40] sm:$0xff] }
  0x29   : > { %503 = vrot.lane.b32.xlu0 %v3091_v5, %s3011_s9 }
  0x2b   : > { %594 = vrot.lane.b32.xlu1 %v3082_v3, %s3012_s19 }
  0x2d   : > { %541 = vperm.xlu0 %2996, %v2867_v13  }
  0x2f   : > { %615 = vperm.xlu1 %2995, %v2870_v15  }
  0x31   : > { %579 = vperm.xlu0 %2996, %v2869_v14  }
  0x33   : > { %653 = vperm.xlu1 %2995, %v2872_v16  }
  0x35   : > { %596 = vrot.lane.b32.xlu0 %v3091_v5, %s3012_s19 }
  0x37   : > { %691 = vperm.xlu1 %2995, %v2874_v18  }
  0x39   : > { %634 = vperm.xlu0 %2996, %v2871_v17   ;;  %v2909_v17 = vld [vmem:[%s4338_s6 + $0x38] sm:$0xff] }
  0x3b   : > { %749 = vperm.xlu1 %2995, %v2876_v20  }
  0x3d   : > { %672 = vperm.xlu0 %2996, %v2873_v19  }
  0x3f   : > { %803 = vrot.lane.b32.xlu1 %v3082_v3, %s3013_s21 }
  0x41   : > { %720 = vperm.xlu0 %2996, %v2875_v21  }
  0x43   : > { %824 = vperm.xlu1 %2995, %v2878_v23  }
  0x45   : > { %778 = vperm.xlu0 %2996, %v2877_v22  }
  0x47   : > { %862 = vperm.xlu1 %2995, %v2880_v24   ;;  %v3324_v24 = vsub.s32 3, %v3252_v51 }
  0x49   : > { %805 = vrot.lane.b32.xlu0 %v3091_v5, %s3013_s21 }
  0x4b   : > { %896 = vrot.lane.b32.xlu1 %v3082_v3, %s3014_s11 }
  0x4d   : > { %843 = vperm.xlu0 %2996, %v2879_v25   ;;  %v2912_v25 = vld [vmem:[%s4338_s6 + $0x50] sm:$0xff] }
  0x4f   : > { %917 = vperm.xlu1 %2995, %v2882_v27   ;;  %v3336_v27 = vrot.slane %v3276_v58, %v3303_v8 }
  0x51   : > { %881 = vperm.xlu0 %2996, %v2881_v26   ;;  %v3332_v26 = vrot.slane %v3271_v57, %v3303_v8 }
  0x53   : > { %955 = vperm.xlu1 %2995, %v2884_v28  }
  0x55   : > { %898 = vrot.lane.b32.xlu0 %v3091_v5, %s3014_s11 }
  0x57   : > { %989 = vrot.lane.b32.xlu1 %v3082_v3, %s3015_s24 }
  0x59   : > { %936 = vperm.xlu0 %2996, %v2883_v29  }
  0x5b   : > { %1010 = vperm.xlu1 %2995, %v2886_v31  }
  0x5d   : > { %974 = vperm.xlu0 %2996, %v2885_v30  }
  0x5f   : > { %1048 = vperm.xlu1 %2995, %v2888_v32   ;;  %v2911_v32 = vld [vmem:[%s4338_s6 + $0x48] sm:$0xff] }
  0x61   : > { %991 = vrot.lane.b32.xlu0 %v3091_v5, %s3015_s24 }
  0x63   : > { %1082 = vrot.lane.b32.xlu1 %v3082_v3, %s3016_s16 }
  0x65   : > { %1029 = vperm.xlu0 %2996, %v2887_v33  }
  0x67   : > { %1103 = vperm.xlu1 %2995, %v2892_v35  }
  0x69   : > { %1067 = vperm.xlu0 %2996, %v2889_v34  }
  0x6b   : > { %1141 = vperm.xlu1 %2995, %v2894_v36  }
  0x6d   : > { %1084 = vrot.lane.b32.xlu0 %v3091_v5, %s3016_s16  ;;  %v2908_v5 = vld [vmem:[%s4338_s6 + $0x30] sm:$0xff] }
  0x6f   : > { %1178 = vperm.xlu1 %2995, %v1175_v38  }
  0x71   : > { %1122 = vperm.xlu0 %2996, %v2893_v37  }
  0x73   : > { %1211 = vperm.xlu1 %2995, %v2896_v40  }
  0x75   : > { %1160 = vperm.xlu0 %2996, %v2895_v39  }
  0x77   : > { %1249 = vperm.xlu1 %2995, %v2898_v42  }
  0x79   : > { %1192 = vperm.xlu0 %2996, %v1189_v41   ;;  %v2914_v41 = vld [vmem:[%s4338_s6 + $0x60] sm:$0xff] }
  0x7b   : > { %1287 = vperm.xlu1 %2995, %v2900_v44  }
  0x7d   : > { %1230 = vperm.xlu0 %2996, %v2897_v43  }
  0x7f   : > { %1325 = vperm.xlu1 %2995, %v2902_v46   ;;  %v2913_v46 = vld [vmem:[%s4338_s6 + $0x58] sm:$0xff] }
  0x81   : > { %1268 = vperm.xlu0 %2996, %v2899_v45  }
  0x83   : > { %v315_v50 = vpop.permute.xlu0 %314  ;;  %1365 = vperm.xlu1 %2995, %v1362_v49  }
  0x85   : > { %1306 = vperm.xlu0 %2996, %v2901_v47  }
  0x86   : > { %v337_v59 = vpop.permute.xlu1 %336 }
  0x87   : > { %v317_v60 = vpop.permute.xlu0 %316  ;;  %1403 = vperm.xlu1 %2995, %v2904_v54  }
  0x88   : > { %v321_v1 = vsel %vm320_vm0, %v315_v50, %v317_v60  ;;  %v322_v2 = vsel %vm320_vm0, %v317_v60, %v315_v50  ;;  %v2916_v60 = vld [vmem:[%s4338_s6 + $0x70] sm:$0xff] }
  0x89   : > { %1343 = vperm.xlu0 %2996, %v1340_v52   ;;  %v331_v6 = vmul.f32 %v3284_v62, %v322_v2  ;;  %v332_v7 = vmul.f32 %v3288_v63, %v321_v1 }
  0x8a   : > { %v356_v4 = vpop.permute.xlu1 %355 }
  0x8b   : > { %1441 = vperm.xlu1 %2995, %v2906_v61   ;;  %v342_v13 = vrot.slane %v331_v6, %v3263_v55  ;;  %v346_v14 = vrot.slane %v332_v7, %v3263_v55  ;;  %v361_v15 = vrot.slane %v331_v6, %v3303_v8  ;;  %v365_v16 = vrot.slane %v332_v7, %v3303_v8 }
  0x8c   : > { %v380_v21 = vrot.slane %v331_v6, %v3309_v11  ;;  %v384_v22 = vrot.slane %v332_v7, %v3309_v11  ;;  %v399_v37 = vrot.slane %v331_v6, %v3324_v24  ;;  %v403_v38 = vrot.slane %v332_v7, %v3324_v24 }
  0x8d   : > { %1384 = vperm.xlu0 %2996, %v2903_v56   ;;  %v366_v19 = vmul.f32 %v361_v15, %v356_v4  ;;  %v367_v20 = vmul.f32 %v365_v16, %v356_v4  ;;  %v347_v28 = vmul.f32 %v342_v13, %v337_v59  ;;  %v348_v29 = vmul.f32 %v346_v14, %v337_v59  ;;  %v2915_v4 = vld [vmem:[%s4338_s6 + $0x68] sm:$0xff]  ;;  %v2918_v15 = vld [vmem:[%s4338_s6 + $0x80] sm:$0xff] }
  0x8e   : > { %v394_v10 = vpop.permute.xlu1 %393 }
  0x8f   : > { %1479 = vperm.xlu1 %2995, %v2908_v5   ;;  %v368_v34 = vadd.f32 %v366_v19, %v347_v28  ;;  %v369_v35 = vadd.f32 %v367_v20, %v348_v29  ;;  %v404_v48 = vmul.f32 %v399_v37, %v394_v10  ;;  %v405_v49 = vmul.f32 %v403_v38, %v394_v10  ;;  %v2917_v20 = vld [vmem:[%s4338_s6 + $0x78] sm:$0xff] }
  0x90   : > { %v3377_v19 = vrot.slane %v3276_v58, %v3309_v11 }
  0x91   : > { %1422 = vperm.xlu0 %2996, %v2905_v0  }
  0x92   : > { %v409_v18 = vpop.permute.xlu1 %408 }
  0x93   : > { %1525 = vperm.xlu1 %2995, %v2910_v12  }
  0x95   : > { %1460 = vperm.xlu0 %2996, %v2907_v9  }
  0x96   : > { %v430_v33 = vpop.permute.xlu1 %429 }
  0x97   : > { %1563 = vperm.xlu1 %2995, %v2912_v25  }
  0x98   : > { %v375_v23 = vpop.permute.xlu0 %374 }
  0x99   : > { %1498 = vperm.xlu0 %2996, %v2909_v17   ;;  %v385_v30 = vmul.f32 %v380_v21, %v375_v23  ;;  %v386_v31 = vmul.f32 %v384_v22, %v375_v23 }
  0x9a   : > { %v468_v47 = vpop.permute.xlu1 %467 }
  0x9b   : > { %v387_v42 = vadd.f32 %v385_v30, %v368_v34  ;;  %v388_v43 = vadd.f32 %v386_v31, %v369_v35  ;;  %1601 = vperm.xlu1 %2995, %v2914_v41  }
  0x9c   : > { %v411_v36 = vpop.permute.xlu0 %410 }
  0x9d   : > { %v413_v39 = vsel %vm412_vm1, %v409_v18, %v411_v36  ;;  %v414_v40 = vsel %vm412_vm1, %v411_v36, %v409_v18  ;;  %1544 = vperm.xlu0 %2996, %v2911_v32   ;;  %v406_v61 = vadd.f32 %v404_v48, %v387_v42  ;;  %v407_v0 = vadd.f32 %v405_v49, %v388_v43 }
  0x9e   : > { %v423_v44 = vmul.f32 %v3332_v26, %v414_v40  ;;  %v424_v45 = vmul.f32 %v3336_v27, %v413_v39  ;;  %v502_v7 = vpop.permute.xlu1 %501  ;;  %v3373_v18 = vrot.slane %v3271_v57, %v3309_v11 }
  0x9f   : > { %1639 = vperm.xlu1 %2995, %v2916_v60  }
  0xa0   : > { %v435_v50 = vrot.slane %v423_v44, %v3263_v55  ;;  %v439_v52 = vrot.slane %v424_v45, %v3263_v55  ;;  %v449_v54 = vpop.permute.xlu0 %448  ;;  %v454_v56 = vrot.slane %v423_v44, %v3303_v8  ;;  %v458_v59 = vrot.slane %v424_v45, %v3303_v8 }
  0xa1   : > { %1582 = vperm.xlu0 %2996, %v2913_v46   ;;  %v473_v5 = vrot.slane %v423_v44, %v3309_v11  ;;  %v477_v6 = vrot.slane %v424_v45, %v3309_v11  ;;  %v492_v28 = vrot.slane %v423_v44, %v3324_v24  ;;  %v496_v29 = vrot.slane %v424_v45, %v3324_v24 }
  0xa2   : > { %v440_v1 = vmul.f32 %v435_v50, %v430_v33  ;;  %v441_v2 = vmul.f32 %v439_v52, %v430_v33  ;;  %v459_v12 = vmul.f32 %v454_v56, %v449_v54  ;;  %v460_v13 = vmul.f32 %v458_v59, %v449_v54  ;;  %v523_v21 = vpop.permute.xlu1 %522 }
  0xa3   : > { %v478_v22 = vmul.f32 %v473_v5, %v468_v47  ;;  %v479_v23 = vmul.f32 %v477_v6, %v468_v47  ;;  %1685 = vperm.xlu1 %2995, %v2918_v15  }
  0xa4   : > { %v442_v9 = vadd.f32 %v440_v1, %v406_v61  ;;  %v443_v10 = vadd.f32 %v441_v2, %v407_v0  ;;  %v487_v14 = vpop.permute.xlu0 %486  ;;  %v3399_v1 = vrot.slane %v3271_v57, %v3324_v24  ;;  %v3403_v2 = vrot.slane %v3276_v58, %v3324_v24 }
  0xa5   : > { %1620 = vperm.xlu0 %2996, %v2915_v4   ;;  %v497_v37 = vmul.f32 %v492_v28, %v487_v14  ;;  %v498_v38 = vmul.f32 %v496_v29, %v487_v14  ;;  %v3419_v28 = vsub.s32 5, %v3252_v51 }
  0xa6   : > { %v461_v16 = vadd.f32 %v459_v12, %v442_v9  ;;  %v462_v17 = vadd.f32 %v460_v13, %v443_v10  ;;  %v561_v36 = vpop.permute.xlu1 %560  ;;  %v3408_v12 = vsub.s32 4, %v3252_v51 }
  0xa8   : > { %v504_v25 = vpop.permute.xlu0 %503  ;;  %v480_v32 = vadd.f32 %v478_v22, %v461_v16  ;;  %v481_v33 = vadd.f32 %v479_v23, %v462_v17 }
  0xa9   : > { %v506_v30 = vsel %vm505_vm2, %v502_v7, %v504_v25  ;;  %v507_v31 = vsel %vm505_vm2, %v504_v25, %v502_v7  ;;  %1658 = vperm.xlu0 %2996, %v2917_v20   ;;  %v697_v25 = vrot.slane %v3082_v3, %v3263_v55 }
  0xaa   : > { %v516_v34 = vmul.f32 %v3373_v18, %v507_v31  ;;  %v517_v35 = vmul.f32 %v3377_v19, %v506_v30  ;;  %v499_v44 = vadd.f32 %v497_v37, %v480_v32  ;;  %v500_v45 = vadd.f32 %v498_v38, %v481_v33  ;;  %v595_v50 = vpop.permute.xlu1 %594 }
  0xab   : > { %v701_v32 = vrot.slane %v3082_v3, %v3408_v12 }
  0xac   : > { %v528_v39 = vrot.slane %v516_v34, %v3263_v55  ;;  %v532_v40 = vrot.slane %v517_v35, %v3263_v55  ;;  %v542_v41 = vpop.permute.xlu0 %541  ;;  %v547_v42 = vrot.slane %v516_v34, %v3303_v8  ;;  %v551_v43 = vrot.slane %v517_v35, %v3303_v8 }
  0xad   : > { %v566_v48 = vrot.slane %v516_v34, %v3309_v11  ;;  %v570_v49 = vrot.slane %v517_v35, %v3309_v11  ;;  %v585_v7 = vrot.slane %v516_v34, %v3324_v24  ;;  %v589_v9 = vrot.slane %v517_v35, %v3324_v24 }
  0xae   : > { %v533_v46 = vmul.f32 %v528_v39, %v523_v21  ;;  %v534_v47 = vmul.f32 %v532_v40, %v523_v21  ;;  %v552_v56 = vmul.f32 %v547_v42, %v542_v41  ;;  %v553_v59 = vmul.f32 %v551_v43, %v542_v41  ;;  %v616_v6 = vpop.permute.xlu1 %615 }
  0xaf   : > { %v571_v4 = vmul.f32 %v566_v48, %v561_v36  ;;  %v572_v5 = vmul.f32 %v570_v49, %v561_v36  ;;  %v707_v42 = vrot.slane %v697_v25, %v3263_v55  ;;  %v3431_v43 = vsub.s32 6, %v3252_v51 }
  0xb0   : > { %v535_v52 = vadd.f32 %v533_v46, %v499_v44  ;;  %v536_v54 = vadd.f32 %v534_v47, %v500_v45  ;;  %v580_v60 = vpop.permute.xlu0 %579  ;;  %v726_v44 = vrot.slane %v3082_v3, %v3303_v8  ;;  %v730_v45 = vrot.slane %v3082_v3, %v3419_v28 }
  0xb1   : > { %v590_v21 = vmul.f32 %v585_v7, %v580_v60  ;;  %v591_v22 = vmul.f32 %v589_v9, %v580_v60 }
  0xb2   : > { %v554_v61 = vadd.f32 %v552_v56, %v535_v52  ;;  %v555_v0 = vadd.f32 %v553_v59, %v536_v54  ;;  %v654_v23 = vpop.permute.xlu1 %653  ;;  %v711_v52 = vrot.slane %v701_v32, %v3263_v55  ;;  %v755_v59 = vrot.slane %v3082_v3, %v3309_v11 }
  0xb3   : > { %v736_v7 = vrot.slane %v726_v44, %v3303_v8  ;;  %v740_v9 = vrot.slane %v730_v45, %v3303_v8 }
  0xb4   : > { %v597_v10 = vpop.permute.xlu0 %596  ;;  %v573_v13 = vadd.f32 %v571_v4, %v554_v61  ;;  %v574_v14 = vadd.f32 %v572_v5, %v555_v0  ;;  %v765_v25 = vrot.slane %v755_v59, %v3309_v11 }
  0xb5   : > { %v599_v15 = vsel %vm598_vm3, %v595_v50, %v597_v10  ;;  %v600_v16 = vsel %vm598_vm3, %v597_v10, %v595_v50  ;;  %v3447_v10 = vsub.s32 7, %v3252_v51 }
  0xb6   : > { %v609_v17 = vmul.f32 %v3399_v1, %v600_v16  ;;  %v610_v20 = vmul.f32 %v3403_v2, %v599_v15  ;;  %v592_v33 = vadd.f32 %v590_v21, %v573_v13  ;;  %v593_v34 = vadd.f32 %v591_v22, %v574_v14  ;;  %v692_v41 = vpop.permute.xlu1 %691 }
  0xb7   : > { %v713_v21 = vmul.f32 %v711_v52, %v692_v41  ;;  %v788_v51 = vrot.slane %v3082_v3, %v3447_v10 }
  0xb8   : > { %v621_v29 = vrot.slane %v609_v17, %v3263_v55  ;;  %v625_v30 = vrot.slane %v610_v20, %v3263_v55  ;;  %v635_v31 = vpop.permute.xlu0 %634  ;;  %v640_v35 = vrot.slane %v609_v17, %v3303_v8  ;;  %v644_v36 = vrot.slane %v610_v20, %v3303_v8 }
  0xb9   : > { %v659_v37 = vrot.slane %v609_v17, %v3309_v11  ;;  %v663_v38 = vrot.slane %v610_v20, %v3309_v11  ;;  %v678_v54 = vrot.slane %v609_v17, %v3324_v24  ;;  %v682_v56 = vrot.slane %v610_v20, %v3324_v24 }
  0xba   : > { %v626_v39 = vmul.f32 %v621_v29, %v616_v6  ;;  %v627_v40 = vmul.f32 %v625_v30, %v616_v6  ;;  %v645_v48 = vmul.f32 %v640_v35, %v635_v31  ;;  %v646_v49 = vmul.f32 %v644_v36, %v635_v31  ;;  %v750_v5 = vpop.permute.xlu1 %749 }
  0xbb   : > { %v664_v60 = vmul.f32 %v659_v37, %v654_v23  ;;  %v665_v61 = vmul.f32 %v663_v38, %v654_v23  ;;  %v759_v6 = vrot.slane %v3082_v3, %v3431_v43  ;;  %v712_v20 = vmul.f32 %v707_v42, %v692_v41 }
  0xbc   : > { %v628_v46 = vadd.f32 %v626_v39, %v592_v33  ;;  %v629_v47 = vadd.f32 %v627_v40, %v593_v34  ;;  %v673_v50 = vpop.permute.xlu0 %672  ;;  %v784_v31 = vrot.slane %v3082_v3, %v3324_v24  ;;  %v3458_v39 = vrot.slane %v3271_v57, %v3419_v28 }
  0xbd   : > { %v683_v15 = vmul.f32 %v678_v54, %v673_v50  ;;  %v684_v16 = vmul.f32 %v682_v56, %v673_v50  ;;  %v769_v29 = vrot.slane %v759_v6, %v3309_v11  ;;  %v3462_v40 = vrot.slane %v3276_v58, %v3419_v28 }
  0xbe   : > { %v647_v0 = vadd.f32 %v645_v48, %v628_v46  ;;  %v648_v4 = vadd.f32 %v646_v49, %v629_v47  ;;  %v804_v30 = vpop.permute.xlu1 %803  ;;  %v770_v42 = vmul.f32 %v765_v25, %v750_v5  ;;  %v794_v44 = vrot.slane %v784_v31, %v3324_v24 }
  0xbf   : > { %v771_v3 = vmul.f32 %v769_v29, %v750_v5  ;;  %v798_v45 = vrot.slane %v788_v51, %v3324_v24  ;;  %v3481_v31 = vrot.slane %v3271_v57, %v3431_v43  ;;  %v3485_v51 = vrot.slane %v3276_v58, %v3431_v43 }
  0xc0   : > { %v666_v13 = vadd.f32 %v664_v60, %v647_v0  ;;  %v667_v14 = vadd.f32 %v665_v61, %v648_v4  ;;  %v721_v17 = vpop.permute.xlu0 %720 }
  0xc1   : > { %v741_v34 = vmul.f32 %v736_v7, %v721_v17  ;;  %v742_v35 = vmul.f32 %v740_v9, %v721_v17 }
  0xc2   : > { %v685_v22 = vadd.f32 %v683_v15, %v666_v13  ;;  %v686_v23 = vadd.f32 %v684_v16, %v667_v14  ;;  %v825_v41 = vpop.permute.xlu1 %824 }
  0xc4   : > { %v714_v32 = vadd.f32 %v712_v20, %v685_v22  ;;  %v715_v33 = vadd.f32 %v713_v21, %v686_v23  ;;  %v779_v36 = vpop.permute.xlu0 %778 }
  0xc5   : > { %v799_v59 = vmul.f32 %v794_v44, %v779_v36  ;;  %v800_v60 = vmul.f32 %v798_v45, %v779_v36 }
  0xc6   : > { %v743_v37 = vadd.f32 %v741_v34, %v714_v32  ;;  %v744_v38 = vadd.f32 %v742_v35, %v715_v33  ;;  %v863_v56 = vpop.permute.xlu1 %862 }
  0xc8   : > { %v806_v46 = vpop.permute.xlu0 %805  ;;  %v772_v49 = vadd.f32 %v770_v42, %v743_v37  ;;  %v773_v50 = vadd.f32 %v771_v3, %v744_v38 }
  0xc9   : > { %v808_v47 = vsel %vm807_vm4, %v804_v30, %v806_v46  ;;  %v809_v48 = vsel %vm807_vm4, %v806_v46, %v804_v30 }
  0xca   : > { %v818_v52 = vmul.f32 %v3458_v39, %v808_v47  ;;  %v819_v54 = vmul.f32 %v3462_v40, %v809_v48  ;;  %v801_v7 = vadd.f32 %v799_v59, %v772_v49  ;;  %v802_v9 = vadd.f32 %v800_v60, %v773_v50  ;;  %v897_v17 = vpop.permute.xlu1 %896 }
  0xcc   : > { %v830_v61 = vrot.slane %v818_v52, %v3263_v55  ;;  %v834_v0 = vrot.slane %v819_v54, %v3263_v55  ;;  %v844_v4 = vpop.permute.xlu0 %843  ;;  %v849_v5 = vrot.slane %v818_v52, %v3303_v8  ;;  %v853_v6 = vrot.slane %v819_v54, %v3303_v8 }
  0xcd   : > { %v868_v15 = vrot.slane %v818_v52, %v3309_v11  ;;  %v872_v16 = vrot.slane %v819_v54, %v3309_v11  ;;  %v887_v36 = vrot.slane %v818_v52, %v3324_v24  ;;  %v891_v37 = vrot.slane %v819_v54, %v3324_v24 }
  0xce   : > { %v835_v13 = vmul.f32 %v830_v61, %v825_v41  ;;  %v836_v14 = vmul.f32 %v834_v0, %v825_v41  ;;  %v854_v22 = vmul.f32 %v849_v5, %v844_v4  ;;  %v855_v23 = vmul.f32 %v853_v6, %v844_v4  ;;  %v918_v32 = vpop.permute.xlu1 %917 }
  0xcf   : > { %v873_v33 = vmul.f32 %v868_v15, %v863_v56  ;;  %v874_v34 = vmul.f32 %v872_v16, %v863_v56 }
  0xd0   : > { %v837_v20 = vadd.f32 %v835_v13, %v801_v7  ;;  %v838_v21 = vadd.f32 %v836_v14, %v802_v9  ;;  %v882_v25 = vpop.permute.xlu0 %881 }
  0xd1   : > { %v892_v47 = vmul.f32 %v887_v36, %v882_v25  ;;  %v893_v48 = vmul.f32 %v891_v37, %v882_v25 }
  0xd2   : > { %v856_v29 = vadd.f32 %v854_v22, %v837_v20  ;;  %v857_v30 = vadd.f32 %v855_v23, %v838_v21  ;;  %v956_v46 = vpop.permute.xlu1 %955  ;;  %v3504_v20 = vrot.slane %v3271_v57, %v3447_v10  ;;  %v3508_v21 = vrot.slane %v3276_v58, %v3447_v10 }
  0xd4   : > { %v899_v35 = vpop.permute.xlu0 %898  ;;  %v875_v42 = vadd.f32 %v873_v33, %v856_v29  ;;  %v876_v3 = vadd.f32 %v874_v34, %v857_v30 }
  0xd5   : > { %v901_v38 = vsel %vm900_vm5, %v897_v17, %v899_v35  ;;  %v902_v41 = vsel %vm900_vm5, %v899_v35, %v897_v17 }
  0xd6   : > { %v911_v44 = vmul.f32 %v3481_v31, %v901_v38  ;;  %v912_v45 = vmul.f32 %v3485_v51, %v902_v41  ;;  %v894_v59 = vadd.f32 %v892_v47, %v875_v42  ;;  %v895_v60 = vadd.f32 %v893_v48, %v876_v3  ;;  %v990_v6 = vpop.permute.xlu1 %989 }
  0xd8   : > { %v923_v49 = vrot.slane %v911_v44, %v3263_v55  ;;  %v927_v50 = vrot.slane %v912_v45, %v3263_v55  ;;  %v937_v52 = vpop.permute.xlu0 %936  ;;  %v942_v54 = vrot.slane %v911_v44, %v3303_v8  ;;  %v946_v56 = vrot.slane %v912_v45, %v3303_v8 }
  0xd9   : > { %v961_v4 = vrot.slane %v911_v44, %v3309_v11  ;;  %v965_v5 = vrot.slane %v912_v45, %v3309_v11  ;;  %v980_v30 = vrot.slane %v911_v44, %v3324_v24 }
  0xda   : > { %v928_v61 = vmul.f32 %v923_v49, %v918_v32  ;;  %v929_v0 = vmul.f32 %v927_v50, %v918_v32  ;;  %v947_v13 = vmul.f32 %v942_v54, %v937_v52  ;;  %v948_v14 = vmul.f32 %v946_v56, %v937_v52  ;;  %v1011_v22 = vpop.permute.xlu1 %1010 }
  0xdb   : > { %v966_v23 = vmul.f32 %v961_v4, %v956_v46  ;;  %v967_v25 = vmul.f32 %v965_v5, %v956_v46  ;;  %v984_v32 = vrot.slane %v912_v45, %v3324_v24 }
  0xdc   : > { %v930_v7 = vadd.f32 %v928_v61, %v894_v59  ;;  %v931_v9 = vadd.f32 %v929_v0, %v895_v60  ;;  %v975_v15 = vpop.permute.xlu0 %974 }
  0xdd   : > { %v985_v38 = vmul.f32 %v980_v30, %v975_v15  ;;  %v986_v41 = vmul.f32 %v984_v32, %v975_v15  ;;  %v2891_v15 = vld [vmem:[%s4333_s1 + $0x18] ss:$0 sm:$0xff] }
  0xde   : > { %v949_v16 = vadd.f32 %v947_v13, %v930_v7  ;;  %v950_v17 = vadd.f32 %v948_v14, %v931_v9  ;;  %v1049_v37 = vpop.permute.xlu1 %1048  ;;  %v2890_v14 = vld [vmem:[%s4333_s1 + $0x10] ss:$0 sm:$0xff] }
  0xe0   : > { %v992_v29 = vpop.permute.xlu0 %991  ;;  %v968_v57 = vadd.f32 %v966_v23, %v949_v16  ;;  %v969_v35 = vadd.f32 %v967_v25, %v950_v17 }
  0xe1   : > { %v994_v33 = vsel %vm993_vm6, %v990_v6, %v992_v29  ;;  %v995_v34 = vsel %vm993_vm6, %v992_v29, %v990_v6 }
  0xe2   : > { %v1004_v36 = vmul.f32 %v3504_v20, %v994_v33  ;;  %v1005_v58 = vmul.f32 %v3508_v21, %v995_v34  ;;  %v987_v47 = vadd.f32 %v985_v38, %v968_v57  ;;  %v988_v48 = vadd.f32 %v986_v41, %v969_v35  ;;  %v1083_v56 = vpop.permute.xlu1 %1082 }
  0xe4   : > { %v1016_v42 = vrot.slane %v1004_v36, %v3263_v55  ;;  %v1020_v3 = vrot.slane %v1005_v58, %v3263_v55  ;;  %v1030_v44 = vpop.permute.xlu0 %1029  ;;  %v1035_v45 = vrot.slane %v1004_v36, %v3303_v8  ;;  %v1039_v46 = vrot.slane %v1005_v58, %v3303_v8 }
  0xe5   : > { %v1054_v52 = vrot.slane %v1004_v36, %v3309_v11  ;;  %v1058_v54 = vrot.slane %v1005_v58, %v3309_v11  ;;  %v1073_v16 = vrot.slane %v1004_v36, %v3324_v24  ;;  %v1077_v17 = vrot.slane %v1005_v58, %v3324_v24 }
  0xe6   : > { %v1021_v49 = vmul.f32 %v1016_v42, %v1011_v22  ;;  %v1022_v50 = vmul.f32 %v1020_v3, %v1011_v22  ;;  %v1040_v61 = vmul.f32 %v1035_v45, %v1030_v44  ;;  %v1041_v0 = vmul.f32 %v1039_v46, %v1030_v44  ;;  %v1104_v13 = vpop.permute.xlu1 %1103 }
  0xe7   : > { %v1059_v7 = vmul.f32 %v1054_v52, %v1049_v37  ;;  %v1060_v9 = vmul.f32 %v1058_v54, %v1049_v37 }
  0xe8   : > { %v1023_v59 = vadd.f32 %v1021_v49, %v987_v47  ;;  %v1024_v60 = vadd.f32 %v1022_v50, %v988_v48  ;;  %v1068_v4 = vpop.permute.xlu0 %1067 }
  0xe9   : > { %v1078_v34 = vmul.f32 %v1073_v16, %v1068_v4  ;;  %v1079_v57 = vmul.f32 %v1077_v17, %v1068_v4 }
  0xea   : > { %v1042_v5 = vadd.f32 %v1040_v61, %v1023_v59  ;;  %v1043_v6 = vadd.f32 %v1041_v0, %v1024_v60  ;;  %v1142_v35 = vpop.permute.xlu1 %1141 }
  0xec   : > { %v1085_v22 = vpop.permute.xlu0 %1084  ;;  %v1061_v23 = vadd.f32 %v1059_v7, %v1042_v5  ;;  %v1062_v25 = vadd.f32 %v1060_v9, %v1043_v6 }
  0xed   : > { %v1087_v29 = vsel %vm1086_vm7, %v1083_v56, %v1085_v22  ;;  %v1088_v30 = vsel %vm1086_vm7, %v1085_v22, %v1083_v56 }
  0xee   : > { %v1097_v32 = vmul.f32 %v2890_v14, %v1087_v29  ;;  %v1098_v33 = vmul.f32 %v2891_v15, %v1088_v30  ;;  %v1080_v58 = vadd.f32 %v1078_v34, %v1061_v23  ;;  %v1081_v41 = vadd.f32 %v1079_v57, %v1062_v25  ;;  %v1179_v54 = vpop.permute.xlu1 %1178 }
  0xf0   : > { %v1109_v37 = vrot.slane %v1097_v32, %v3263_v55  ;;  %v1113_v36 = vrot.slane %v1098_v33, %v3263_v55  ;;  %v1123_v38 = vpop.permute.xlu0 %1122  ;;  %v1128_v42 = vrot.slane %v1097_v32, %v3303_v8  ;;  %v1132_v3 = vrot.slane %v1098_v33, %v3303_v8 }
  0xf1   : > { %v1147_v44 = vrot.slane %v1097_v32, %v3309_v11  ;;  %v1151_v45 = vrot.slane %v1098_v33, %v3309_v11  ;;  %v1166_v59 = vrot.slane %v1097_v32, %v3324_v24  ;;  %v1170_v60 = vrot.slane %v1098_v33, %v3324_v24 }
  0xf2   : > { %v1114_v46 = vmul.f32 %v1109_v37, %v1104_v13  ;;  %v1115_v47 = vmul.f32 %v1113_v36, %v1104_v13  ;;  %v1133_v50 = vmul.f32 %v1128_v42, %v1123_v38  ;;  %v1134_v52 = vmul.f32 %v1132_v3, %v1123_v38  ;;  %v1212_v17 = vpop.permute.xlu1 %1211 }
  0xf3   : > { %v1152_v61 = vmul.f32 %v1147_v44, %v1142_v35  ;;  %v1153_v0 = vmul.f32 %v1151_v45, %v1142_v35 }
  0xf4   : > { %v1116_v48 = vadd.f32 %v1114_v46, %v1080_v58  ;;  %v1117_v49 = vadd.f32 %v1115_v47, %v1081_v41  ;;  %v1161_v56 = vpop.permute.xlu0 %1160 }
  0xf5   : > { %v1171_v9 = vmul.f32 %v1166_v59, %v1161_v56  ;;  %v1172_v14 = vmul.f32 %v1170_v60, %v1161_v56 }
  0xf6   : > { %v1135_v4 = vadd.f32 %v1133_v50, %v1116_v48  ;;  %v1136_v5 = vadd.f32 %v1134_v52, %v1117_v49  ;;  %v1250_v34 = vpop.permute.xlu1 %1249 }
  0xf8   : > { %v1154_v6 = vadd.f32 %v1152_v61, %v1135_v4  ;;  %v1155_v7 = vadd.f32 %v1153_v0, %v1136_v5  ;;  %v1193_v15 = vpop.permute.xlu0 %1192 }
  0xfa   : > { %v1173_v13 = vadd.f32 %v1171_v9, %v1154_v6  ;;  %v1174_v16 = vadd.f32 %v1172_v14, %v1155_v7 }
  0xfc   : > { %v1181_v22 = vadd.f32 %v1179_v54, %v1173_v13  ;;  %v1182_v23 = vadd.f32 %v1179_v54, %v1174_v16  ;;  %v1231_v30 = vpop.permute.xlu0 %1230  ;;  %v1288_v54 = vpop.permute.xlu1 %1287 }
  0xfe   : > { %vm1183_vm8 = vcmp.ge.f32.partialorder %v1181_v22, 0.0  ;;  %vm1184_vm9 = vcmp.ge.f32.partialorder %v1182_v23, 0.0  ;;  %v1185_v25 = vmul.f32 0.2, %v1181_v22  ;;  %v1186_v29 = vmul.f32 0.2, %v1182_v23 }
 0x100   : > { %v1187_v32 = vsel %vm1183_vm8, %v1181_v22, %v1185_v25  ;;  %v1188_v33 = vsel %vm1184_vm9, %v1182_v23, %v1186_v29  ;;  %v1269_v47 = vpop.permute.xlu0 %1268 }
 0x101   : > { %v1217_v57 = vrot.slane %v1187_v32, %v3303_v8  ;;  %v1221_v35 = vrot.slane %v1188_v33, %v3303_v8  ;;  %v1198_v37 = vrot.slane %v1187_v32, %v3263_v55  ;;  %v1202_v36 = vrot.slane %v1188_v33, %v3263_v55 }
 0x102   : > { %v1255_v38 = vrot.slane %v1187_v32, %v3324_v24  ;;  %v1259_v58 = vrot.slane %v1188_v33, %v3324_v24  ;;  %v1236_v41 = vrot.slane %v1187_v32, %v3309_v11  ;;  %v1240_v42 = vrot.slane %v1188_v33, %v3309_v11 }
 0x103   : > { %v1222_v3 = vmul.f32 %v1217_v57, %v1212_v17  ;;  %v1223_v44 = vmul.f32 %v1221_v35, %v1212_v17  ;;  %v1203_v45 = vmul.f32 %v1198_v37, %v1193_v15  ;;  %v1204_v46 = vmul.f32 %v1202_v36, %v1193_v15 }
 0x104   : > { %v1241_v50 = vmul.f32 %v1236_v41, %v1231_v30  ;;  %v1242_v52 = vmul.f32 %v1240_v42, %v1231_v30  ;;  %v1293_v56 = vrot.slane %v1187_v32, %v3419_v28  ;;  %v1297_v59 = vrot.slane %v1188_v33, %v3419_v28  ;;  %v1307_v23 = vpop.permute.xlu0 %1306 }
 0x105   : > { %v1224_v48 = vadd.f32 %v1222_v3, %v1203_v45  ;;  %v1225_v49 = vadd.f32 %v1223_v44, %v1204_v46  ;;  %v1274_v60 = vrot.slane %v1187_v32, %v3408_v12  ;;  %v1278_v61 = vrot.slane %v1188_v33, %v3408_v12 }
 0x106   : > { %v1260_v0 = vmul.f32 %v1255_v38, %v1250_v34  ;;  %v1261_v4 = vmul.f32 %v1259_v58, %v1250_v34  ;;  %v1298_v13 = vmul.f32 %v1293_v56, %v1288_v54  ;;  %v1299_v16 = vmul.f32 %v1297_v59, %v1288_v54  ;;  %v1326_v34 = vpop.permute.xlu1 %1325  ;;  %v2920_v54 = vld [vmem:[%s4338_s6 + $0x90] sm:$0xff]  ;;  %v2921_v56 = vld [vmem:[%s4338_s6 + $0x98] sm:$0xff]  ;;  %v2922_v59 = vld [vmem:[%s4338_s6 + $0xa0] sm:$0xff] }
 0x107   : > { %v1243_v5 = vadd.f32 %v1241_v50, %v1224_v48  ;;  %v1244_v6 = vadd.f32 %v1242_v52, %v1225_v49  ;;  %v1279_v14 = vmul.f32 %v1274_v60, %v1269_v47  ;;  %v1280_v15 = vmul.f32 %v1278_v61, %v1269_v47  ;;  %v2919_v52 = vld [vmem:[%s4338_s6 + $0x88] sm:$0xff]  ;;  %v2924_v61 = vld [vmem:[%s4338_s6 + $0xb0] sm:$0xff] }
 0x108   : > { %v1331_v17 = vrot.slane %v1187_v32, %v3447_v10  ;;  %v1335_v22 = vrot.slane %v1188_v33, %v3447_v10  ;;  %v1312_v30 = vrot.slane %v1187_v32, %v3431_v43  ;;  %v1316_v57 = vrot.slane %v1188_v33, %v3431_v43  ;;  %v1344_v46 = vpop.permute.xlu0 %1343  ;;  %v2923_v60 = vld [vmem:[%s4338_s6 + $0xa8] sm:$0xff] }
 0x109   : > { %v1262_v7 = vadd.f32 %v1260_v0, %v1243_v5  ;;  %v1263_v9 = vadd.f32 %v1261_v4, %v1244_v6  ;;  %v2925_v0 = vld [vmem:[%s4338_s6 + $0xb8] sm:$0xff]  ;;  %v2926_v4 = vld [vmem:[%s4338_s6 + $0xc0] sm:$0xff]  ;;  %v2927_v5 = vld [vmem:[%s4338_s6 + $0xc8] sm:$0xff] }
 0x10a   : > { %v1317_v36 = vmul.f32 %v1312_v30, %v1307_v23  ;;  %v1318_v38 = vmul.f32 %v1316_v57, %v1307_v23  ;;  %v1336_v58 = vmul.f32 %v1331_v17, %v1326_v34  ;;  %v1337_v41 = vmul.f32 %v1335_v22, %v1326_v34  ;;  %v2928_v6 = vld [vmem:[%s4338_s6 + $0xd0] sm:$0xff]  ;;  %v2935_v17 = vld [vmem:[%s4338_s6 + $0x108] sm:$0xff]  ;;  %v2937_v23 = vld [vmem:[%s4338_s6 + $0x118] sm:$0xff] }
 0x10b   : > { %v1281_v25 = vadd.f32 %v1279_v14, %v1262_v7  ;;  %v1282_v29 = vadd.f32 %v1280_v15, %v1263_v9  ;;  %v2929_v7 = vld [vmem:[%s4338_s6 + $0xd8] sm:$0xff]  ;;  %v2930_v9 = vld [vmem:[%s4338_s6 + $0xe0] sm:$0xff]  ;;  %v2931_v14 = vld [vmem:[%s4338_s6 + $0xe8] sm:$0xff] }
 0x10c   : > { %v2932_v15 = vld [vmem:[%s4338_s6 + $0xf0] sm:$0xff]  ;;  %v2941_v57 = vld [vmem:[%s4338_s6 + $0x138] sm:$0xff]  ;;  %v2942_v34 = vld [vmem:[%s4338_s6 + $0x140] sm:$0xff] }
 0x10d   : > { %v1300_v35 = vadd.f32 %v1298_v13, %v1281_v25  ;;  %v1301_v37 = vadd.f32 %v1299_v16, %v1282_v29  ;;  %v2933_v13 = vld [vmem:[%s4338_s6 + $0xf8] sm:$0xff]  ;;  %v2934_v16 = vld [vmem:[%s4338_s6 + $0x100] sm:$0xff]  ;;  %v2936_v22 = vld [vmem:[%s4338_s6 + $0x110] sm:$0xff] }
 0x10e   : > { %v2938_v25 = vld [vmem:[%s4338_s6 + $0x120] sm:$0xff]  ;;  %v2939_v29 = vld [vmem:[%s4338_s6 + $0x128] sm:$0xff]  ;;  %v2940_v30 = vld [vmem:[%s4338_s6 + $0x130] sm:$0xff] }
 0x10f   : > { %v1319_v42 = vadd.f32 %v1317_v36, %v1300_v35  ;;  %v1320_v3 = vadd.f32 %v1318_v38, %v1301_v37  ;;  %v2943_v35 = vld [vmem:[%s4338_s6 + $0x148] sm:$0xff]  ;;  %v2944_v37 = vld [vmem:[%s4338_s6 + $0x150] sm:$0xff]  ;;  %v3659_v36 = vpop.permute.xlu1 %1365 }
 0x111   : > { %v1338_v44 = vadd.f32 %v1336_v58, %v1319_v42  ;;  %v1339_v45 = vadd.f32 %v1337_v41, %v1320_v3  ;;  %v3663_v58 = vpop.permute.xlu0 %1384  ;;  %v2945_v41 = vld [vmem:[%s4338_s6 + $0x158] sm:$0xff]  ;;  %v2946_v42 = vld [vmem:[%s4338_s6 + $0x160] sm:$0xff]  ;;  %v2947_v3 = vld [vmem:[%s4338_s6 + $0x168] sm:$0xff] }
 0x113   : > { %v1346_v47 = vadd.f32 %v1344_v46, %v1338_v44  ;;  %v1347_v48 = vadd.f32 %v1344_v46, %v1339_v45  ;;  %v3661_v38 = vpop.permute.xlu1 %1403  ;;  %v2948_v44 = vld [vmem:[%s4338_s6 + $0x170] sm:$0xff] }
 0x115   : > { %vm1348_vm10 = vcmp.ge.f32.partialorder %v1346_v47, 0.0  ;;  %vm1349_vm11 = vcmp.ge.f32.partialorder %v1347_v48, 0.0  ;;  %v1350_v49 = vmul.f32 0.2, %v1346_v47  ;;  %v1351_v32 = vmul.f32 0.2, %v1347_v48  ;;  %v3683_v46 = vpop.permute.xlu0 %1422 }
 0x117   : > { %v3561_v50 = vsel %vm1348_vm10, %v1346_v47, %v1350_v49  ;;  %v3563_v33 = vsel %vm1349_vm11, %v1347_v48, %v1351_v32  ;;  %v3681_v45 = vpop.permute.xlu1 %1441  ;;  %v2949_v47 = vld [vmem:[%s4338_s6 + $0x178] sm:$0xff]  ;;  %v2950_v48 = vld [vmem:[%s4338_s6 + $0x180] sm:$0xff] }
 0x118   : > { %1356 = vrot.lane.b32.xlu0 %v3563_v33, %s3009_s15  ;;  %1354 = vrot.lane.b32.xlu1 %v3561_v50, %s3009_s15 }
 0x119   : > { %v3693_v32 = vpop.permute.xlu0 %1460 }
 0x11b   : > { %v3691_v49 = vpop.permute.xlu1 %1479 }
 0x11c   : > { %1704 = vperm.xlu0 %2996, %v2919_v52   ;;  %1723 = vperm.xlu1 %2995, %v2920_v54   ;;  %v2951_v52 = vld [vmem:[%s4338_s6 + $0x188] sm:$0xff]  ;;  %v2952_v54 = vld [vmem:[%s4338_s6 + $0x190] sm:$0xff] }
 0x120   : > { %1742 = vperm.xlu0 %2996, %v2921_v56   ;;  %1761 = vperm.xlu1 %2995, %v2922_v59   ;;  %v3705_v56 = vpop.permute.xlu1 %1525  ;;  %v3707_v59 = vpop.permute.xlu0 %1498 }
 0x124   : > { %1780 = vperm.xlu0 %2996, %v2923_v60   ;;  %1513 = vrot.lane.b32.xlu1 %v3561_v50, %s3010_s20  ;;  %v2953_v60 = vld [vmem:[%s4338_s6 + $0x198] sm:$0xff] }
 0x128   : > { %1515 = vrot.lane.b32.xlu0 %v3563_v33, %s3010_s20  ;;  %1799 = vperm.xlu1 %2995, %v2924_v61   ;;  %v2954_v61 = vld [vmem:[%s4338_s6 + $0x1a0] sm:$0xff] }
 0x12c   : > { %1818 = vperm.xlu0 %2996, %v2925_v0   ;;  %1845 = vperm.xlu1 %2995, %v2926_v4   ;;  %v3715_v0 = vpop.permute.xlu1 %1563  ;;  %v3717_v4 = vpop.permute.xlu0 %1544 }
 0x130   : > { %1864 = vperm.xlu0 %2996, %v2927_v5   ;;  %1883 = vperm.xlu1 %2995, %v2928_v6   ;;  %v2955_v5 = vld [vmem:[%s4338_s6 + $0x1a8] sm:$0xff]  ;;  %v2956_v6 = vld [vmem:[%s4338_s6 + $0x1b0] sm:$0xff] }
 0x134   : > { %1902 = vperm.xlu0 %2996, %v2929_v7   ;;  %1673 = vrot.lane.b32.xlu1 %v3561_v50, %s3011_s9  ;;  %v2957_v7 = vld [vmem:[%s4338_s6 + $0x1b8] sm:$0xff] }
 0x138   : > { %1675 = vrot.lane.b32.xlu0 %v3563_v33, %s3011_s9  ;;  %1921 = vperm.xlu1 %2995, %v2930_v9   ;;  %v2958_v9 = vld [vmem:[%s4338_s6 + $0x1c0] sm:$0xff] }
 0x13c   : > { %1940 = vperm.xlu0 %2996, %v2931_v14   ;;  %1959 = vperm.xlu1 %2995, %v2932_v15   ;;  %v3731_v14 = vpop.permute.xlu1 %1601  ;;  %v3733_v15 = vpop.permute.xlu0 %1582 }
 0x140   : > { %1978 = vperm.xlu0 %2996, %v2933_v13   ;;  %1997 = vperm.xlu1 %2995, %v2934_v16   ;;  %v3735_v13 = vpop.permute.xlu1 %1639  ;;  %v3737_v16 = vpop.permute.xlu0 %1620 }
 0x144   : > { %2016 = vperm.xlu0 %2996, %v2935_v17   ;;  %1833 = vrot.lane.b32.xlu1 %v3561_v50, %s3012_s19  ;;  %v2959_v17 = vld [vmem:[%s4338_s6 + $0x1c8] sm:$0xff] }
 0x148   : > { %1835 = vrot.lane.b32.xlu0 %v3563_v33, %s3012_s19  ;;  %2035 = vperm.xlu1 %2995, %v2936_v22   ;;  %v2960_v22 = vld [vmem:[%s4338_s6 + $0x1d0] sm:$0xff] }
 0x14c   : > { %2054 = vperm.xlu0 %2996, %v2937_v23   ;;  %2073 = vperm.xlu1 %2995, %v2938_v25   ;;  %v2961_v23 = vld [vmem:[%s4338_s6 + $0x1d8] sm:$0xff]  ;;  %v2962_v25 = vld [vmem:[%s4338_s6 + $0x1e0] sm:$0xff] }
 0x150   : > { %2092 = vperm.xlu0 %2996, %v2939_v29   ;;  %2111 = vperm.xlu1 %2995, %v2940_v30   ;;  %v3755_v29 = vpop.permute.xlu1 %1685  ;;  %v3757_v30 = vpop.permute.xlu0 %1658 }
 0x154   : > { %2130 = vperm.xlu0 %2996, %v2941_v57   ;;  %2157 = vperm.xlu1 %2995, %v2942_v34   ;;  %v2963_v57 = vld [vmem:[%s4338_s6 + $0x1e8] sm:$0xff]  ;;  %v2964_v34 = vld [vmem:[%s4338_s6 + $0x1f0] sm:$0xff] }
 0x158   : > { %2176 = vperm.xlu0 %2996, %v2943_v35   ;;  %2195 = vperm.xlu1 %2995, %v2944_v37  }
 0x15c   : > { %2147 = vrot.lane.b32.xlu0 %v3563_v33, %s3013_s21  ;;  %2145 = vrot.lane.b32.xlu1 %v3561_v50, %s3013_s21 }
 0x160   : > { %2214 = vperm.xlu0 %2996, %v2945_v41   ;;  %2233 = vperm.xlu1 %2995, %v2946_v42  }
 0x164   : > { %2252 = vperm.xlu0 %2996, %v2947_v3   ;;  %2271 = vperm.xlu1 %2995, %v2948_v44  }
 0x168   : > { %2290 = vperm.xlu0 %2996, %v2949_v47   ;;  %2317 = vperm.xlu1 %2995, %v2950_v48   ;;  %v2965_v47 = vld [vmem:[%s4338_s6 + $0x1f8] sm:$0xff] }
 0x16c   : > { %2305 = vrot.lane.b32.xlu0 %v3561_v50, %s3014_s11  ;;  %2307 = vrot.lane.b32.xlu1 %v3563_v33, %s3014_s11 }
 0x170   : > { %2336 = vperm.xlu0 %2996, %v2951_v52   ;;  %2355 = vperm.xlu1 %2995, %v2952_v54  }
 0x174   : > { %2374 = vperm.xlu0 %2996, %v2953_v60   ;;  %2393 = vperm.xlu1 %2995, %v2954_v61  }
 0x178   : > { %2412 = vperm.xlu0 %2996, %v2955_v5   ;;  %2431 = vperm.xlu1 %2995, %v2956_v6  }
 0x17c   : > { %2450 = vperm.xlu0 %2996, %v2957_v7   ;;  %2477 = vperm.xlu1 %2995, %v2958_v9  }
 0x180   : > { %2465 = vrot.lane.b32.xlu0 %v3561_v50, %s3015_s24  ;;  %2467 = vrot.lane.b32.xlu1 %v3563_v33, %s3015_s24 }
 0x184   : > { %2496 = vperm.xlu0 %2996, %v2959_v17   ;;  %2515 = vperm.xlu1 %2995, %v2960_v22  }
 0x188   : > { %2534 = vperm.xlu0 %2996, %v2961_v23   ;;  %2553 = vperm.xlu1 %2995, %v2962_v25  }
 0x18a   : > { %v1355_v35 = vpop.permute.xlu1 %1354  ;;  %v1357_v37 = vpop.permute.xlu0 %1356 }
 0x18b   : > { %v1358_v41 = vsel %vm320_vm0, %v1355_v35, %v1357_v37  ;;  %v1359_v42 = vsel %vm320_vm0, %v1357_v37, %v1355_v35 }
 0x18c   : > { %v3770_v3 = vmul.f32 %v1359_v42, %v3284_v62  ;;  %v3773_v44 = vmul.f32 %v1358_v41, %v3288_v63  ;;  %2572 = vperm.xlu0 %2996, %v2963_v57   ;;  %2591 = vperm.xlu1 %2995, %v2964_v34   ;;  %v2966_v63 = vld [vmem:[%s4338_s6 + $0x200] sm:$0xff]  ;;  %v2969_v41 = vld [vmem:[%s4338_s6 + $0x218] sm:$0xff] }
 0x18d   : > { %v2970_v42 = vld [vmem:[%s4338_s6 + $0x220] sm:$0xff] }
 0x18e   : > { %v1371_v48 = vrot.slane %v3770_v3, %v3263_v55  ;;  %v1375_v52 = vrot.slane %v3773_v44, %v3263_v55  ;;  %v1390_v54 = vrot.slane %v3770_v3, %v3303_v8  ;;  %v1394_v62 = vrot.slane %v3773_v44, %v3303_v8 }
 0x18f   : > { %v1409_v7 = vrot.slane %v3770_v3, %v3309_v11  ;;  %v1413_v9 = vrot.slane %v3773_v44, %v3309_v11  ;;  %v1428_v57 = vrot.slane %v3770_v3, %v3324_v24  ;;  %v1432_v34 = vrot.slane %v3773_v44, %v3324_v24 }
 0x190   : > { %2610 = vperm.xlu0 %2996, %v2965_v47   ;;  %v1376_v60 = vmul.f32 %v1371_v48, %v3659_v36  ;;  %v1377_v61 = vmul.f32 %v1375_v52, %v3659_v36  ;;  %v1395_v5 = vmul.f32 %v1390_v54, %v3663_v58  ;;  %v1396_v6 = vmul.f32 %v1394_v62, %v3663_v58  ;;  %v2967_v36 = vld [vmem:[%s4338_s6 + $0x208] sm:$0xff]  ;;  %v2968_v58 = vld [vmem:[%s4338_s6 + $0x210] sm:$0xff] }
 0x191   : > { %2637 = vperm.xlu1 %2995, %v2966_v63   ;;  %v1414_v23 = vmul.f32 %v1409_v7, %v3661_v38  ;;  %v1415_v25 = vmul.f32 %v1413_v9, %v3661_v38  ;;  %v1433_v38 = vmul.f32 %v1428_v57, %v3683_v46  ;;  %v1434_v47 = vmul.f32 %v1432_v34, %v3683_v46  ;;  %v2972_v46 = vld [vmem:[%s4338_s6 + $0x230] sm:$0xff] }
 0x192   : > { %v1397_v17 = vadd.f32 %v1395_v5, %v1376_v60  ;;  %v1398_v22 = vadd.f32 %v1396_v6, %v1377_v61  ;;  %v1447_v48 = vrot.slane %v3770_v3, %v3408_v12  ;;  %v1451_v52 = vrot.slane %v3773_v44, %v3408_v12  ;;  %v2971_v61 = vld [vmem:[%s4338_s6 + $0x228] sm:$0xff] }
 0x193   : > { %v1466_v7 = vrot.slane %v3770_v3, %v3419_v28  ;;  %v1470_v9 = vrot.slane %v3773_v44, %v3419_v28  ;;  %v1485_v34 = vrot.slane %v3770_v3, %v3431_v43 }
 0x194   : > { %2625 = vrot.lane.b32.xlu0 %v3561_v50, %s3016_s16  ;;  %v1416_v35 = vadd.f32 %v1414_v23, %v1397_v17  ;;  %v1417_v37 = vadd.f32 %v1415_v25, %v1398_v22  ;;  %v1452_v5 = vmul.f32 %v1447_v48, %v3681_v45  ;;  %v1453_v6 = vmul.f32 %v1451_v52, %v3681_v45  ;;  %v2973_v23 = vld [vmem:[%s4338_s6 + $0x238] sm:$0xff]  ;;  %v2785_v45 = vld [vmem:[%s4339_s7] sm:$0xff] }
 0x195   : > { %2627 = vrot.lane.b32.xlu1 %v3563_v33, %s3016_s16  ;;  %v1471_v25 = vmul.f32 %v1466_v7, %v3693_v32  ;;  %v1472_v57 = vmul.f32 %v1470_v9, %v3693_v32  ;;  %v1508_v48 = vrot.slane %v3773_v44, %v3447_v10  ;;  %v1490_v32 = vmul.f32 %v1485_v34, %v3691_v49 }
 0x196   : > { %v1435_v63 = vadd.f32 %v1433_v38, %v1416_v35  ;;  %v1436_v60 = vadd.f32 %v1434_v47, %v1417_v37  ;;  %v1489_v35 = vrot.slane %v3773_v44, %v3431_v43  ;;  %v1504_v47 = vrot.slane %v3770_v3, %v3447_v10 }
 0x197   : > { %v1510_v9 = vmul.f32 %v1508_v48, %v3707_v59 }
 0x198   : > { %2656 = vperm.xlu0 %2996, %v2967_v36   ;;  %v1454_v36 = vadd.f32 %v1452_v5, %v1435_v63  ;;  %v1491_v52 = vmul.f32 %v1489_v35, %v3691_v49  ;;  %v1509_v44 = vmul.f32 %v1504_v47, %v3707_v59 }
 0x199   : > { %2675 = vperm.xlu1 %2995, %v2968_v58   ;;  %v1455_v58 = vadd.f32 %v1453_v6, %v1436_v60 }
 0x19b   : > { %v3825_v54 = vpop.permute.xlu1 %1723  ;;  %v3827_v62 = vpop.permute.xlu0 %1704  ;;  %v1474_v38 = vadd.f32 %v1472_v57, %v1455_v58 }
 0x19c   : > { %2694 = vperm.xlu0 %2996, %v2969_v41  }
 0x19d   : > { %2713 = vperm.xlu1 %2995, %v2970_v42   ;;  %v1473_v42 = vadd.f32 %v1471_v25, %v1454_v36  ;;  %v1493_v6 = vadd.f32 %v1491_v52, %v1474_v38 }
 0x19f   : > { %v3841_v17 = vpop.permute.xlu1 %1761  ;;  %v3843_v22 = vpop.permute.xlu0 %1742  ;;  %v1492_v5 = vadd.f32 %v1490_v32, %v1473_v42  ;;  %v1512_v34 = vadd.f32 %v1510_v9, %v1493_v6 }
 0x1a0   : > { %2732 = vperm.xlu0 %2996, %v2971_v61  }
 0x1a1   : > { %2751 = vperm.xlu1 %2995, %v2972_v46   ;;  %v1511_v57 = vadd.f32 %v1509_v44, %v1492_v5 }
 0x1a3   : > { %v1514_v37 = vpop.permute.xlu1 %1513  ;;  %v3857_v41 = vpop.permute.xlu0 %1780 }
 0x1a4   : > { %2770 = vperm.xlu0 %2996, %v2973_v23  }
 0x1a5   : > { %2788 = vperm.xlu1 %2995, %v2785_v45  }
 0x1a7   : > { %v3865_v63 = vpop.permute.xlu1 %1799  ;;  %v1516_v60 = vpop.permute.xlu0 %1515 }
 0x1a8   : > { %v1517_v61 = vsel %vm412_vm1, %v1514_v37, %v1516_v60  ;;  %v1518_v46 = vsel %vm412_vm1, %v1516_v60, %v1514_v37 }
 0x1a9   : > { %v1519_v3 = vmul.f32 %v1518_v46, %v3332_v26  ;;  %v1520_v7 = vmul.f32 %v1517_v61, %v3336_v27 }
 0x1ab   : > { %v1531_v49 = vrot.slane %v1519_v3, %v3263_v55  ;;  %v1535_v36 = vrot.slane %v1520_v7, %v3263_v55  ;;  %v1550_v58 = vrot.slane %v1519_v3, %v3303_v8  ;;  %v1554_v23 = vrot.slane %v1520_v7, %v3303_v8  ;;  %v3879_v45 = vpop.permute.xlu1 %1845  ;;  %v3881_v25 = vpop.permute.xlu0 %1818 }
 0x1ac   : > { %v1569_v26 = vrot.slane %v1519_v3, %v3309_v11  ;;  %v1573_v27 = vrot.slane %v1520_v7, %v3309_v11  ;;  %v1588_v37 = vrot.slane %v1519_v3, %v3324_v24  ;;  %v1592_v42 = vrot.slane %v1520_v7, %v3324_v24 }
 0x1ad   : > { %v1536_v59 = vmul.f32 %v1531_v49, %v3705_v56  ;;  %v1537_v35 = vmul.f32 %v1535_v36, %v3705_v56  ;;  %v1555_v48 = vmul.f32 %v1550_v58, %v3717_v4  ;;  %v1556_v32 = vmul.f32 %v1554_v23, %v3717_v4 }
 0x1ae   : > { %v1574_v61 = vmul.f32 %v1569_v26, %v3715_v0  ;;  %v1575_v46 = vmul.f32 %v1573_v27, %v3715_v0  ;;  %v1607_v6 = vrot.slane %v1519_v3, %v3408_v12  ;;  %v1611_v44 = vrot.slane %v1520_v7, %v3408_v12 }
 0x1af   : > { %v1538_v38 = vadd.f32 %v1536_v59, %v1511_v57  ;;  %v1539_v47 = vadd.f32 %v1537_v35, %v1512_v34  ;;  %v3891_v52 = vpop.permute.xlu1 %1883  ;;  %v3893_v60 = vpop.permute.xlu0 %1864  ;;  %v1593_v9 = vmul.f32 %v1588_v37, %v3733_v15  ;;  %v1594_v49 = vmul.f32 %v1592_v42, %v3733_v15 }
 0x1b0   : > { %v1626_v58 = vrot.slane %v1519_v3, %v3419_v28  ;;  %v1630_v23 = vrot.slane %v1520_v7, %v3419_v28  ;;  %v1645_v0 = vrot.slane %v1519_v3, %v3431_v43  ;;  %v1649_v27 = vrot.slane %v1520_v7, %v3431_v43 }
 0x1b1   : > { %v1557_v5 = vadd.f32 %v1555_v48, %v1538_v38  ;;  %v1558_v56 = vadd.f32 %v1556_v32, %v1539_v47  ;;  %v1612_v35 = vmul.f32 %v1607_v6, %v3731_v14  ;;  %v1613_v37 = vmul.f32 %v1611_v44, %v3731_v14 }
 0x1b2   : > { %v1664_v15 = vrot.slane %v1519_v3, %v3447_v10  ;;  %v1668_v42 = vrot.slane %v1520_v7, %v3447_v10  ;;  %v1631_v48 = vmul.f32 %v1626_v58, %v3737_v16  ;;  %v1632_v32 = vmul.f32 %v1630_v23, %v3737_v16 }
 0x1b3   : > { %v1576_v36 = vadd.f32 %v1574_v61, %v1557_v5  ;;  %v1577_v4 = vadd.f32 %v1575_v46, %v1558_v56  ;;  %v1674_v57 = vpop.permute.xlu1 %1673  ;;  %v3903_v26 = vpop.permute.xlu0 %1902  ;;  %v1650_v5 = vmul.f32 %v1645_v0, %v3735_v13  ;;  %v1651_v56 = vmul.f32 %v1649_v27, %v3735_v13 }
 0x1b5   : > { %v1595_v34 = vadd.f32 %v1593_v9, %v1576_v36  ;;  %v1596_v59 = vadd.f32 %v1594_v49, %v1577_v4  ;;  %v1669_v9 = vmul.f32 %v1664_v15, %v3757_v30  ;;  %v1670_v49 = vmul.f32 %v1668_v42, %v3757_v30 }
 0x1b7   : > { %v1614_v38 = vadd.f32 %v1612_v35, %v1595_v34  ;;  %v1615_v47 = vadd.f32 %v1613_v37, %v1596_v59  ;;  %v3913_v61 = vpop.permute.xlu1 %1921  ;;  %v1676_v46 = vpop.permute.xlu0 %1675 }
 0x1b8   : > { %v1677_v14 = vsel %vm505_vm2, %v1674_v57, %v1676_v46  ;;  %v1678_v3 = vsel %vm505_vm2, %v1676_v46, %v1674_v57 }
 0x1b9   : > { %v1633_v7 = vadd.f32 %v1631_v48, %v1614_v38  ;;  %v1634_v6 = vadd.f32 %v1632_v32, %v1615_v47  ;;  %v3922_v44 = vmul.f32 %v1678_v3, %v3373_v18  ;;  %v3925_v16 = vmul.f32 %v1677_v14, %v3377_v19 }
 0x1bb   : > { %v1652_v36 = vadd.f32 %v1650_v5, %v1633_v7  ;;  %v1653_v13 = vadd.f32 %v1651_v56, %v1634_v6  ;;  %v1691_v4 = vrot.slane %v3922_v44, %v3263_v55  ;;  %v1695_v58 = vrot.slane %v3925_v16, %v3263_v55  ;;  %v3933_v23 = vpop.permute.xlu1 %1959  ;;  %v3935_v57 = vpop.permute.xlu0 %1940 }
 0x1bc   : > { %v1710_v18 = vrot.slane %v3922_v44, %v3303_v8  ;;  %v1714_v19 = vrot.slane %v3925_v16, %v3303_v8  ;;  %v1729_v30 = vrot.slane %v3922_v44, %v3309_v11  ;;  %v1733_v0 = vrot.slane %v3925_v16, %v3309_v11 }
 0x1bd   : > { %v1671_v27 = vadd.f32 %v1669_v9, %v1652_v36  ;;  %v1672_v34 = vadd.f32 %v1670_v49, %v1653_v13  ;;  %v1696_v59 = vmul.f32 %v1691_v4, %v3755_v29  ;;  %v1697_v35 = vmul.f32 %v1695_v58, %v3755_v29 }
 0x1be   : > { %v1715_v37 = vmul.f32 %v1710_v18, %v3827_v62  ;;  %v1716_v15 = vmul.f32 %v1714_v19, %v3827_v62  ;;  %v1748_v47 = vrot.slane %v3922_v44, %v3324_v24  ;;  %v1752_v48 = vrot.slane %v3925_v16, %v3324_v24 }
 0x1bf   : > { %v1698_v42 = vadd.f32 %v1696_v59, %v1671_v27  ;;  %v1699_v38 = vadd.f32 %v1697_v35, %v1672_v34  ;;  %v3953_v32 = vpop.permute.xlu1 %1997  ;;  %v3955_v46 = vpop.permute.xlu0 %1978  ;;  %v1734_v5 = vmul.f32 %v1729_v30, %v3825_v54  ;;  %v1735_v29 = vmul.f32 %v1733_v0, %v3825_v54 }
 0x1c0   : > { %v1767_v62 = vrot.slane %v3922_v44, %v3408_v12  ;;  %v1771_v3 = vrot.slane %v3925_v16, %v3408_v12  ;;  %v1786_v7 = vrot.slane %v3922_v44, %v3419_v28  ;;  %v1790_v6 = vrot.slane %v3925_v16, %v3419_v28 }
 0x1c1   : > { %v1717_v56 = vadd.f32 %v1715_v37, %v1698_v42  ;;  %v1718_v14 = vadd.f32 %v1716_v15, %v1699_v38  ;;  %v1753_v9 = vmul.f32 %v1748_v47, %v3843_v22  ;;  %v1754_v49 = vmul.f32 %v1752_v48, %v3843_v22 }
 0x1c2   : > { %v1805_v58 = vrot.slane %v3922_v44, %v3431_v43  ;;  %v1809_v18 = vrot.slane %v3925_v16, %v3431_v43  ;;  %v1772_v0 = vmul.f32 %v1767_v62, %v3841_v17  ;;  %v1773_v27 = vmul.f32 %v1771_v3, %v3841_v17 }
 0x1c3   : > { %v1834_v36 = vpop.permute.xlu1 %1833  ;;  %v3969_v54 = vpop.permute.xlu0 %2016  ;;  %v1736_v13 = vadd.f32 %v1734_v5, %v1717_v56  ;;  %v1737_v4 = vadd.f32 %v1735_v29, %v1718_v14  ;;  %v1824_v22 = vrot.slane %v3922_v44, %v3447_v10  ;;  %v1828_v34 = vrot.slane %v3925_v16, %v3447_v10 }
 0x1c4   : > { %v1791_v42 = vmul.f32 %v1786_v7, %v3857_v41  ;;  %v1792_v38 = vmul.f32 %v1790_v6, %v3857_v41  ;;  %v1810_v44 = vmul.f32 %v1805_v58, %v3865_v63  ;;  %v1811_v48 = vmul.f32 %v1809_v18, %v3865_v63 }
 0x1c5   : > { %v1755_v19 = vadd.f32 %v1753_v9, %v1736_v13  ;;  %v1756_v30 = vadd.f32 %v1754_v49, %v1737_v4  ;;  %v1829_v41 = vmul.f32 %v1824_v22, %v3881_v25  ;;  %v1830_v14 = vmul.f32 %v1828_v34, %v3881_v25 }
 0x1c7   : > { %v3981_v59 = vpop.permute.xlu1 %2035  ;;  %v1836_v35 = vpop.permute.xlu0 %1835  ;;  %v1774_v37 = vadd.f32 %v1772_v0, %v1755_v19  ;;  %v1775_v15 = vadd.f32 %v1773_v27, %v1756_v30 }
 0x1c8   : > { %v1837_v47 = vsel %vm598_vm3, %v1834_v36, %v1836_v35  ;;  %v1838_v17 = vsel %vm598_vm3, %v1836_v35, %v1834_v36 }
 0x1c9   : > { %v3992_v16 = vmul.f32 %v1838_v17, %v3399_v1  ;;  %v3995_v5 = vmul.f32 %v1837_v47, %v3403_v2  ;;  %v1793_v29 = vadd.f32 %v1791_v42, %v1774_v37  ;;  %v1794_v56 = vadd.f32 %v1792_v38, %v1775_v15 }
 0x1cb   : > { %v3999_v62 = vpop.permute.xlu1 %2073  ;;  %v1812_v3 = vadd.f32 %v1810_v44, %v1793_v29  ;;  %v1813_v7 = vadd.f32 %v1811_v48, %v1794_v56  ;;  %v1851_v6 = vrot.slane %v3992_v16, %v3263_v55  ;;  %v1855_v1 = vrot.slane %v3995_v5, %v3263_v55  ;;  %v4005_v63 = vpop.permute.xlu0 %2054 }
 0x1cc   : > { %v1870_v2 = vrot.slane %v3992_v16, %v3303_v8  ;;  %v1874_v9 = vrot.slane %v3995_v5, %v3303_v8  ;;  %v1889_v18 = vrot.slane %v3992_v16, %v3309_v11  ;;  %v1893_v19 = vrot.slane %v3995_v5, %v3309_v11 }
 0x1cd   : > { %v1831_v49 = vadd.f32 %v1829_v41, %v1812_v3  ;;  %v1832_v25 = vadd.f32 %v1830_v14, %v1813_v7  ;;  %v1856_v36 = vmul.f32 %v1851_v6, %v3879_v45  ;;  %v1857_v13 = vmul.f32 %v1855_v1, %v3879_v45 }
 0x1ce   : > { %v1875_v4 = vmul.f32 %v1870_v2, %v3893_v60  ;;  %v1876_v58 = vmul.f32 %v1874_v9, %v3893_v60  ;;  %v1908_v27 = vrot.slane %v3992_v16, %v3324_v24  ;;  %v1912_v22 = vrot.slane %v3995_v5, %v3324_v24 }
 0x1cf   : > { %v1858_v30 = vadd.f32 %v1856_v36, %v1831_v49  ;;  %v1859_v0 = vadd.f32 %v1857_v13, %v1832_v25  ;;  %v4023_v34 = vpop.permute.xlu1 %2111  ;;  %v4025_v45 = vpop.permute.xlu0 %2092  ;;  %v1927_v60 = vrot.slane %v3992_v16, %v3408_v12  ;;  %v1931_v35 = vrot.slane %v3995_v5, %v3408_v12 }
 0x1d0   : > { %v1894_v42 = vmul.f32 %v1889_v18, %v3891_v52  ;;  %v1895_v38 = vmul.f32 %v1893_v19, %v3891_v52  ;;  %v1946_v47 = vrot.slane %v3992_v16, %v3419_v28  ;;  %v1950_v17 = vrot.slane %v3995_v5, %v3419_v28 }
 0x1d1   : > { %v1877_v37 = vadd.f32 %v1875_v4, %v1858_v30  ;;  %v1878_v15 = vadd.f32 %v1876_v58, %v1859_v0  ;;  %v1913_v29 = vmul.f32 %v1908_v27, %v3903_v26  ;;  %v1914_v56 = vmul.f32 %v1912_v22, %v3903_v26 }
 0x1d2   : > { %v1932_v3 = vmul.f32 %v1927_v60, %v3913_v61  ;;  %v1933_v52 = vmul.f32 %v1931_v35, %v3913_v61  ;;  %v1965_v1 = vrot.slane %v3992_v16, %v3431_v43  ;;  %v1969_v2 = vrot.slane %v3995_v5, %v3431_v43 }
 0x1d3   : > { %v1896_v44 = vadd.f32 %v1894_v42, %v1877_v37  ;;  %v1897_v48 = vadd.f32 %v1895_v38, %v1878_v15  ;;  %v4039_v41 = vpop.permute.xlu1 %2157  ;;  %v4041_v14 = vpop.permute.xlu0 %2130  ;;  %v1951_v9 = vmul.f32 %v1946_v47, %v3935_v57  ;;  %v1952_v26 = vmul.f32 %v1950_v17, %v3935_v57 }
 0x1d4   : > { %v1984_v36 = vrot.slane %v3992_v16, %v3447_v10  ;;  %v1988_v61 = vrot.slane %v3995_v5, %v3447_v10  ;;  %v1970_v19 = vmul.f32 %v1965_v1, %v3933_v23  ;;  %v1971_v30 = vmul.f32 %v1969_v2, %v3933_v23 }
 0x1d5   : > { %v1915_v7 = vadd.f32 %v1913_v29, %v1896_v44  ;;  %v1916_v6 = vadd.f32 %v1914_v56, %v1897_v48  ;;  %v2007_v57 = vrot.slane %v3563_v33, %v3263_v55  ;;  %v2003_v0 = vrot.slane %v3561_v50, %v3263_v55 }
 0x1d6   : > { %v1989_v5 = vmul.f32 %v1984_v36, %v3955_v46  ;;  %v1990_v22 = vmul.f32 %v1988_v61, %v3955_v46  ;;  %v2022_v37 = vrot.slane %v3561_v50, %v3303_v8  ;;  %v2026_v23 = vrot.slane %v3563_v33, %v3303_v8 }
 0x1d7   : > { %v1934_v49 = vadd.f32 %v1932_v3, %v1915_v7  ;;  %v1935_v25 = vadd.f32 %v1933_v52, %v1916_v6  ;;  %v4055_v13 = vpop.permute.xlu1 %2195  ;;  %v4057_v4 = vpop.permute.xlu0 %2176  ;;  %v2008_v15 = vmul.f32 %v2003_v0, %v3953_v32  ;;  %v2009_v42 = vmul.f32 %v2007_v57, %v3953_v32 }
 0x1d8   : > { %v2045_v17 = vrot.slane %v3563_v33, %v3309_v11  ;;  %v2041_v46 = vrot.slane %v3561_v50, %v3309_v11  ;;  %v2027_v44 = vmul.f32 %v2022_v37, %v3969_v54  ;;  %v2028_v48 = vmul.f32 %v2026_v23, %v3969_v54 }
 0x1d9   : > { %v1953_v58 = vadd.f32 %v1951_v9, %v1934_v49  ;;  %v1954_v18 = vadd.f32 %v1952_v26, %v1935_v25  ;;  %v2060_v6 = vrot.slane %v3561_v50, %v3324_v24  ;;  %v2064_v1 = vrot.slane %v3563_v33, %v3324_v24 }
 0x1da   : > { %v2046_v32 = vmul.f32 %v2041_v46, %v3981_v59  ;;  %v2047_v7 = vmul.f32 %v2045_v17, %v3981_v59  ;;  %v2083_v49 = vrot.slane %v3563_v33, %v3408_v12  ;;  %v2079_v59 = vrot.slane %v3561_v50, %v3408_v12 }
 0x1db   : > { %v1972_v16 = vadd.f32 %v1970_v19, %v1953_v58  ;;  %v1973_v27 = vadd.f32 %v1971_v30, %v1954_v18  ;;  %v2146_v60 = vpop.permute.xlu1 %2145  ;;  %v2148_v35 = vpop.permute.xlu0 %2147  ;;  %v2065_v61 = vmul.f32 %v2060_v6, %v4005_v63  ;;  %v2066_v58 = vmul.f32 %v2064_v1, %v4005_v63 }
 0x1dc   : > { %v2149_v54 = vsel %vm807_vm4, %v2146_v60, %v2148_v35  ;;  %v2150_v26 = vsel %vm807_vm4, %v2148_v35, %v2146_v60  ;;  %v2098_v30 = vrot.slane %v3561_v50, %v3419_v28  ;;  %v2102_v57 = vrot.slane %v3563_v33, %v3419_v28 }
 0x1dd   : > { %v1991_v38 = vadd.f32 %v1989_v5, %v1972_v16  ;;  %v1992_v47 = vadd.f32 %v1990_v22, %v1973_v27  ;;  %v4108_v0 = vmul.f32 %v2149_v54, %v3458_v39  ;;  %v4111_v16 = vmul.f32 %v2150_v26, %v3462_v40 }
 0x1de   : > { %v2084_v27 = vmul.f32 %v2079_v59, %v3999_v62  ;;  %v2085_v63 = vmul.f32 %v2083_v49, %v3999_v62  ;;  %v2121_v60 = vrot.slane %v3563_v33, %v3431_v43  ;;  %v2117_v35 = vrot.slane %v3561_v50, %v3431_v43 }
 0x1df   : > { %v2010_v29 = vadd.f32 %v2008_v15, %v1991_v38  ;;  %v2011_v56 = vadd.f32 %v2009_v42, %v1992_v47  ;;  %v4079_v3 = vpop.permute.xlu1 %2233  ;;  %v4081_v52 = vpop.permute.xlu0 %2214  ;;  %v2103_v39 = vmul.f32 %v2098_v30, %v4025_v45  ;;  %v2104_v15 = vmul.f32 %v2102_v57, %v4025_v45 }
 0x1e0   : > { %v2136_v62 = vrot.slane %v3561_v50, %v3447_v10  ;;  %v2140_v38 = vrot.slane %v3563_v33, %v3447_v10  ;;  %v2163_v47 = vrot.slane %v4108_v0, %v3263_v55  ;;  %v2167_v17 = vrot.slane %v4111_v16, %v3263_v55 }
 0x1e1   : > { %v2029_v2 = vadd.f32 %v2027_v44, %v2010_v29  ;;  %v2030_v9 = vadd.f32 %v2028_v48, %v2011_v56  ;;  %v2122_v46 = vmul.f32 %v2117_v35, %v4023_v34  ;;  %v2123_v45 = vmul.f32 %v2121_v60, %v4023_v34 }
 0x1e2   : > { %v2182_v29 = vrot.slane %v4108_v0, %v3303_v8  ;;  %v2186_v50 = vrot.slane %v4111_v16, %v3303_v8  ;;  %v2169_v34 = vmul.f32 %v2167_v17, %v4039_v41  ;;  %v2201_v26 = vrot.slane %v4108_v0, %v3309_v11 }
 0x1e3   : > { %v2048_v25 = vadd.f32 %v2046_v32, %v2029_v2  ;;  %v2049_v36 = vadd.f32 %v2047_v7, %v2030_v9  ;;  %v4099_v18 = vpop.permute.xlu1 %2271  ;;  %v4101_v19 = vpop.permute.xlu0 %2252  ;;  %v2141_v32 = vmul.f32 %v2136_v62, %v4041_v14  ;;  %v2142_v7 = vmul.f32 %v2140_v38, %v4041_v14 }
 0x1e4   : > { %v2168_v2 = vmul.f32 %v2163_v47, %v4039_v41  ;;  %v2205_v49 = vrot.slane %v4111_v16, %v3309_v11  ;;  %v2187_v59 = vmul.f32 %v2182_v29, %v4057_v4  ;;  %v2224_v41 = vrot.slane %v4111_v16, %v3324_v24 }
 0x1e5   : > { %v2067_v5 = vadd.f32 %v2065_v61, %v2048_v25  ;;  %v2068_v22 = vadd.f32 %v2066_v58, %v2049_v36  ;;  %v2188_v25 = vmul.f32 %v2186_v50, %v4057_v4  ;;  %v2220_v61 = vrot.slane %v4108_v0, %v3324_v24 }
 0x1e6   : > { %v2239_v57 = vrot.slane %v4108_v0, %v3408_v12  ;;  %v2206_v4 = vmul.f32 %v2201_v26, %v4055_v13  ;;  %v2277_v29 = vrot.slane %v4108_v0, %v3431_v43 }
 0x1e7   : > { %v2086_v37 = vadd.f32 %v2084_v27, %v2067_v5  ;;  %v2087_v23 = vadd.f32 %v2085_v63, %v2068_v22  ;;  %v4121_v40 = vpop.permute.xlu1 %2317  ;;  %v4123_v42 = vpop.permute.xlu0 %2290  ;;  %v2243_v27 = vrot.slane %v4111_v16, %v3408_v12  ;;  %v2207_v22 = vmul.f32 %v2205_v49, %v4055_v13 }
 0x1e8   : > { %v2244_v47 = vmul.f32 %v2239_v57, %v4079_v3  ;;  %v2258_v13 = vrot.slane %v4108_v0, %v3419_v28 }
 0x1e9   : > { %v2105_v44 = vadd.f32 %v2103_v39, %v2086_v37  ;;  %v2106_v48 = vadd.f32 %v2104_v15, %v2087_v23  ;;  %v2225_v39 = vmul.f32 %v2220_v61, %v4081_v52  ;;  %v2226_v15 = vmul.f32 %v2224_v41, %v4081_v52 }
 0x1ea   : > { %v2245_v17 = vmul.f32 %v2243_v27, %v4079_v3  ;;  %v2281_v3 = vrot.slane %v4111_v16, %v3431_v43 }
 0x1eb   : > { %v2124_v56 = vadd.f32 %v2122_v46, %v2105_v44  ;;  %v2125_v33 = vadd.f32 %v2123_v45, %v2106_v48  ;;  %v2308_v6 = vpop.permute.xlu1 %2307  ;;  %v2306_v1 = vpop.permute.xlu0 %2305  ;;  %v2262_v46 = vrot.slane %v4111_v16, %v3419_v28 }
 0x1ec   : > { %v2309_v60 = vsel %vm900_vm5, %v2306_v1, %v2308_v6  ;;  %v2310_v35 = vsel %vm900_vm5, %v2308_v6, %v2306_v1  ;;  %v2296_v1 = vrot.slane %v4108_v0, %v3447_v10 }
 0x1ed   : > { %v2143_v9 = vadd.f32 %v2141_v32, %v2124_v56  ;;  %v2144_v54 = vadd.f32 %v2142_v7, %v2125_v33  ;;  %v4174_v48 = vmul.f32 %v2309_v60, %v3481_v31  ;;  %v4177_v52 = vmul.f32 %v2310_v35, %v3485_v51 }
 0x1ee   : > { %v2263_v33 = vmul.f32 %v2258_v13, %v4101_v19  ;;  %v2264_v32 = vmul.f32 %v2262_v46, %v4101_v19  ;;  %v2282_v31 = vmul.f32 %v2277_v29, %v4099_v18  ;;  %v2283_v51 = vmul.f32 %v2281_v3, %v4099_v18 }
 0x1ef   : > { %v2170_v36 = vadd.f32 %v2168_v2, %v2143_v9  ;;  %v2171_v14 = vadd.f32 %v2169_v34, %v2144_v54  ;;  %v2356_v58 = vpop.permute.xlu1 %2355  ;;  %v2337_v30 = vpop.permute.xlu0 %2336  ;;  %v2300_v2 = vrot.slane %v4111_v16, %v3447_v10  ;;  %v2323_v54 = vrot.slane %v4174_v48, %v3263_v55 }
 0x1f0   : > { %v2327_v19 = vrot.slane %v4177_v52, %v3263_v55  ;;  %v2301_v26 = vmul.f32 %v2296_v1, %v4123_v42  ;;  %v2342_v0 = vrot.slane %v4174_v48, %v3303_v8  ;;  %v2346_v16 = vrot.slane %v4177_v52, %v3303_v8 }
 0x1f1   : > { %v2189_v63 = vadd.f32 %v2187_v59, %v2170_v36  ;;  %v2190_v5 = vadd.f32 %v2188_v25, %v2171_v14  ;;  %v2302_v49 = vmul.f32 %v2300_v2, %v4123_v42  ;;  %v2361_v14 = vrot.slane %v4174_v48, %v3309_v11 }
 0x1f2   : > { %v2365_v61 = vrot.slane %v4177_v52, %v3309_v11  ;;  %v2328_v42 = vmul.f32 %v2323_v54, %v4121_v40  ;;  %v2329_v27 = vmul.f32 %v2327_v19, %v4121_v40  ;;  %v2399_v13 = vrot.slane %v4174_v48, %v3408_v12 }
 0x1f3   : > { %v2208_v37 = vadd.f32 %v2206_v4, %v2189_v63  ;;  %v2209_v23 = vadd.f32 %v2207_v22, %v2190_v5  ;;  %v4165_v62 = vpop.permute.xlu1 %2393  ;;  %v2375_v38 = vpop.permute.xlu0 %2374  ;;  %v2347_v4 = vmul.f32 %v2342_v0, %v2337_v30  ;;  %v2348_v22 = vmul.f32 %v2346_v16, %v2337_v30 }
 0x1f4   : > { %v2403_v40 = vrot.slane %v4177_v52, %v3408_v12  ;;  %v2460_v0 = vrot.slane %v4177_v52, %v3447_v10 }
 0x1f5   : > { %v2227_v45 = vadd.f32 %v2225_v39, %v2208_v37  ;;  %v2228_v44 = vadd.f32 %v2226_v15, %v2209_v23  ;;  %v2366_v37 = vmul.f32 %v2361_v14, %v2356_v58  ;;  %v2367_v23 = vmul.f32 %v2365_v61, %v2356_v58 }
 0x1f7   : > { %v2246_v50 = vadd.f32 %v2244_v47, %v2227_v45  ;;  %v2247_v56 = vadd.f32 %v2245_v17, %v2228_v44  ;;  %v4185_v7 = vpop.permute.xlu1 %2431  ;;  %v2413_v6 = vpop.permute.xlu0 %2412  ;;  %v2380_v47 = vrot.slane %v4174_v48, %v3324_v24  ;;  %v2384_v17 = vrot.slane %v4177_v52, %v3324_v24 }
 0x1f9   : > { %v2265_v34 = vadd.f32 %v2263_v33, %v2246_v50  ;;  %v2266_v9 = vadd.f32 %v2264_v32, %v2247_v56  ;;  %v2385_v44 = vmul.f32 %v2380_v47, %v2375_v38  ;;  %v2386_v29 = vmul.f32 %v2384_v17, %v2375_v38 }
 0x1fa   : > { %v2404_v56 = vmul.f32 %v2399_v13, %v4165_v62  ;;  %v2405_v33 = vmul.f32 %v2403_v40, %v4165_v62  ;;  %v2418_v32 = vrot.slane %v4174_v48, %v3419_v28  ;;  %v2437_v38 = vrot.slane %v4174_v48, %v3431_v43 }
 0x1fb   : > { %v2284_v59 = vadd.f32 %v2282_v31, %v2265_v34  ;;  %v2285_v18 = vadd.f32 %v2283_v51, %v2266_v9  ;;  %v4203_v25 = vpop.permute.xlu1 %2477  ;;  %v2451_v36 = vpop.permute.xlu0 %2450  ;;  %v2422_v31 = vrot.slane %v4177_v52, %v3419_v28  ;;  %v2441_v62 = vrot.slane %v4177_v52, %v3431_v43 }
 0x1fc   : > { %v2423_v19 = vmul.f32 %v2418_v32, %v2413_v6 }
 0x1fd   : > { %v2303_v41 = vadd.f32 %v2301_v26, %v2284_v59  ;;  %v2304_v57 = vadd.f32 %v2302_v49, %v2285_v18  ;;  %v2424_v26 = vmul.f32 %v2422_v31, %v2413_v6  ;;  %v2442_v18 = vmul.f32 %v2437_v38, %v4185_v7 }
 0x1ff   : > { %v2330_v63 = vadd.f32 %v2328_v42, %v2303_v41  ;;  %v2331_v5 = vadd.f32 %v2329_v27, %v2304_v57  ;;  %v2468_v60 = vpop.permute.xlu1 %2467  ;;  %v2466_v35 = vpop.permute.xlu0 %2465  ;;  %v2462_v57 = vmul.f32 %v2460_v0, %v2451_v36 }
 0x200   : > { %v2469_v30 = vsel %vm993_vm6, %v2466_v35, %v2468_v60  ;;  %v2470_v58 = vsel %vm993_vm6, %v2468_v60, %v2466_v35 }
 0x201   : > { %v2349_v39 = vadd.f32 %v2347_v4, %v2330_v63  ;;  %v2350_v15 = vadd.f32 %v2348_v22, %v2331_v5  ;;  %v4230_v2 = vmul.f32 %v2469_v30, %v3504_v20  ;;  %v4233_v34 = vmul.f32 %v2470_v58, %v3508_v21 }
 0x202   : > { %v2443_v20 = vmul.f32 %v2441_v62, %v4185_v7  ;;  %v2456_v21 = vrot.slane %v4174_v48, %v3447_v10 }
 0x203   : > { %v2368_v46 = vadd.f32 %v2366_v37, %v2349_v39  ;;  %v2369_v45 = vadd.f32 %v2367_v23, %v2350_v15  ;;  %v2516_v3 = vpop.permute.xlu1 %2515  ;;  %v2497_v50 = vpop.permute.xlu0 %2496  ;;  %v2483_v61 = vrot.slane %v4230_v2, %v3263_v55  ;;  %v2487_v6 = vrot.slane %v4233_v34, %v3263_v55 }
 0x204   : > { %v2461_v41 = vmul.f32 %v2456_v21, %v2451_v36  ;;  %v2502_v7 = vrot.slane %v4230_v2, %v3303_v8  ;;  %v2506_v48 = vrot.slane %v4233_v34, %v3303_v8  ;;  %v2521_v5 = vrot.slane %v4230_v2, %v3309_v11 }
 0x205   : > { %v2387_v51 = vadd.f32 %v2385_v44, %v2368_v46  ;;  %v2388_v1 = vadd.f32 %v2386_v29, %v2369_v45  ;;  %v2525_v4 = vrot.slane %v4233_v34, %v3309_v11  ;;  %v2488_v36 = vmul.f32 %v2483_v61, %v4203_v25 }
 0x206   : > { %v2489_v35 = vmul.f32 %v2487_v6, %v4203_v25  ;;  %v2507_v39 = vmul.f32 %v2502_v7, %v2497_v50  ;;  %v2508_v15 = vmul.f32 %v2506_v48, %v2497_v50  ;;  %v2526_v17 = vmul.f32 %v2521_v5, %v2516_v3 }
 0x207   : > { %v2406_v9 = vadd.f32 %v2404_v56, %v2387_v51  ;;  %v2407_v54 = vadd.f32 %v2405_v33, %v2388_v1  ;;  %v2554_v49 = vpop.permute.xlu1 %2553  ;;  %v2535_v59 = vpop.permute.xlu0 %2534  ;;  %v2527_v13 = vmul.f32 %v2525_v4, %v2516_v3  ;;  %v2540_v46 = vrot.slane %v4230_v2, %v3324_v24 }
 0x208   : > { %v2544_v45 = vrot.slane %v4233_v34, %v3324_v24  ;;  %v2559_v44 = vrot.slane %v4230_v2, %v3408_v12  ;;  %v2563_v25 = vrot.slane %v4233_v34, %v3408_v12  ;;  %v2578_v51 = vrot.slane %v4230_v2, %v3419_v28 }
 0x209   : > { %v2425_v16 = vadd.f32 %v2423_v19, %v2406_v9  ;;  %v2426_v14 = vadd.f32 %v2424_v26, %v2407_v54  ;;  %v2545_v56 = vmul.f32 %v2540_v46, %v2535_v59  ;;  %v2582_v1 = vrot.slane %v4233_v34, %v3419_v28 }
 0x20a   : > { %v2546_v33 = vmul.f32 %v2544_v45, %v2535_v59  ;;  %v2564_v32 = vmul.f32 %v2559_v44, %v2554_v49  ;;  %v2565_v31 = vmul.f32 %v2563_v25, %v2554_v49  ;;  %v2597_v26 = vrot.slane %v4230_v2, %v3431_v43  ;;  %v2998_v59 = vld [vmem:[%s4333_s1 + $0x10] ss:$0 sm:$0xff] }
 0x20b   : > { %v2444_v42 = vadd.f32 %v2442_v18, %v2425_v16  ;;  %v2445_v27 = vadd.f32 %v2443_v20, %v2426_v14  ;;  %v2592_v63 = vpop.permute.xlu1 %2591  ;;  %v2573_v52 = vpop.permute.xlu0 %2572  ;;  %v2601_v49 = vrot.slane %v4233_v34, %v3431_v43  ;;  %v2999_v20 = vld [vmem:[%s4333_s1 + $0x18] ss:$0 sm:$0xff] }
 0x20c   : > { %v2583_v16 = vmul.f32 %v2578_v51, %v2573_v52  ;;  %v2584_v14 = vmul.f32 %v2582_v1, %v2573_v52  ;;  %v2602_v6 = vmul.f32 %v2597_v26, %v2592_v63 }
 0x20d   : > { %v2463_v22 = vadd.f32 %v2461_v41, %v2444_v42  ;;  %v2464_v60 = vadd.f32 %v2462_v57, %v2445_v27  ;;  %v2603_v41 = vmul.f32 %v2601_v49, %v2592_v63  ;;  %v2616_v57 = vrot.slane %v4230_v2, %v3447_v10 }
 0x20e   : > { %v2620_v42 = vrot.slane %v4233_v34, %v3447_v10 }
 0x20f   : > { %v2490_v37 = vadd.f32 %v2488_v36, %v2463_v22  ;;  %v2491_v23 = vadd.f32 %v2489_v35, %v2464_v60  ;;  %v2611_v47 = vpop.permute.xlu0 %2610 }
 0x210   : > { %v2638_v40 = vpop.permute.xlu1 %2637  ;;  %v2621_v4 = vmul.f32 %v2616_v57, %v2611_v47  ;;  %v2622_v22 = vmul.f32 %v2620_v42, %v2611_v47 }
 0x211   : > { %v2509_v30 = vadd.f32 %v2507_v39, %v2490_v37  ;;  %v2510_v58 = vadd.f32 %v2508_v15, %v2491_v23 }
 0x213   : > { %v2528_v29 = vadd.f32 %v2526_v17, %v2509_v30  ;;  %v2529_v50 = vadd.f32 %v2527_v13, %v2510_v58  ;;  %v2626_v3 = vpop.permute.xlu0 %2625 }
 0x214   : > { %v2628_v38 = vpop.permute.xlu1 %2627 }
 0x215   : > { %v2547_v62 = vadd.f32 %v2545_v56, %v2528_v29  ;;  %v2548_v9 = vadd.f32 %v2546_v33, %v2529_v50  ;;  %v2629_v54 = vsel %vm1086_vm7, %v2626_v3, %v2628_v38  ;;  %v2630_v19 = vsel %vm1086_vm7, %v2628_v38, %v2626_v3 }
 0x216   : > { %v4282_v18 = vmul.f32 %v2998_v59, %v2629_v54  ;;  %v4287_v21 = vmul.f32 %v2999_v20, %v2630_v19 }
 0x217   : > { %v2566_v53 = vadd.f32 %v2564_v32, %v2547_v62  ;;  %v2567_v0 = vadd.f32 %v2565_v31, %v2548_v9  ;;  %v2657_v61 = vpop.permute.xlu0 %2656 }
 0x218   : > { %v2643_v48 = vrot.slane %v4282_v18, %v3263_v55  ;;  %v2647_v5 = vrot.slane %v4287_v21, %v3263_v55  ;;  %v2676_v52 = vpop.permute.xlu1 %2675  ;;  %v2662_v63 = vrot.slane %v4282_v18, %v3303_v8  ;;  %v2666_v2 = vrot.slane %v4287_v21, %v3303_v8 }
 0x219   : > { %v2585_v27 = vadd.f32 %v2583_v16, %v2566_v53  ;;  %v2586_v7 = vadd.f32 %v2584_v14, %v2567_v0  ;;  %v2681_v34 = vrot.slane %v4282_v18, %v3309_v11  ;;  %v2685_v35 = vrot.slane %v4287_v21, %v3309_v11 }
 0x21a   : > { %v2648_v39 = vmul.f32 %v2643_v48, %v2638_v40  ;;  %v2649_v15 = vmul.f32 %v2647_v5, %v2638_v40  ;;  %v2667_v13 = vmul.f32 %v2662_v63, %v2657_v61  ;;  %v2668_v30 = vmul.f32 %v2666_v2, %v2657_v61 }
 0x21b   : > { %v2604_v60 = vadd.f32 %v2602_v6, %v2585_v27  ;;  %v2605_v36 = vadd.f32 %v2603_v41, %v2586_v7  ;;  %v2695_v37 = vpop.permute.xlu0 %2694  ;;  %v2686_v58 = vmul.f32 %v2681_v34, %v2676_v52  ;;  %v2687_v46 = vmul.f32 %v2685_v35, %v2676_v52 }
 0x21c   : > { %v2714_v45 = vpop.permute.xlu1 %2713  ;;  %v2700_v25 = vrot.slane %v4282_v18, %v3324_v24  ;;  %v2704_v11 = vrot.slane %v4287_v21, %v3324_v24  ;;  %v2719_v29 = vrot.slane %v4282_v18, %v3408_v12  ;;  %v2723_v40 = vrot.slane %v4287_v21, %v3408_v12 }
 0x21d   : > { %v2623_v23 = vadd.f32 %v2621_v4, %v2604_v60  ;;  %v2624_v55 = vadd.f32 %v2622_v22, %v2605_v36  ;;  %v2738_v62 = vrot.slane %v4282_v18, %v3419_v28  ;;  %v2742_v24 = vrot.slane %v4287_v21, %v3419_v28 }
 0x21e   : > { %v2705_v3 = vmul.f32 %v2700_v25, %v2695_v37  ;;  %v2706_v32 = vmul.f32 %v2704_v11, %v2695_v37  ;;  %v2724_v31 = vmul.f32 %v2719_v29, %v2714_v45  ;;  %v2725_v51 = vmul.f32 %v2723_v40, %v2714_v45 }
 0x21f   : > { %v2650_v47 = vadd.f32 %v2648_v39, %v2623_v23  ;;  %v2651_v17 = vadd.f32 %v2649_v15, %v2624_v55  ;;  %v2733_v50 = vpop.permute.xlu0 %2732  ;;  %v2757_v12 = vrot.slane %v4282_v18, %v3431_v43  ;;  %v2761_v54 = vrot.slane %v4287_v21, %v3431_v43 }
 0x220   : > { %v2752_v9 = vpop.permute.xlu1 %2751  ;;  %v2743_v49 = vmul.f32 %v2738_v62, %v2733_v50  ;;  %v2744_v59 = vmul.f32 %v2742_v24, %v2733_v50  ;;  %v2776_v20 = vrot.slane %v4282_v18, %v3447_v10  ;;  %v2780_v53 = vrot.slane %v4287_v21, %v3447_v10 }
 0x221   : > { %v2669_v44 = vadd.f32 %v2667_v13, %v2650_v47  ;;  %v2670_v8 = vadd.f32 %v2668_v30, %v2651_v17  ;;  %v2762_v16 = vmul.f32 %v2757_v12, %v2752_v9  ;;  %v2763_v28 = vmul.f32 %v2761_v54, %v2752_v9 }
 0x223   : > { %v2688_v56 = vadd.f32 %v2686_v58, %v2669_v44  ;;  %v2689_v33 = vadd.f32 %v2687_v46, %v2670_v8  ;;  %v2771_v0 = vpop.permute.xlu0 %2770 }
 0x224   : > { %v2781_v57 = vmul.f32 %v2776_v20, %v2771_v0  ;;  %v2782_v43 = vmul.f32 %v2780_v53, %v2771_v0  ;;  %v2789_v7 = vpop.permute.xlu1 %2788 }
 0x225   : > { %v2707_v1 = vadd.f32 %v2705_v3, %v2688_v56  ;;  %v2708_v38 = vadd.f32 %v2706_v32, %v2689_v33 }
 0x227   : > { %v2726_v19 = vadd.f32 %v2724_v31, %v2707_v1  ;;  %v2727_v26 = vadd.f32 %v2725_v51, %v2708_v38 }
 0x229   : > { %v2745_v14 = vadd.f32 %v2743_v49, %v2726_v19  ;;  %v2746_v61 = vadd.f32 %v2744_v59, %v2727_v26 }
 0x22b   : > { %v2764_v6 = vadd.f32 %v2762_v16, %v2745_v14  ;;  %v2765_v41 = vadd.f32 %v2763_v28, %v2746_v61 }
 0x22d   : > { %v2783_v42 = vadd.f32 %v2781_v57, %v2764_v6  ;;  %v2784_v27 = vadd.f32 %v2782_v43, %v2765_v41 }
 0x22f   : > { %v2791_v18 = vadd.f32 %v2789_v7, %v2783_v42  ;;  %v2792_v48 = vadd.f32 %v2789_v7, %v2784_v27 }
 0x231   : > { %2793 = vst [vmem:[%s305_s17] sm:$0xff] %v2791_v18  ;;  %2794 = vst [vmem:[%s305_s17 + $0x8] sm:$0xff] %v2792_v48 }
 0x232 PF: > { %s18_s27 = sadd.s32 1, %s3006_s27  }
 0x233   : > { %p15_p4 = scmp.ge.s32.totalorder %s18_s27, 4  }
 0x235   :  { %17 = sbr.rel (!%p15_p4) target bundleno = 1 (0x1), region = 195 }

</bundles_post_ra>
